<compile_context>
chip_gen: v6e
topology: v6e:2x2x1
jax: 0.10.0
libtpu: 0.0.40
codegen_flags: <defaults>
</compile_context>

<pallas_src>
import jax
import jax.numpy as jnp
from jax.experimental import pallas as pl
from jax.experimental.pallas import tpu as pltpu


def _encoder_kernel(x_ref,
                    w1_ref, b1_ref,
                    w2_ref,
                    w3g_ref, w3l_ref, b3_ref,
                    w4_ref, b4_ref,
                    out_ref):
    M = x_ref.shape[0]
    TG, C = out_ref.shape
    N = M // TG

    x = x_ref[...]                                                      # (M, 8)

    # first_conv: Conv1d(3,128,1)+BN folded -> ReLU.  K padded 3->8 so it is a
    # single (nearly free) MXU pass instead of VPU broadcast-FMAs.
    h1 = jnp.dot(x, w1_ref[...],
                 preferred_element_type=jnp.float32) + b1_ref[...]      # (M, 128)
    h1 = jnp.maximum(h1, 0.0)

    # Conv1d(128, 256, 1); its bias b2 is folded into b3 on the host.
    feat = jnp.dot(h1, w2_ref[...],
                   preferred_element_type=jnp.float32)                  # (M, 256)

    # Per-group global max over the N points.
    g = jnp.max(feat.reshape(TG, N, -1), axis=1)                        # (TG, 256)

    # second_conv: Conv1d(512,512,1)+BN folded -> ReLU, concat-free:
    #   cat([g_bcast, feat]) @ w3 == g @ w3[:256] + feat @ w3[256:]
    local = jnp.dot(feat, w3l_ref[...],
                    preferred_element_type=jnp.float32)                 # (M, 512)
    glob = jnp.dot(g, w3g_ref[...],
                   preferred_element_type=jnp.float32)                  # (TG, 512)
    h2 = local.reshape(TG, N, -1) + glob[:, None, :] + b3_ref[...]      # (TG, N, 512)
    h2 = jnp.maximum(h2, 0.0).reshape(M, -1)                            # (M, 512)

    # Conv1d(512, C, 1); bias hoisted past the per-group row-max.
    o = jnp.dot(h2, w4_ref[...], preferred_element_type=jnp.float32)    # (M, C)
    out_ref[...] = jnp.max(o.reshape(TG, N, -1), axis=1) + b4_ref[...]  # (TG, C)


def _full_spec(shape):
    nd = len(shape)
    return pl.BlockSpec(shape, lambda i, _nd=nd: (0,) * _nd)


def _choose_tg(bg, n, *, m_cap=2048):
    """Largest TG dividing BG with M = TG*N <= m_cap, preferring M % 256 == 0
    (full v6e/v7x MXU rows), then M % 128 == 0 (v5e MXU rows).  No >=2-step
    requirement: on single-TC v5e/v6e extra grid steps are pure overhead."""
    divisors = [d for d in range(1, bg + 1) if bg % d == 0]
    fitting = [d for d in divisors if d * n <= m_cap] or [divisors[0]]
    for mult in (256, 128):
        aligned = [d for d in fitting if (d * n) % mult == 0]
        if aligned:
            return max(aligned)
    return max(fitting)


def old_encoder_forward(point_groups, params, *, tg=None):
    """point_groups: (B, G, N, 3) float32 -> (B, G, C) float32."""
    B, G, N, _ = point_groups.shape
    BG = B * G
    C = params["w4"].shape[0]
    eps = 1e-5

    if tg is None:
        tg = _choose_tg(BG, N)
    assert BG % tg == 0, (BG, tg)
    nb = BG // tg

    # Zero-pad the 3 input channels to 8 lanes so the first conv is an MXU op.
    x = point_groups.reshape(BG * N, 3).astype(jnp.float32)
    x_pad = jnp.zeros((BG * N, 8), jnp.float32).at[:, :3].set(x)

    # Fold eval-mode BN into the adjacent conv weights/biases.
    s1 = params["gamma1"] / jnp.sqrt(params["rv1"] + eps)
    t1 = params["beta1"] - params["rm1"] * s1
    s2 = params["gamma2"] / jnp.sqrt(params["rv2"] + eps)
    t2 = params["beta2"] - params["rm2"] * s2

    w1f = jnp.zeros((8, 128), jnp.float32).at[:3, :].set(
        params["w1"].T * s1[None, :])                  # (8, 128), rows 3..7 zero
    b1f = (params["b1"] * s1 + t1).reshape(1, -1)      # (1, 128)
    w2t = params["w2"].T                               # (128, 256)
    w3f = params["w3"].T * s2[None, :]                 # (512, 512), BN folded
    w3g = w3f[:256]                                    # acts on broadcast global feat
    w3l = w3f[256:]                                    # acts on per-point feat
    # b2 commutes with the per-group max and distributes through both halves.
    b3f = (params["b3"] * s2 + t2
           + params["b2"] @ (w3g + w3l)).reshape(1, -1)  # (1, 512)
    w4t = params["w4"].T                               # (512, C)
    b4 = params["b4"].reshape(1, -1)                   # (1, C)

    out = pl.pallas_call(
        _encoder_kernel,
        out_shape=jax.ShapeDtypeStruct((BG, C), jnp.float32),
        grid_spec=pltpu.PrefetchScalarGridSpec(
            num_scalar_prefetch=0,
            grid=(nb,),
            in_specs=[
                pl.BlockSpec((tg * N, 8), lambda i: (i, 0)),
                _full_spec(w1f.shape), _full_spec(b1f.shape),
                _full_spec(w2t.shape),
                _full_spec(w3g.shape), _full_spec(w3l.shape), _full_spec(b3f.shape),
                _full_spec(w4t.shape), _full_spec(b4.shape),
            ],
            out_specs=pl.BlockSpec((tg, C), lambda i: (i, 0)),
        ),
        compiler_params=pltpu.CompilerParams(
            dimension_semantics=("parallel",)),
    )(x_pad, w1f, b1f, w2t, w3g, w3l, b3f, w4t, b4)

    return out.reshape(B, G, C)


def _reference_forward(point_groups, params):
    """Pure-JAX reference (same eval-mode BN semantics, no folding) for validation."""
    B, G, N, _ = point_groups.shape
    eps = 1e-5
    x = point_groups.reshape(B * G, N, 3).astype(jnp.float32)

    s1 = params["gamma1"] / jnp.sqrt(params["rv1"] + eps)
    t1 = params["beta1"] - params["rm1"] * s1
    s2 = params["gamma2"] / jnp.sqrt(params["rv2"] + eps)
    t2 = params["beta2"] - params["rm2"] * s2

    h1 = jnp.einsum("bnc,oc->bno", x, params["w1"]) + params["b1"]
    h1 = jnp.maximum(h1 * s1 + t1, 0.0)
    feat = jnp.einsum("bnc,oc->bno", h1, params["w2"]) + params["b2"]
    g = jnp.max(feat, axis=1, keepdims=True)
    cat = jnp.concatenate([jnp.broadcast_to(g, feat.shape), feat], axis=-1)
    h2 = jnp.einsum("bnc,oc->bno", cat, params["w3"]) + params["b3"]
    h2 = jnp.maximum(h2 * s2 + t2, 0.0)
    o = jnp.einsum("bnc,oc->bno", h2, params["w4"]) + params["b4"]
    out = jnp.max(o, axis=1)
    return out.reshape(B, G, -1)


def _init_params(key, encoder_channel):
    ks = jax.random.split(key, 16)
    f = jnp.float32

    def nrm(k, shape, scale):
        return (scale * jax.random.normal(k, shape)).astype(f)

    params = {
        # first_conv
        "w1": nrm(ks[0], (128, 3), 0.3), "b1": nrm(ks[1], (128,), 0.05),
        "gamma1": (1.0 + 0.1 * jax.random.normal(ks[2], (128,))).astype(f),
        "beta1": nrm(ks[3], (128,), 0.05),
        "rm1": nrm(ks[4], (128,), 0.02),
        "rv1": (1.0 + 0.1 * jnp.abs(jax.random.normal(ks[5], (128,)))).astype(f),
        "w2": nrm(ks[6], (256, 128), 0.08), "b2": nrm(ks[7], (256,), 0.05),
        # second_conv
        "w3": nrm(ks[8], (512, 512), 0.04), "b3": nrm(ks[9], (512,), 0.05),
        "gamma2": (1.0 + 0.1 * jax.random.normal(ks[10], (512,))).astype(f),
        "beta2": nrm(ks[11], (512,), 0.05),
        "rm2": nrm(ks[12], (512,), 0.02),
        "rv2": (1.0 + 0.1 * jnp.abs(jax.random.normal(ks[13], (512,)))).astype(f),
        "w4": nrm(ks[14], (encoder_channel, 512), 0.04),
        "b4": nrm(ks[15], (encoder_channel,), 0.05),
    }
    return params


if __name__ == "__main__":
    B, G, N = 2, 4, 32
    ENCODER_CHANNEL = 128

    key = jax.random.PRNGKey(0)
    k_pts, k_par = jax.random.split(key)
    point_groups = jax.random.normal(k_pts, (B, G, N, 3), dtype=jnp.float32)
    params = _init_params(k_par, ENCODER_CHANNEL)

    out = old_encoder_forward(point_groups, params)
    out = jax.block_until_ready(out)

    ref = jax.block_until_ready(_reference_forward(point_groups, params))
    assert out.shape == (B, G, ENCODER_CHANNEL), out.shape
    assert jnp.allclose(out, ref, atol=1e-4, rtol=1e-4), float(
        jnp.max(jnp.abs(out - ref)))

    print("KERNEL_OK")
</pallas_src>

<mosaic_0001>
module attributes {stable_mosaic.version = 11 : i64} {
  func.func @_encoder_kernel(%arg0: i32, %arg1: memref<256x8xf32, #tpu.memory_space<vmem>>, %arg2: memref<8x128xf32, #tpu.memory_space<vmem>>, %arg3: memref<1x128xf32, #tpu.memory_space<vmem>>, %arg4: memref<128x256xf32, #tpu.memory_space<vmem>>, %arg5: memref<256x512xf32, #tpu.memory_space<vmem>>, %arg6: memref<256x512xf32, #tpu.memory_space<vmem>>, %arg7: memref<1x512xf32, #tpu.memory_space<vmem>>, %arg8: memref<512x128xf32, #tpu.memory_space<vmem>>, %arg9: memref<1x128xf32, #tpu.memory_space<vmem>>, %arg10: memref<8x128xf32, #tpu.memory_space<vmem>>) attributes {dimension_semantics = [#tpu.dimension_semantics<parallel>], iteration_bounds = array<i64: 1>, scalar_prefetch = 0 : i64, scratch_operands = 0 : i64, tpu.core_type = #tpu.core_type<tc>, window_params = [{transform_indices = @transform_0, window_bounds = array<i64: 256, 8>}, {pipeline_mode = #tpu.pipeline_mode<synchronous>, transform_indices = @transform_1, window_bounds = array<i64: 8, 128>}, {pipeline_mode = #tpu.pipeline_mode<synchronous>, transform_indices = @transform_2, window_bounds = array<i64: 1, 128>}, {pipeline_mode = #tpu.pipeline_mode<synchronous>, transform_indices = @transform_3, window_bounds = array<i64: 128, 256>}, {pipeline_mode = #tpu.pipeline_mode<synchronous>, transform_indices = @transform_4, window_bounds = array<i64: 256, 512>}, {pipeline_mode = #tpu.pipeline_mode<synchronous>, transform_indices = @transform_5, window_bounds = array<i64: 256, 512>}, {pipeline_mode = #tpu.pipeline_mode<synchronous>, transform_indices = @transform_6, window_bounds = array<i64: 1, 512>}, {pipeline_mode = #tpu.pipeline_mode<synchronous>, transform_indices = @transform_7, window_bounds = array<i64: 512, 128>}, {pipeline_mode = #tpu.pipeline_mode<synchronous>, transform_indices = @transform_8, window_bounds = array<i64: 1, 128>}, {transform_indices = @transform_9, window_bounds = array<i64: 8, 128>}]} {
    %c0 = arith.constant 0 : index
    %c0_0 = arith.constant 0 : index
    %0 = vector.load %arg1[%c0, %c0_0] : memref<256x8xf32, #tpu.memory_space<vmem>>, vector<256x8xf32>
    %c0_1 = arith.constant 0 : index
    %c0_2 = arith.constant 0 : index
    %1 = vector.load %arg2[%c0_1, %c0_2] : memref<8x128xf32, #tpu.memory_space<vmem>>, vector<8x128xf32>
    %cst = arith.constant dense<0.000000e+00> : vector<256x128xf32>
    %2 = tpu.matmul %0, %1, %cst {dimension_numbers = #tpu.dot_dimension_numbers<[1], [0], [0], [1], [0, 0, 1, 1], [], []>} : vector<256x8xf32>, vector<8x128xf32>, vector<256x128xf32> -> vector<256x128xf32>
    %c0_3 = arith.constant 0 : index
    %c0_4 = arith.constant 0 : index
    %3 = vector.load %arg3[%c0_3, %c0_4] : memref<1x128xf32, #tpu.memory_space<vmem>>, vector<1x128xf32>
    %4 = vector.broadcast %3 : vector<1x128xf32> to vector<256x128xf32>
    %5 = arith.addf %2, %4 : vector<256x128xf32>
    %cst_5 = arith.constant 0.000000e+00 : f32
    %6 = vector.broadcast %cst_5 : f32 to vector<256x128xf32>
    %7 = arith.maximumf %5, %6 : vector<256x128xf32>
    %c0_6 = arith.constant 0 : index
    %c0_7 = arith.constant 0 : index
    %8 = vector.load %arg4[%c0_6, %c0_7] : memref<128x256xf32, #tpu.memory_space<vmem>>, vector<128x256xf32>
    %cst_8 = arith.constant dense<0.000000e+00> : vector<256x256xf32>
    %9 = tpu.matmul %7, %8, %cst_8 {dimension_numbers = #tpu.dot_dimension_numbers<[1], [0], [0], [1], [0, 0, 1, 1], [], []>} : vector<256x128xf32>, vector<128x256xf32>, vector<256x256xf32> -> vector<256x256xf32>
    %10 = vector.shape_cast %9 : vector<256x256xf32> to vector<8x32x256xf32>
    %cst_9 = arith.constant dense<0xFF800000> : vector<8x256xf32>
    %11 = vector.multi_reduction <maximumf>, %10, %cst_9 [1] : vector<8x32x256xf32> to vector<8x256xf32>
    %c0_10 = arith.constant 0 : index
    %c0_11 = arith.constant 0 : index
    %12 = vector.load %arg6[%c0_10, %c0_11] : memref<256x512xf32, #tpu.memory_space<vmem>>, vector<256x512xf32>
    %cst_12 = arith.constant dense<0.000000e+00> : vector<256x512xf32>
    %13 = tpu.matmul %9, %12, %cst_12 {dimension_numbers = #tpu.dot_dimension_numbers<[1], [0], [0], [1], [0, 0, 1, 1], [], []>} : vector<256x256xf32>, vector<256x512xf32>, vector<256x512xf32> -> vector<256x512xf32>
    %c0_13 = arith.constant 0 : index
    %c0_14 = arith.constant 0 : index
    %14 = vector.load %arg5[%c0_13, %c0_14] : memref<256x512xf32, #tpu.memory_space<vmem>>, vector<256x512xf32>
    %cst_15 = arith.constant dense<0.000000e+00> : vector<8x512xf32>
    %15 = tpu.matmul %11, %14, %cst_15 {dimension_numbers = #tpu.dot_dimension_numbers<[1], [0], [0], [1], [0, 0, 1, 1], [], []>} : vector<8x256xf32>, vector<256x512xf32>, vector<8x512xf32> -> vector<8x512xf32>
    %16 = vector.shape_cast %13 : vector<256x512xf32> to vector<8x32x512xf32>
    %17 = vector.shape_cast %15 : vector<8x512xf32> to vector<8x1x512xf32>
    %18 = vector.broadcast %17 : vector<8x1x512xf32> to vector<8x32x512xf32>
    %19 = arith.addf %16, %18 : vector<8x32x512xf32>
    %c0_16 = arith.constant 0 : index
    %c0_17 = arith.constant 0 : index
    %20 = vector.load %arg7[%c0_16, %c0_17] : memref<1x512xf32, #tpu.memory_space<vmem>>, vector<1x512xf32>
    %21 = vector.shape_cast %20 : vector<1x512xf32> to vector<1x1x512xf32>
    %22 = vector.broadcast %21 : vector<1x1x512xf32> to vector<8x32x512xf32>
    %23 = arith.addf %19, %22 : vector<8x32x512xf32>
    %cst_18 = arith.constant 0.000000e+00 : f32
    %24 = vector.broadcast %cst_18 : f32 to vector<8x32x512xf32>
    %25 = arith.maximumf %23, %24 : vector<8x32x512xf32>
    %26 = vector.shape_cast %25 : vector<8x32x512xf32> to vector<256x512xf32>
    %c0_19 = arith.constant 0 : index
    %c0_20 = arith.constant 0 : index
    %27 = vector.load %arg8[%c0_19, %c0_20] : memref<512x128xf32, #tpu.memory_space<vmem>>, vector<512x128xf32>
    %cst_21 = arith.constant dense<0.000000e+00> : vector<256x128xf32>
    %28 = tpu.matmul %26, %27, %cst_21 {dimension_numbers = #tpu.dot_dimension_numbers<[1], [0], [0], [1], [0, 0, 1, 1], [], []>} : vector<256x512xf32>, vector<512x128xf32>, vector<256x128xf32> -> vector<256x128xf32>
    %29 = vector.shape_cast %28 : vector<256x128xf32> to vector<8x32x128xf32>
    %cst_22 = arith.constant dense<0xFF800000> : vector<8x128xf32>
    %30 = vector.multi_reduction <maximumf>, %29, %cst_22 [1] : vector<8x32x128xf32> to vector<8x128xf32>
    %c0_23 = arith.constant 0 : index
    %c0_24 = arith.constant 0 : index
    %31 = vector.load %arg9[%c0_23, %c0_24] : memref<1x128xf32, #tpu.memory_space<vmem>>, vector<1x128xf32>
    %32 = vector.broadcast %31 : vector<1x128xf32> to vector<8x128xf32>
    %33 = arith.addf %30, %32 : vector<8x128xf32>
    %c0_25 = arith.constant 0 : index
    %c0_26 = arith.constant 0 : index
    %34 = vector.load %arg10[%c0_25, %c0_26] : memref<8x128xf32, #tpu.memory_space<vmem>>, vector<8x128xf32>
    tpu.vector_store %arg10[%c0_25, %c0_26], %33 {strides = array<i32>} : memref<8x128xf32, #tpu.memory_space<vmem>>, vector<8x128xf32>,
    return
  }
  func.func @transform_0(%arg0: i32) -> (i32, i32) {
    %c0_i32 = arith.constant 0 : i32
    %c0_i32_0 = arith.constant 0 : i32
    return %arg0, %c0_i32 : i32, i32
  }
  func.func @transform_1(%arg0: i32) -> (i32, i32) {
    %c0_i32 = arith.constant 0 : i32
    %c0_i32_0 = arith.constant 0 : i32
    %c0_i32_1 = arith.constant 0 : i32
    return %c0_i32, %c0_i32_0 : i32, i32
  }
  func.func @transform_2(%arg0: i32) -> (i32, i32) {
    %c0_i32 = arith.constant 0 : i32
    %c0_i32_0 = arith.constant 0 : i32
    %c0_i32_1 = arith.constant 0 : i32
    return %c0_i32, %c0_i32_0 : i32, i32
  }
  func.func @transform_3(%arg0: i32) -> (i32, i32) {
    %c0_i32 = arith.constant 0 : i32
    %c0_i32_0 = arith.constant 0 : i32
    %c0_i32_1 = arith.constant 0 : i32
    return %c0_i32, %c0_i32_0 : i32, i32
  }
  func.func @transform_4(%arg0: i32) -> (i32, i32) {
    %c0_i32 = arith.constant 0 : i32
    %c0_i32_0 = arith.constant 0 : i32
    %c0_i32_1 = arith.constant 0 : i32
    return %c0_i32, %c0_i32_0 : i32, i32
  }
  func.func @transform_5(%arg0: i32) -> (i32, i32) {
    %c0_i32 = arith.constant 0 : i32
    %c0_i32_0 = arith.constant 0 : i32
    %c0_i32_1 = arith.constant 0 : i32
    return %c0_i32, %c0_i32_0 : i32, i32
  }
  func.func @transform_6(%arg0: i32) -> (i32, i32) {
    %c0_i32 = arith.constant 0 : i32
    %c0_i32_0 = arith.constant 0 : i32
    %c0_i32_1 = arith.constant 0 : i32
    return %c0_i32, %c0_i32_0 : i32, i32
  }
  func.func @transform_7(%arg0: i32) -> (i32, i32) {
    %c0_i32 = arith.constant 0 : i32
    %c0_i32_0 = arith.constant 0 : i32
    %c0_i32_1 = arith.constant 0 : i32
    return %c0_i32, %c0_i32_0 : i32, i32
  }
  func.func @transform_8(%arg0: i32) -> (i32, i32) {
    %c0_i32 = arith.constant 0 : i32
    %c0_i32_0 = arith.constant 0 : i32
    %c0_i32_1 = arith.constant 0 : i32
    return %c0_i32, %c0_i32_0 : i32, i32
  }
  func.func @transform_9(%arg0: i32) -> (i32, i32) {
    %c0_i32 = arith.constant 0 : i32
    %c0_i32_0 = arith.constant 0 : i32
    return %arg0, %c0_i32 : i32, i32
  }
}

</mosaic_0001>

<bundles_post_ra>
// kernel: tpu_custom_call.1
= control target key start
LH: loop header
LB: loop body
LE: loop exit
PB: predicated region body
PF: predicated region fallthrough
CT: control target
= control target key end

     0   :  { %14 = vsyncpa [#allocation3], 0  ;;  %s4901_s0 = inlined_call_operand.vmem [shape: f32[256,8], index: 0, kind: input, shape index: {}]   ;;  %s4902_s1 = inlined_call_operand.vmem [shape: f32[8,128], index: 1, kind: input, shape index: {}]   ;;  %s4903_s2 = inlined_call_operand.vmem [shape: f32[1,128], index: 2, kind: input, shape index: {}]   ;;  %s4904_s3 = inlined_call_operand.vmem [shape: f32[128,256], index: 3, kind: input, shape index: {}]   ;;  %s4905_s4 = inlined_call_operand.hbm [shape: f32[256,512], index: 4, kind: input, shape index: {}]   ;;  %s4906_s5 = inlined_call_operand.hbm [shape: f32[256,512], index: 5, kind: input, shape index: {}]   ;;  %s4907_s6 = inlined_call_operand.vmem [shape: f32[1,512], index: 6, kind: input, shape index: {}]   ;;  %s4908_s7 = inlined_call_operand.hbm [shape: f32[512,128], index: 7, kind: input, shape index: {}]   ;;  %s4909_s8 = inlined_call_operand.vmem [shape: f32[1,128], index: 8, kind: input, shape index: {}]   ;;  %s4910_s9 = inlined_call_operand.hbm [shape: f32[8,128], index: 9, kind: output, shape index: {}]  }
   0x1   :  { %15 = vsyncpa [#allocation6], 0 }
   0x2   :  { %16 = vsyncpa [#allocation4], 0  ;;  %s3425_s30 = smov [#allocation5]   ;;  %s3426_s11 = smov [#allocation2]  }
   0x3   :  { %s42_s10 = sshll.u32 %s3425_s30, 4  ;;  %s30_s12 = sshll.u32 %s3426_s11, 4  ;;  %s43_s10 = int_to_ptr.vmem [resolvable:$true] %s42_s10  ;;  %s31_s12 = int_to_ptr.vmem [resolvable:$true] %s30_s12 }
   0x4   :  { %s3347_s13 = scalar_lea.vmem %s43_s10, 16384  ;;  %p3352_p1 = scmp.lt.s32.totalorder %s43_s10, %s43_s10 }
   0x5   :  { %p3348_p0 = scmp.ne.s32.totalorder %s43_s10, %s3347_s13  ;;  %p3353_p2 = scmp.lt.s32.totalorder %s3347_s13, %s3347_s13 }
   0x7   :  { %p3354_p3 = por %p3353_p2, %p3352_p1 }
   0x9   :  { %p3355_p4 = pnand %p3354_p3, %p3348_p0 }
   0xb   :  { %3358 = shalt.err (!%p3355_p4)
}
   0xc   :  { %s3427_s14 = smov 512   ;;  %s3428_s15 = smov 32  }
   0xd   :  { %48 = dma.hbm_to_vmem [thread:$0]  %s4906_s5, 16384, %s43_s10, [#allocation6], %s3427_s14, %s3427_s14, %s3428_s15  }
   0xe   :  { %s3367_s18 = scalar_lea.vmem %s31_s12, 16384  ;;  %p3372_p6 = scmp.lt.s32.totalorder %s31_s12, %s31_s12 }
   0xf   :  { %p3368_p5 = scmp.ne.s32.totalorder %s31_s12, %s3367_s18  ;;  %p3373_p7 = scmp.lt.s32.totalorder %s3367_s18, %s3367_s18 }
  0x11   :  { %p3374_p8 = por %p3373_p7, %p3372_p6 }
  0x13   :  { %p3375_p9 = pnand %p3374_p8, %p3368_p5 }
  0x15   :  { %3378 = shalt.err (!%p3375_p9)
}
  0x16   :  { %36 = dma.hbm_to_vmem [thread:$0]  %s4905_s4, 16384, %s31_s12, [#allocation3], %s3427_s14, %s3427_s14, %s3428_s15  }
  0x17   :  { %s3429_s21 = smov [#allocation7]  }
  0x18   :  { %s56_s22 = sshll.u32 %s3429_s21, 4  ;;  %s57_s22 = int_to_ptr.vmem [resolvable:$true] %s56_s22 }
  0x19   :  { %s3387_s23 = scalar_lea.vmem %s57_s22, 8192  ;;  %p3392_p11 = scmp.lt.s32.totalorder %s57_s22, %s57_s22 }
  0x1a   :  { %p3388_p10 = scmp.ne.s32.totalorder %s57_s22, %s3387_s23  ;;  %p3393_p12 = scmp.lt.s32.totalorder %s3387_s23, %s3387_s23 }
  0x1c   :  { %p3394_p13 = por %p3393_p12, %p3392_p11 }
  0x1e   :  { %p3395_p0 = pnand %p3394_p13, %p3388_p10 }
  0x20   :  { %3398 = shalt.err (!%p3395_p0)
}
  0x21   :  { %s3430_s5 = smov 128   ;;  %s3431_s24 = smov 8  }
  0x22   :  { %62 = dma.hbm_to_vmem [thread:$0]  %s4908_s7, 8192, %s57_s22, [#allocation6], %s3430_s5, %s3430_s5, %s3431_s24  }
  0x23   :  { %3419 = dma.done.wait [#allocation3], 16384  }
  0x24   :  { %3420 = vsyncadd [#allocation3], 4294950912 }
  0x25   :  { %3421 = dma.done.wait [#allocation6], 24576  }
  0x26   :  { %3422 = vsyncadd [#allocation6], 4294942720  ;;  %vm114_vm0 = vcmask 64512   ;;  %v106_v0 = vld [vmem:[%s4902_s1] sm:$0xff]  ;;  %v75_v2 = vld [vmem:[%s4901_s0 + $0x8] sm:$0xff]  ;;  %vm1687_vm1 = vcmask 1041409  }
  0x27   :  { %v74_v1 = vld [vmem:[%s4901_s0] sm:$0xff]  ;;  %3198 = vmatprep.subr.mxu0 %v106_v0  ;;  %v76_v3 = vld [vmem:[%s4901_s0 + $0x10] sm:$0xff]  ;;  %v77_v4 = vld [vmem:[%s4901_s0 + $0x18] sm:$0xff]  ;;  %vm1689_vm2 = vcmask 1042434   ;;  %vm1691_vm3 = vcmask 1043459   ;;  %vm1693_vm4 = vcmask 1044484  }
  0x28   :  { %3200 = vmatprep.mubr.msk.f32.mxu0 %vm114_vm0, %v74_v1  ;;  %3199 = vmatpush3.msra.mxu0 %v106_v0  ;;  %v78_v5 = vld [vmem:[%s4901_s0 + $0x20] sm:$0xff]  ;;  %v79_v6 = vld [vmem:[%s4901_s0 + $0x28] sm:$0xff]  ;;  %v80_v7 = vld [vmem:[%s4901_s0 + $0x30] sm:$0xff]  ;;  %v4911_v1 = vmov 0.0   ;;  %vm1695_vm5 = vcmask 1045509   ;;  %vm1697_vm6 = vcmask 1046534  }
  0x29   :  { %3201 = vmatmul.mubr.msk.f32.vlgmr.msra.gmra.mxu0 %vm114_vm0, %v75_v2  ;;  %v499_v8 = vld [vmem:[%s4904_s3 + $0xf8] sm:$0xff]  ;;  %v498_v9 = vld [vmem:[%s4904_s3 + $0xf0] sm:$0xff]  ;;  %v497_v10 = vld [vmem:[%s4904_s3 + $0xe8] sm:$0xff]  ;;  %564 = vmatprep.mubr.f32.mxu1 %v4911_v1  ;;  %vm1699_vm7 = vcmask 1047559  }
  0x2a   :  { %3203 = vmatprep.mubr.msk.f32.mxu0 %vm114_vm0, %v76_v3  ;;  %v81_v11 = vld [vmem:[%s4901_s0 + $0x38] sm:$0xff]  ;;  %500 = vmatprep.subr.mxu1 %v499_v8  ;;  %v496_v12 = vld [vmem:[%s4904_s3 + $0xe0] sm:$0xff]  ;;  %v494_v15 = vld [vmem:[%s4904_s3 + $0xd0] sm:$0xff] }
  0x2b   :  { %v82_v13 = vld [vmem:[%s4901_s0 + $0x40] sm:$0xff]  ;;  %501 = vmatpush1.msra.mxu1 %v498_v9  ;;  %v495_v14 = vld [vmem:[%s4904_s3 + $0xd8] sm:$0xff]  ;;  %v493_v16 = vld [vmem:[%s4904_s3 + $0xc8] sm:$0xff] }
  0x2c   :  { %502 = vmatprep.subr.mxu1 %v497_v10  ;;  %v83_v17 = vld [vmem:[%s4901_s0 + $0x48] sm:$0xff]  ;;  %v492_v18 = vld [vmem:[%s4904_s3 + $0xc0] sm:$0xff]  ;;  %v84_v19 = vld [vmem:[%s4901_s0 + $0x50] sm:$0xff] }
  0x2d   :  { %3204 = vmatmul.mubr.msk.f32.gmra.mxu0 %vm114_vm0, %v77_v4  ;;  %503 = vmatpush1.msra.mxu1 %v496_v12  ;;  %v491_v20 = vld [vmem:[%s4904_s3 + $0xb8] sm:$0xff]  ;;  %v490_v21 = vld [vmem:[%s4904_s3 + $0xb0] sm:$0xff]  ;;  %v489_v22 = vld [vmem:[%s4904_s3 + $0xa8] sm:$0xff] }
  0x2e   :  { %3206 = vmatprep.mubr.msk.f32.mxu0 %vm114_vm0, %v78_v5  ;;  %504 = vmatprep.subr.mxu1 %v495_v14  ;;  %v85_v23 = vld [vmem:[%s4901_s0 + $0x58] sm:$0xff]  ;;  %v488_v24 = vld [vmem:[%s4904_s3 + $0xa0] sm:$0xff]  ;;  %v486_v27 = vld [vmem:[%s4904_s3 + $0x90] sm:$0xff] }
  0x2f   :  { %505 = vmatpush1.msra.mxu1 %v494_v15  ;;  %v86_v25 = vld [vmem:[%s4901_s0 + $0x60] sm:$0xff]  ;;  %v487_v26 = vld [vmem:[%s4904_s3 + $0x98] sm:$0xff]  ;;  %v485_v28 = vld [vmem:[%s4904_s3 + $0x88] sm:$0xff] }
  0x30   :  { %506 = vmatprep.subr.mxu1 %v493_v16  ;;  %v87_v29 = vld [vmem:[%s4901_s0 + $0x68] sm:$0xff]  ;;  %v484_v30 = vld [vmem:[%s4904_s3 + $0x80] sm:$0xff]  ;;  %v88_v31 = vld [vmem:[%s4901_s0 + $0x70] sm:$0xff] }
  0x31   :  { %3207 = vmatmul.mubr.msk.f32.gmra.mxu0 %vm114_vm0, %v79_v6  ;;  %507 = vmatpush1.msra.mxu1 %v492_v18  ;;  %v483_v32 = vld [vmem:[%s4904_s3 + $0x78] sm:$0xff]  ;;  %v482_v33 = vld [vmem:[%s4904_s3 + $0x70] sm:$0xff]  ;;  %v481_v34 = vld [vmem:[%s4904_s3 + $0x68] sm:$0xff] }
  0x32   :  { %3209 = vmatprep.mubr.msk.f32.mxu0 %vm114_vm0, %v80_v7  ;;  %508 = vmatprep.subr.mxu1 %v491_v20  ;;  %v89_v35 = vld [vmem:[%s4901_s0 + $0x78] sm:$0xff]  ;;  %v480_v36 = vld [vmem:[%s4904_s3 + $0x60] sm:$0xff]  ;;  %v478_v39 = vld [vmem:[%s4904_s3 + $0x50] sm:$0xff] }
  0x33   :  { %509 = vmatpush1.msra.mxu1 %v490_v21  ;;  %v90_v37 = vld [vmem:[%s4901_s0 + $0x80] sm:$0xff]  ;;  %v479_v38 = vld [vmem:[%s4904_s3 + $0x58] sm:$0xff]  ;;  %v477_v40 = vld [vmem:[%s4904_s3 + $0x48] sm:$0xff] }
  0x34   :  { %510 = vmatprep.subr.mxu1 %v489_v22  ;;  %v91_v41 = vld [vmem:[%s4901_s0 + $0x88] sm:$0xff]  ;;  %v476_v42 = vld [vmem:[%s4904_s3 + $0x40] sm:$0xff]  ;;  %v92_v43 = vld [vmem:[%s4901_s0 + $0x90] sm:$0xff] }
  0x35   :  { %3210 = vmatmul.mubr.msk.f32.gmra.mxu0 %vm114_vm0, %v81_v11  ;;  %511 = vmatpush1.msra.mxu1 %v488_v24  ;;  %v475_v44 = vld [vmem:[%s4904_s3 + $0x38] sm:$0xff]  ;;  %v94_v46 = vld [vmem:[%s4901_s0 + $0xa0] sm:$0xff]  ;;  %v95_v47 = vld [vmem:[%s4901_s0 + $0xa8] sm:$0xff] }
  0x36   :  { %3212 = vmatprep.mubr.msk.f32.mxu0 %vm114_vm0, %v82_v13  ;;  %512 = vmatprep.subr.mxu1 %v487_v26  ;;  %v93_v45 = vld [vmem:[%s4901_s0 + $0x98] sm:$0xff]  ;;  %v96_v48 = vld [vmem:[%s4901_s0 + $0xb0] sm:$0xff]  ;;  %v98_v50 = vld [vmem:[%s4901_s0 + $0xc0] sm:$0xff] }
  0x37   :  { %513 = vmatpush1.msra.mxu1 %v486_v27  ;;  %v97_v49 = vld [vmem:[%s4901_s0 + $0xb8] sm:$0xff]  ;;  %v99_v51 = vld [vmem:[%s4901_s0 + $0xc8] sm:$0xff]  ;;  %v100_v52 = vld [vmem:[%s4901_s0 + $0xd0] sm:$0xff] }
  0x38   :  { %514 = vmatprep.subr.mxu1 %v485_v28  ;;  %v101_v53 = vld [vmem:[%s4901_s0 + $0xd8] sm:$0xff]  ;;  %v102_v54 = vld [vmem:[%s4901_s0 + $0xe0] sm:$0xff]  ;;  %v103_v55 = vld [vmem:[%s4901_s0 + $0xe8] sm:$0xff] }
  0x39   :  { %3213 = vmatmul.mubr.msk.f32.gmra.mxu0 %vm114_vm0, %v83_v17  ;;  %515 = vmatpush1.msra.mxu1 %v484_v30  ;;  %v104_v56 = vld [vmem:[%s4901_s0 + $0xf0] sm:$0xff]  ;;  %v105_v57 = vld [vmem:[%s4901_s0 + $0xf8] sm:$0xff]  ;;  %v473_v59 = vld [vmem:[%s4904_s3 + $0x28] sm:$0xff] }
  0x3a   :  { %3215 = vmatprep.mubr.msk.f32.mxu0 %vm114_vm0, %v84_v19  ;;  %516 = vmatprep.subr.mxu1 %v483_v32  ;;  %v474_v58 = vld [vmem:[%s4904_s3 + $0x30] sm:$0xff]  ;;  %v472_v60 = vld [vmem:[%s4904_s3 + $0x20] sm:$0xff]  ;;  %v471_v61 = vld [vmem:[%s4904_s3 + $0x18] sm:$0xff] }
  0x3b   :  { %517 = vmatpush1.msra.mxu1 %v482_v33  ;;  %v470_v62 = vld [vmem:[%s4904_s3 + $0x10] sm:$0xff]  ;;  %v469_v63 = vld [vmem:[%s4904_s3 + $0x8] sm:$0xff]  ;;  %v468_v0 = vld [vmem:[%s4904_s3] sm:$0xff] }
  0x3c   :  { %518 = vmatprep.subr.mxu1 %v481_v34  ;;  %v3725_v3 = vld [vmem:[%s4903_s2] ss:$0 sm:$0xff]  ;;  %v962_v6 = vld [vmem:[#allocation5 + $0x1e8] sm:$0xff]  ;;  %v964_v7 = vld [vmem:[#allocation5 + $0x1f8] sm:$0xff] }
  0x3d   :  { %3216 = vmatmul.mubr.msk.f32.gmra.mxu0 %vm114_vm0, %v85_v23  ;;  %519 = vmatpush1.msra.mxu1 %v480_v36  ;;  %v961_v8 = vld [vmem:[#allocation5 + $0x1e0] sm:$0xff]  ;;  %v958_v10 = vld [vmem:[#allocation5 + $0x1c8] sm:$0xff]  ;;  %v963_v13 = vld [vmem:[#allocation5 + $0x1f0] sm:$0xff] }
  0x3e   :  { %3218 = vmatprep.mubr.msk.f32.mxu0 %vm114_vm0, %v86_v25  ;;  %520 = vmatprep.subr.mxu1 %v479_v38  ;;  %v957_v14 = vld [vmem:[#allocation5 + $0x1c0] sm:$0xff]  ;;  %v960_v16 = vld [vmem:[#allocation5 + $0x1d8] sm:$0xff]  ;;  %v954_v17 = vld [vmem:[#allocation5 + $0x1a8] sm:$0xff] }
  0x3f   :  { %521 = vmatpush1.msra.mxu1 %v478_v39  ;;  %1029 = vmatprep.subr.mxu0 %v962_v6  ;;  %v959_v18 = vld [vmem:[#allocation5 + $0x1d0] sm:$0xff]  ;;  %v953_v19 = vld [vmem:[#allocation5 + $0x1a0] sm:$0xff]  ;;  %v956_v20 = vld [vmem:[#allocation5 + $0x1b8] sm:$0xff] }
  0x40   :  { %522 = vmatprep.subr.mxu1 %v477_v40  ;;  %1030 = vmatpush1.msra.mxu0 %v961_v8  ;;  %v955_v23 = vld [vmem:[#allocation5 + $0x1b0] sm:$0xff]  ;;  %v950_v25 = vld [vmem:[#allocation5 + $0x188] sm:$0xff]  ;;  %v952_v26 = vld [vmem:[#allocation5 + $0x198] sm:$0xff] }
  0x41   :  { %3219 = vmatmul.mubr.msk.f32.gmra.mxu0 %vm114_vm0, %v87_v29  ;;  %523 = vmatpush1.msra.mxu1 %v476_v42  ;;  %v949_v27 = vld [vmem:[#allocation5 + $0x180] sm:$0xff]  ;;  %v951_v28 = vld [vmem:[#allocation5 + $0x190] sm:$0xff]  ;;  %v946_v29 = vld [vmem:[#allocation5 + $0x168] sm:$0xff] }
  0x42   :  { %3221 = vmatprep.mubr.msk.f32.mxu0 %vm114_vm0, %v88_v31  ;;  %524 = vmatprep.subr.mxu1 %v475_v44  ;;  %v948_v32 = vld [vmem:[#allocation5 + $0x178] sm:$0xff]  ;;  %v945_v34 = vld [vmem:[#allocation5 + $0x160] sm:$0xff]  ;;  %v942_v36 = vld [vmem:[#allocation5 + $0x148] sm:$0xff] }
  0x43   :  { %525 = vmatpush1.msra.mxu1 %v474_v58  ;;  %1031 = vmatprep.subr.mxu0 %v958_v10  ;;  %v941_v38 = vld [vmem:[#allocation5 + $0x140] sm:$0xff]  ;;  %v940_v44 = vld [vmem:[#allocation5 + $0x138] sm:$0xff]  ;;  %v918_v10 = vld [vmem:[#allocation5 + $0x88] sm:$0xff] }
  0x44   :  { %526 = vmatprep.subr.mxu1 %v473_v59  ;;  %1032 = vmatpush1.msra.mxu0 %v957_v14  ;;  %v931_v59 = vld [vmem:[#allocation5 + $0xf0] sm:$0xff]  ;;  %v924_v6 = vld [vmem:[#allocation5 + $0xb8] sm:$0xff]  ;;  %v921_v8 = vld [vmem:[#allocation5 + $0xa0] sm:$0xff] }
  0x45   :  { %3222 = vmatmul.mubr.msk.f32.gmra.mxu0 %vm114_vm0, %v89_v35  ;;  %527 = vmatpush1.msra.mxu1 %v472_v60  ;;  %v947_v35 = vld [vmem:[#allocation5 + $0x170] sm:$0xff] }
  0x46   :  { %3224 = vmatprep.mubr.msk.f32.mxu0 %vm114_vm0, %v90_v37  ;;  %528 = vmatprep.subr.mxu1 %v471_v61  ;;  %v944_v37 = vld [vmem:[#allocation5 + $0x158] sm:$0xff]  ;;  %v926_v61 = vld [vmem:[#allocation5 + $0xc8] sm:$0xff] }
  0x47   :  { %529 = vmatpush1.msra.mxu1 %v470_v62  ;;  %1033 = vmatprep.subr.mxu0 %v954_v17  ;;  %v928_v62 = vld [vmem:[#allocation5 + $0xd8] sm:$0xff]  ;;  %v914_v17 = vld [vmem:[#allocation5 + $0x68] sm:$0xff] }
  0x48   :  { %530 = vmatprep.subr.mxu1 %v469_v63  ;;  %1034 = vmatpush1.msra.mxu0 %v953_v19  ;;  %v925_v63 = vld [vmem:[#allocation5 + $0xc0] sm:$0xff] }
  0x49   :  { %3225 = vmatmul.mubr.msk.f32.gmra.mxu0 %vm114_vm0, %v91_v41  ;;  %531 = vmatpush1.msra.mxu1 %v468_v0  ;;  %v943_v41 = vld [vmem:[#allocation5 + $0x150] sm:$0xff]  ;;  %v913_v19 = vld [vmem:[#allocation5 + $0x60] sm:$0xff] }
  0x4a   :  { %3227 = vmatprep.mubr.msk.f32.mxu0 %vm114_vm0, %v92_v43  ;;  %1286 = vmatprep.subr.mxu1 %v964_v7  ;;  %v938_v43 = vld [vmem:[#allocation5 + $0x128] sm:$0xff]  ;;  %v927_v0 = vld [vmem:[#allocation5 + $0xd0] sm:$0xff] }
  0x4b   :  { %1035 = vmatprep.subr.mxu0 %v950_v25 }
  0x4c   :  { %1036 = vmatpush1.msra.mxu0 %v949_v27  ;;  %v911_v27 = vld [vmem:[#allocation5 + $0x50] sm:$0xff] }
  0x4d   :  { %3228 = vmatmul.mubr.msk.f32.gmra.mxu0 %vm114_vm0, %v93_v45  ;;  %1037 = vmatprep.subr.mxu0 %v946_v29  ;;  %v937_v45 = vld [vmem:[#allocation5 + $0x120] sm:$0xff]  ;;  %v908_v29 = vld [vmem:[#allocation5 + $0x38] sm:$0xff] }
  0x4e   :  { %3230 = vmatprep.mubr.msk.f32.mxu0 %vm114_vm0, %v94_v46  ;;  %1038 = vmatpush1.msra.mxu0 %v945_v34  ;;  %v939_v46 = vld [vmem:[#allocation5 + $0x130] sm:$0xff] }
  0x4f   :  { %1039 = vmatprep.subr.mxu0 %v942_v36  ;;  %v904_v36 = vld [vmem:[#allocation5 + $0x18] sm:$0xff] }
  0x50   :  { %1040 = vmatpush1.msra.mxu0 %v941_v38  ;;  %v903_v38 = vld [vmem:[#allocation5 + $0x10] sm:$0xff] }
  0x51   :  { %3231 = vmatmul.mubr.msk.f32.gmra.mxu0 %vm114_vm0, %v95_v47  ;;  %v934_v47 = vld [vmem:[#allocation5 + $0x108] sm:$0xff]  ;;  %1041 = vmatprep.subr.mxu0 %v938_v43 }
  0x52   :  { %3233 = vmatprep.mubr.msk.f32.mxu0 %vm114_vm0, %v96_v48  ;;  %1042 = vmatpush1.msra.mxu0 %v937_v45  ;;  %v1027_v45 = vld [vmem:[#allocation5 + $0x3f0] sm:$0xff] }
  0x53   :  { %1043 = vmatprep.subr.mxu0 %v934_v47  ;;  %v1024_v47 = vld [vmem:[#allocation5 + $0x3d8] sm:$0xff] }
  0x55   :  { %3234 = vmatmul.mubr.msk.f32.gmra.mxu0 %vm114_vm0, %v97_v49 }
  0x56   :  { %3236 = vmatprep.mubr.msk.f32.mxu0 %vm114_vm0, %v98_v50  ;;  %v936_v50 = vld [vmem:[#allocation5 + $0x118] sm:$0xff] }
  0x59   :  { %3237 = vmatmul.mubr.msk.f32.gmra.mxu0 %vm114_vm0, %v99_v51 }
  0x5a   :  { %3239 = vmatprep.mubr.msk.f32.mxu0 %vm114_vm0, %v100_v52  ;;  %v933_v52 = vld [vmem:[#allocation5 + $0x100] sm:$0xff] }
  0x5b   :  { %1044 = vmatpush1.msra.mxu0 %v933_v52 }
  0x5d   :  { %3240 = vmatmul.mubr.msk.f32.gmra.mxu0 %vm114_vm0, %v101_v53  ;;  %v935_v53 = vld [vmem:[#allocation5 + $0x110] sm:$0xff] }
  0x5e   :  { %3242 = vmatprep.mubr.msk.f32.mxu0 %vm114_vm0, %v102_v54  ;;  %v930_v54 = vld [vmem:[#allocation5 + $0xe8] sm:$0xff] }
  0x5f   :  { %1045 = vmatprep.subr.mxu0 %v930_v54  ;;  %v1020_v54 = vld [vmem:[#allocation5 + $0x3b8] sm:$0xff] }
  0x61   :  { %3243 = vmatmul.mubr.msk.f32.gmra.mxu0 %vm114_vm0, %v103_v55  ;;  %v932_v55 = vld [vmem:[#allocation5 + $0xf8] sm:$0xff] }
  0x62   :  { %3245 = vmatprep.mubr.msk.f32.mxu0 %vm114_vm0, %v104_v56  ;;  %v929_v56 = vld [vmem:[#allocation5 + $0xe0] sm:$0xff] }
  0x63   :  { %1046 = vmatpush1.msra.mxu0 %v929_v56  ;;  %v1019_v56 = vld [vmem:[#allocation5 + $0x3b0] sm:$0xff] }
  0x64   :  { %1047 = vmatprep.subr.mxu0 %v926_v61 }
  0x65   :  { %3246 = vmatmul.mubr.msk.f32.gmra.mxu0 %vm114_vm0, %v105_v57 }
  0x66   :  { %1048 = vmatpush1.msra.mxu0 %v925_v63  ;;  %v1015_v63 = vld [vmem:[#allocation5 + $0x390] sm:$0xff] }
  0xe9   :  { %v3202_v2 = vpop.f32.mrf.mxu0 }
  0xea   :  { %v283_v11 = vadd.f32 %v3202_v2, %v3725_v3  ;;  %v922_v2 = vld [vmem:[#allocation5 + $0xa8] sm:$0xff] }
  0xeb   :  { %v277_v4 = vpop.f32.mrf.mxu0  ;;  %1049 = vmatprep.subr.mxu0 %v922_v2  ;;  %v1012_v2 = vld [vmem:[#allocation5 + $0x378] sm:$0xff] }
  0xec   :  { %v278_v5 = vadd.f32 %v3725_v3, %v277_v4  ;;  %v437_v21 = vmax.f32 %v283_v11, 0.0  ;;  %v920_v11 = vld [vmem:[#allocation5 + $0x98] sm:$0xff]  ;;  %1050 = vmatpush1.msra.mxu0 %v921_v8 }
  0xed   :  { %v3205_v9 = vpop.f32.mrf.mxu0  ;;  %1051 = vmatprep.subr.mxu0 %v918_v10  ;;  %v1008_v10 = vld [vmem:[#allocation5 + $0x358] sm:$0xff] }
  0xee   :  { %v436_v12 = vmax.f32 %v278_v5, 0.0  ;;  %v293_v30 = vadd.f32 %v3205_v9, %v3725_v3  ;;  %v923_v9 = vld [vmem:[#allocation5 + $0xb0] sm:$0xff] }
  0xef   :  { %v287_v15 = vpop.f32.mrf.mxu0 }
  0xf0   :  { %565 = vmatmul.mubr.f32.vlgmr.msra.gmra.mxu1 %v436_v12  ;;  %v288_v22 = vadd.f32 %v3725_v3, %v287_v15  ;;  %v439_v39 = vmax.f32 %v293_v30, 0.0  ;;  %v917_v12 = vld [vmem:[#allocation5 + $0x80] sm:$0xff]  ;;  %v919_v15 = vld [vmem:[#allocation5 + $0x90] sm:$0xff] }
  0xf1   :  { %570 = vmatprep.mubr.f32.mxu1 %v4911_v1  ;;  %1287 = vmatpush1.msra.mxu1 %v963_v13  ;;  %v3208_v24 = vpop.f32.mrf.mxu0  ;;  %v905_v30 = vld [vmem:[#allocation5 + $0x20] sm:$0xff] }
  0xf2   :  { %1288 = vmatprep.subr.mxu1 %v960_v16  ;;  %v438_v31 = vmax.f32 %v288_v22, 0.0  ;;  %v303_v48 = vadd.f32 %v3208_v24, %v3725_v3  ;;  %1052 = vmatpush1.msra.mxu0 %v917_v12  ;;  %v912_v24 = vld [vmem:[#allocation5 + $0x58] sm:$0xff]  ;;  %v1007_v12 = vld [vmem:[#allocation5 + $0x350] sm:$0xff] }
  0xf3   :  { %1289 = vmatpush1.msra.mxu1 %v959_v18  ;;  %v297_v33 = vpop.f32.mrf.mxu0  ;;  %v916_v18 = vld [vmem:[#allocation5 + $0x78] sm:$0xff]  ;;  %1053 = vmatprep.subr.mxu0 %v914_v17 }
  0xf4   :  { %571 = vmatmul.mubr.f32.gmra.mxu1 %v437_v21  ;;  %1290 = vmatprep.subr.mxu1 %v956_v20  ;;  %v298_v40 = vadd.f32 %v3725_v3, %v297_v33  ;;  %v441_v57 = vmax.f32 %v303_v48, 0.0  ;;  %v915_v20 = vld [vmem:[#allocation5 + $0x70] sm:$0xff]  ;;  %v910_v21 = vld [vmem:[#allocation5 + $0x48] sm:$0xff]  ;;  %v1021_v48 = vld [vmem:[#allocation5 + $0x3c0] sm:$0xff] }
  0xf5   :  { %576 = vmatprep.mubr.f32.mxu1 %v4911_v1  ;;  %1291 = vmatpush1.msra.mxu1 %v955_v23  ;;  %v3211_v42 = vpop.f32.mrf.mxu0  ;;  %v907_v33 = vld [vmem:[#allocation5 + $0x30] sm:$0xff] }
  0xf6   :  { %1292 = vmatprep.subr.mxu1 %v952_v26  ;;  %v440_v49 = vmax.f32 %v298_v40, 0.0  ;;  %v313_v4 = vadd.f32 %v3211_v42, %v3725_v3  ;;  %1054 = vmatpush1.msra.mxu0 %v913_v19  ;;  %v909_v26 = vld [vmem:[#allocation5 + $0x40] sm:$0xff]  ;;  %v1028_v42 = vld [vmem:[#allocation5 + $0x3f8] sm:$0xff]  ;;  %v1003_v19 = vld [vmem:[#allocation5 + $0x330] sm:$0xff] }
  0xf7   :  { %1293 = vmatpush1.msra.mxu1 %v951_v28  ;;  %v307_v51 = vpop.f32.mrf.mxu0  ;;  %1055 = vmatprep.subr.mxu0 %v910_v21  ;;  %v906_v28 = vld [vmem:[#allocation5 + $0x28] sm:$0xff]  ;;  %v1000_v21 = vld [vmem:[#allocation5 + $0x318] sm:$0xff] }
  0xf8   :  { %577 = vmatmul.mubr.f32.gmra.mxu1 %v438_v31  ;;  %1294 = vmatprep.subr.mxu1 %v948_v32  ;;  %v308_v58 = vadd.f32 %v3725_v3, %v307_v51  ;;  %v443_v13 = vmax.f32 %v313_v4, 0.0  ;;  %v1023_v51 = vld [vmem:[#allocation5 + $0x3d0] sm:$0xff]  ;;  %v1009_v4 = vld [vmem:[#allocation5 + $0x360] sm:$0xff] }
  0xf9   :  { %582 = vmatprep.mubr.f32.mxu1 %v4911_v1  ;;  %1295 = vmatpush1.msra.mxu1 %v947_v35  ;;  %v3214_v60 = vpop.f32.mrf.mxu0  ;;  %v902_v35 = vld [vmem:[#allocation5 + $0x8] sm:$0xff] }
  0xfa   :  { %1296 = vmatprep.subr.mxu1 %v944_v37  ;;  %v442_v5 = vmax.f32 %v308_v58, 0.0  ;;  %v323_v22 = vadd.f32 %v3214_v60, %v3725_v3  ;;  %1056 = vmatpush1.msra.mxu0 %v909_v26  ;;  %v901_v37 = vld [vmem:[#allocation5] sm:$0xff]  ;;  %v1016_v60 = vld [vmem:[#allocation5 + $0x398] sm:$0xff] }
  0xfb   :  { %1297 = vmatpush1.msra.mxu1 %v943_v41  ;;  %v317_v7 = vpop.f32.mrf.mxu0  ;;  %1057 = vmatprep.subr.mxu0 %v906_v28  ;;  %v996_v28 = vld [vmem:[#allocation5 + $0x2f8] sm:$0xff] }
  0xfc   :  { %583 = vmatmul.mubr.f32.gmra.mxu1 %v439_v39  ;;  %1298 = vmatprep.subr.mxu1 %v940_v44  ;;  %v318_v14 = vadd.f32 %v3725_v3, %v317_v7  ;;  %v445_v31 = vmax.f32 %v323_v22, 0.0  ;;  %v1026_v39 = vld [vmem:[#allocation5 + $0x3e8] sm:$0xff]  ;;  %v1025_v44 = vld [vmem:[#allocation5 + $0x3e0] sm:$0xff]  ;;  %v1011_v7 = vld [vmem:[#allocation5 + $0x370] sm:$0xff] }
  0xfd   :  { %588 = vmatprep.mubr.f32.mxu1 %v4911_v1  ;;  %1299 = vmatpush1.msra.mxu1 %v939_v46  ;;  %v3217_v16 = vpop.f32.mrf.mxu0  ;;  %v1022_v46 = vld [vmem:[#allocation5 + $0x3c8] sm:$0xff]  ;;  %v997_v22 = vld [vmem:[#allocation5 + $0x300] sm:$0xff] }
  0xfe   :  { %1300 = vmatprep.subr.mxu1 %v936_v50  ;;  %v444_v23 = vmax.f32 %v318_v14, 0.0  ;;  %1058 = vmatpush1.msra.mxu0 %v905_v30  ;;  %v333_v40 = vadd.f32 %v3217_v16, %v3725_v3  ;;  %v1004_v16 = vld [vmem:[#allocation5 + $0x338] sm:$0xff]  ;;  %v995_v30 = vld [vmem:[#allocation5 + $0x2f0] sm:$0xff] }
  0xff   :  { %1301 = vmatpush1.msra.mxu1 %v935_v53  ;;  %v327_v25 = vpop.f32.mrf.mxu0  ;;  %1059 = vmatprep.subr.mxu0 %v902_v35  ;;  %v1018_v53 = vld [vmem:[#allocation5 + $0x3a8] sm:$0xff] }
 0x100   :  { %589 = vmatmul.mubr.f32.gmra.mxu1 %v440_v49  ;;  %1302 = vmatprep.subr.mxu1 %v932_v55  ;;  %v328_v32 = vadd.f32 %v3725_v3, %v327_v25  ;;  %v447_v49 = vmax.f32 %v333_v40, 0.0  ;;  %v1017_v55 = vld [vmem:[#allocation5 + $0x3a0] sm:$0xff]  ;;  %v999_v25 = vld [vmem:[#allocation5 + $0x310] sm:$0xff] }
 0x101   :  { %594 = vmatprep.mubr.f32.mxu1 %v4911_v1  ;;  %1303 = vmatpush1.msra.mxu1 %v931_v59  ;;  %v3220_v34 = vpop.f32.mrf.mxu0  ;;  %v985_v40 = vld [vmem:[#allocation5 + $0x2a0] sm:$0xff] }
 0x102   :  { %1304 = vmatprep.subr.mxu1 %v928_v62  ;;  %v446_v41 = vmax.f32 %v328_v32, 0.0  ;;  %1060 = vmatpush1.msra.mxu0 %v901_v37  ;;  %v343_v58 = vadd.f32 %v3220_v34, %v3725_v3  ;;  %v1013_v62 = vld [vmem:[#allocation5 + $0x380] sm:$0xff]  ;;  %v992_v34 = vld [vmem:[#allocation5 + $0x2d8] sm:$0xff]  ;;  %v991_v37 = vld [vmem:[#allocation5 + $0x2d0] sm:$0xff] }
 0x103   :  { %1305 = vmatpush1.msra.mxu1 %v927_v0  ;;  %v337_v43 = vpop.f32.mrf.mxu0  ;;  %1061 = vmatprep.subr.mxu0 %v1026_v39  ;;  %v1010_v0 = vld [vmem:[#allocation5 + $0x368] sm:$0xff]  ;;  %v988_v39 = vld [vmem:[#allocation5 + $0x2b8] sm:$0xff] }
 0x104   :  { %595 = vmatmul.mubr.f32.gmra.mxu1 %v441_v57  ;;  %1306 = vmatprep.subr.mxu1 %v924_v6  ;;  %v338_v50 = vadd.f32 %v3725_v3, %v337_v43  ;;  %v1014_v57 = vld [vmem:[#allocation5 + $0x388] sm:$0xff]  ;;  %v987_v43 = vld [vmem:[#allocation5 + $0x2b0] sm:$0xff] }
 0x105   :  { %600 = vmatprep.mubr.f32.mxu1 %v4911_v1  ;;  %1307 = vmatpush1.msra.mxu1 %v923_v9  ;;  %v3223_v52 = vpop.f32.mrf.mxu0  ;;  %v1006_v9 = vld [vmem:[#allocation5 + $0x348] sm:$0xff] }
 0x106   :  { %1308 = vmatprep.subr.mxu1 %v920_v11  ;;  %1062 = vmatpush2.msra.mxu0 %v1025_v44  ;;  %v448_v59 = vmax.f32 %v338_v50, 0.0  ;;  %v1005_v11 = vld [vmem:[#allocation5 + $0x340] sm:$0xff]  ;;  %v353_v14 = vadd.f32 %v3223_v52, %v3725_v3  ;;  %v980_v52 = vld [vmem:[#allocation5 + $0x278] sm:$0xff] }
 0x107   :  { %1309 = vmatpush1.msra.mxu1 %v919_v15  ;;  %1063 = vmatprep.subr.mxu0 %v1022_v46  ;;  %v347_v61 = vpop.f32.mrf.mxu0  ;;  %v984_v46 = vld [vmem:[#allocation5 + $0x298] sm:$0xff] }
 0x108   :  { %601 = vmatmul.mubr.f32.gmra.mxu1 %v442_v5  ;;  %1310 = vmatprep.subr.mxu1 %v916_v18  ;;  %v449_v5 = vmax.f32 %v343_v58, 0.0  ;;  %v348_v6 = vadd.f32 %v3725_v3, %v347_v61  ;;  %v1001_v18 = vld [vmem:[#allocation5 + $0x320] sm:$0xff]  ;;  %v975_v61 = vld [vmem:[#allocation5 + $0x250] sm:$0xff] }
 0x109   :  { %606 = vmatprep.mubr.f32.mxu1 %v4911_v1  ;;  %1311 = vmatpush1.msra.mxu1 %v915_v20  ;;  %v3226_v8 = vpop.f32.mrf.mxu0  ;;  %v998_v20 = vld [vmem:[#allocation5 + $0x308] sm:$0xff]  ;;  %v973_v58 = vld [vmem:[#allocation5 + $0x240] sm:$0xff] }
 0x10a   :  { %1312 = vmatprep.subr.mxu1 %v912_v24  ;;  %1064 = vmatpush2.msra.mxu0 %v1021_v48  ;;  %v450_v15 = vmax.f32 %v348_v6, 0.0  ;;  %v363_v32 = vadd.f32 %v3226_v8, %v3725_v3  ;;  %v983_v48 = vld [vmem:[#allocation5 + $0x290] sm:$0xff]  ;;  %v968_v8 = vld [vmem:[#allocation5 + $0x218] sm:$0xff] }
 0x10b   :  { %1313 = vmatpush1.msra.mxu1 %v911_v27  ;;  %1065 = vmatprep.subr.mxu0 %v1018_v53  ;;  %v357_v17 = vpop.f32.mrf.mxu0  ;;  %v994_v27 = vld [vmem:[#allocation5 + $0x2e8] sm:$0xff] }
 0x10c   :  { %607 = vmatmul.mubr.f32.gmra.mxu1 %v443_v13  ;;  %1314 = vmatprep.subr.mxu1 %v908_v29  ;;  %v1002_v13 = vld [vmem:[#allocation5 + $0x328] sm:$0xff]  ;;  %v358_v24 = vadd.f32 %v3725_v3, %v357_v17  ;;  %v993_v29 = vld [vmem:[#allocation5 + $0x2e0] sm:$0xff] }
 0x10d   :  { %612 = vmatprep.mubr.f32.mxu1 %v4911_v1  ;;  %1315 = vmatpush1.msra.mxu1 %v907_v33  ;;  %v3229_v26 = vpop.f32.mrf.mxu0 }
 0x10e   :  { %1316 = vmatprep.subr.mxu1 %v904_v36  ;;  %1066 = vmatpush2.msra.mxu0 %v1017_v55  ;;  %v452_v33 = vmax.f32 %v358_v24, 0.0  ;;  %v989_v36 = vld [vmem:[#allocation5 + $0x2c0] sm:$0xff]  ;;  %v373_v50 = vadd.f32 %v3229_v26, %v3725_v3  ;;  %v979_v55 = vld [vmem:[#allocation5 + $0x270] sm:$0xff] }
 0x10f   :  { %1317 = vmatpush1.msra.mxu1 %v903_v38  ;;  %1067 = vmatprep.subr.mxu0 %v1014_v57  ;;  %v367_v35 = vpop.f32.mrf.mxu0  ;;  %v986_v38 = vld [vmem:[#allocation5 + $0x2a8] sm:$0xff]  ;;  %v976_v57 = vld [vmem:[#allocation5 + $0x258] sm:$0xff] }
 0x110   :  { %613 = vmatmul.mubr.f32.gmra.mxu1 %v444_v23  ;;  %1318 = vmatprep.subr.mxu1 %v1028_v42  ;;  %v451_v23 = vmax.f32 %v353_v14, 0.0  ;;  %v368_v42 = vadd.f32 %v3725_v3, %v367_v35 }
 0x111   :  { %618 = vmatprep.mubr.f32.mxu1 %v4911_v1  ;;  %1319 = vmatpush2.msra.mxu1 %v1027_v45  ;;  %v3232_v44 = vpop.f32.mrf.mxu0  ;;  %v982_v45 = vld [vmem:[#allocation5 + $0x288] sm:$0xff] }
 0x112   :  { %1320 = vmatprep.subr.mxu1 %v1024_v47  ;;  %1068 = vmatpush2.msra.mxu0 %v1013_v62  ;;  %v981_v47 = vld [vmem:[#allocation5 + $0x280] sm:$0xff]  ;;  %v383_v6 = vadd.f32 %v3232_v44, %v3725_v3 }
 0x113   :  { %1321 = vmatpush2.msra.mxu1 %v1023_v51  ;;  %1069 = vmatprep.subr.mxu0 %v1010_v0  ;;  %v454_v51 = vmax.f32 %v368_v42, 0.0  ;;  %v377_v53 = vpop.f32.mrf.mxu0  ;;  %v972_v0 = vld [vmem:[#allocation5 + $0x238] sm:$0xff]  ;;  %v1603_v44 = vld [vmem:[#allocation2 + $0x1e0] sm:$0xff] }
 0x114   :  { %619 = vmatmul.mubr.f32.gmra.mxu1 %v445_v31  ;;  %1322 = vmatprep.subr.mxu1 %v1020_v54  ;;  %v990_v31 = vld [vmem:[#allocation5 + $0x2c8] sm:$0xff]  ;;  %v977_v54 = vld [vmem:[#allocation5 + $0x260] sm:$0xff] }
 0x115   :  { %624 = vmatprep.mubr.f32.mxu1 %v4911_v1  ;;  %1323 = vmatpush2.msra.mxu1 %v1019_v56  ;;  %v974_v56 = vld [vmem:[#allocation5 + $0x248] sm:$0xff]  ;;  %v3235_v62 = vpop.f32.mrf.mxu0 }
 0x116   :  { %1324 = vmatprep.subr.mxu1 %v1016_v60  ;;  %1070 = vmatpush2.msra.mxu0 %v1009_v4  ;;  %v378_v60 = vadd.f32 %v3725_v3, %v377_v53  ;;  %v971_v4 = vld [vmem:[#allocation5 + $0x230] sm:$0xff]  ;;  %v1595_v53 = vld [vmem:[#allocation2 + $0x1a0] sm:$0xff] }
 0x117   :  { %1325 = vmatpush2.msra.mxu1 %v1015_v63  ;;  %1071 = vmatprep.subr.mxu0 %v1006_v9  ;;  %v970_v63 = vld [vmem:[#allocation5 + $0x228] sm:$0xff]  ;;  %v387_v9 = vpop.f32.mrf.mxu0 }
 0x118   :  { %625 = vmatmul.mubr.f32.gmra.mxu1 %v446_v41  ;;  %1326 = vmatprep.subr.mxu1 %v1012_v2  ;;  %v453_v41 = vmax.f32 %v363_v32, 0.0  ;;  %v969_v2 = vld [vmem:[#allocation5 + $0x220] sm:$0xff] }
 0x119   :  { %630 = vmatprep.mubr.f32.mxu1 %v4911_v1  ;;  %1327 = vmatpush2.msra.mxu1 %v1011_v7  ;;  %v456_v7 = vmax.f32 %v378_v60, 0.0  ;;  %v3238_v14 = vpop.f32.mrf.mxu0 }
 0x11a   :  { %1328 = vmatprep.subr.mxu1 %v1008_v10  ;;  %1072 = vmatpush2.msra.mxu0 %v1005_v11  ;;  %v965_v10 = vld [vmem:[#allocation5 + $0x200] sm:$0xff]  ;;  %v967_v11 = vld [vmem:[#allocation5 + $0x210] sm:$0xff] }
 0x11b   :  { %1329 = vmatpush2.msra.mxu1 %v1007_v12  ;;  %1073 = vmatprep.subr.mxu0 %v1002_v13  ;;  %v457_v12 = vmax.f32 %v383_v6, 0.0  ;;  %v388_v13 = vadd.f32 %v3725_v3, %v387_v9  ;;  %v397_v17 = vpop.f32.mrf.mxu0  ;;  %v1583_v6 = vld [vmem:[#allocation2 + $0x140] sm:$0xff] }
 0x11c   :  { %631 = vmatmul.mubr.f32.gmra.mxu1 %v447_v49  ;;  %1330 = vmatprep.subr.mxu1 %v1004_v16  ;;  %v978_v49 = vld [vmem:[#allocation5 + $0x268] sm:$0xff] }
 0x11d   :  { %636 = vmatprep.mubr.f32.mxu1 %v4911_v1  ;;  %1074 = vmatpush2.msra.mxu0 %v1001_v18  ;;  %v458_v16 = vmax.f32 %v388_v13, 0.0  ;;  %v1576_v13 = vld [vmem:[#allocation2 + $0x108] sm:$0xff] }
 0x11e   :  { %1331 = vmatpush2.msra.mxu1 %v1003_v19  ;;  %1075 = vmatprep.subr.mxu0 %v998_v20  ;;  %v398_v19 = vadd.f32 %v3725_v3, %v397_v17  ;;  %v3241_v20 = vpop.f32.mrf.mxu0 }
 0x11f   :  { %1332 = vmatprep.subr.mxu1 %v1000_v21  ;;  %1076 = vmatpush2.msra.mxu0 %v997_v22  ;;  %v1604_v21 = vld [vmem:[#allocation2 + $0x1e8] sm:$0xff]  ;;  %v403_v22 = vadd.f32 %v3238_v14, %v3725_v3 }
 0x120   :  { %637 = vmatmul.mubr.f32.gmra.mxu1 %v448_v59  ;;  %1077 = vmatprep.subr.mxu0 %v994_v27  ;;  %v455_v59 = vmax.f32 %v373_v50, 0.0  ;;  %v407_v24 = vpop.f32.mrf.mxu0 }
 0x121   :  { %642 = vmatprep.mubr.f32.mxu1 %v4911_v1  ;;  %1333 = vmatpush2.msra.mxu1 %v999_v25  ;;  %v461_v25 = vmax.f32 %v403_v22, 0.0  ;;  %v408_v26 = vadd.f32 %v3725_v3, %v407_v24 }
 0x122   :  { %1334 = vmatprep.subr.mxu1 %v996_v28  ;;  %1078 = vmatpush2.msra.mxu0 %v993_v29  ;;  %v3244_v27 = vpop.f32.mrf.mxu0  ;;  %v413_v28 = vadd.f32 %v3241_v20, %v3725_v3  ;;  %v1572_v20 = vld [vmem:[#allocation2 + $0xe8] sm:$0xff] }
 0x123   :  { %1335 = vmatpush2.msra.mxu1 %v995_v30  ;;  %1079 = vmatprep.subr.mxu0 %v990_v31  ;;  %v462_v29 = vmax.f32 %v408_v26, 0.0 }
 0x124   :  { %643 = vmatmul.mubr.f32.gmra.mxu1 %v449_v5  ;;  %1336 = vmatprep.subr.mxu1 %v992_v34  ;;  %v966_v5 = vld [vmem:[#allocation5 + $0x208] sm:$0xff]  ;;  %v417_v30 = vpop.f32.mrf.mxu0  ;;  %v463_v31 = vmax.f32 %v413_v28, 0.0  ;;  %v423_v34 = vadd.f32 %v3244_v27, %v3725_v3 }
 0x125   :  { %648 = vmatprep.mubr.f32.mxu1 %v4911_v1  ;;  %1080 = vmatpush2.msra.mxu0 %v989_v36  ;;  %v418_v32 = vadd.f32 %v3725_v3, %v417_v30  ;;  %v1568_v27 = vld [vmem:[#allocation2 + $0xc8] sm:$0xff] }
 0x126   :  { %1337 = vmatpush2.msra.mxu1 %v991_v37  ;;  %1081 = vmatprep.subr.mxu0 %v986_v38  ;;  %v465_v37 = vmax.f32 %v423_v34, 0.0 }
 0x127   :  { %1338 = vmatprep.subr.mxu1 %v988_v39  ;;  %1082 = vmatpush2.msra.mxu0 %v985_v40  ;;  %v464_v35 = vmax.f32 %v418_v32, 0.0 }
 0x128   :  { %649 = vmatmul.mubr.f32.gmra.mxu1 %v450_v15  ;;  %1083 = vmatprep.subr.mxu0 %v982_v45  ;;  %v393_v15 = vadd.f32 %v3235_v62, %v3725_v3  ;;  %v1600_v45 = vld [vmem:[#allocation2 + $0x1c8] sm:$0xff]  ;;  %v1587_v62 = vld [vmem:[#allocation2 + $0x160] sm:$0xff] }
 0x129   :  { %654 = vmatprep.mubr.f32.mxu1 %v4911_v1  ;;  %1339 = vmatpush2.msra.mxu1 %v987_v43 }
 0x12a   :  { %1340 = vmatprep.subr.mxu1 %v984_v46  ;;  %1084 = vmatpush2.msra.mxu0 %v981_v47  ;;  %v459_v18 = vmax.f32 %v393_v15, 0.0 }
 0x12b   :  { %1341 = vmatpush2.msra.mxu1 %v983_v48  ;;  %1085 = vmatprep.subr.mxu0 %v978_v49  ;;  %v1599_v48 = vld [vmem:[#allocation2 + $0x1c0] sm:$0xff]  ;;  %v1596_v49 = vld [vmem:[#allocation2 + $0x1a8] sm:$0xff] }
 0x12c   :  { %655 = vmatmul.mubr.f32.gmra.mxu1 %v451_v23  ;;  %1342 = vmatprep.subr.mxu1 %v980_v52  ;;  %v460_v23 = vmax.f32 %v398_v19, 0.0 }
 0x12d   :  { %660 = vmatprep.mubr.f32.mxu1 %v4911_v1  ;;  %1086 = vmatpush2.msra.mxu0 %v977_v54  ;;  %v1592_v54 = vld [vmem:[#allocation2 + $0x188] sm:$0xff] }
 0x12e   :  { %1343 = vmatpush2.msra.mxu1 %v979_v55  ;;  %1087 = vmatprep.subr.mxu0 %v974_v56 }
 0x12f   :  { %1344 = vmatprep.subr.mxu1 %v976_v57  ;;  %1088 = vmatpush2.msra.mxu0 %v973_v58  ;;  %v1591_v58 = vld [vmem:[#allocation2 + $0x180] sm:$0xff] }
 0x130   :  { %661 = vmatmul.mubr.f32.gmra.mxu1 %v452_v33  ;;  %1089 = vmatprep.subr.mxu0 %v970_v63  ;;  %v3247_v33 = vpop.f32.mrf.mxu0  ;;  %v1584_v63 = vld [vmem:[#allocation2 + $0x148] sm:$0xff] }
 0x131   :  { %666 = vmatprep.mubr.f32.mxu1 %v4911_v1  ;;  %1345 = vmatpush2.msra.mxu1 %v975_v61  ;;  %v433_v39 = vadd.f32 %v3247_v33, %v3725_v3  ;;  %v1567_v33 = vld [vmem:[#allocation2 + $0xc0] sm:$0xff] }
 0x132   :  { %1346 = vmatprep.subr.mxu1 %v972_v0  ;;  %1090 = vmatpush2.msra.mxu0 %v969_v2  ;;  %v427_v36 = vpop.f32.mrf.mxu0 }
 0x133   :  { %1347 = vmatpush2.msra.mxu1 %v971_v4  ;;  %1091 = vmatprep.subr.mxu0 %v966_v5  ;;  %v428_v38 = vadd.f32 %v3725_v3, %v427_v36 }
 0x134   :  { %667 = vmatmul.mubr.f32.gmra.mxu1 %v453_v41  ;;  %1348 = vmatprep.subr.mxu1 %v968_v8  ;;  %v467_v41 = vmax.f32 %v433_v39, 0.0 }
 0x135   :  { %672 = vmatprep.mubr.f32.mxu1 %v4911_v1  ;;  %1092 = vmatpush2.msra.mxu0 %v965_v10  ;;  %v466_v40 = vmax.f32 %v428_v38, 0.0 }
 0x136   :  { %1349 = vmatpush2.msra.mxu1 %v967_v11  ;;  %1710 = vmatprep.subr.mxu0 %v1604_v21 }
 0x137   :  { %2554 = vmatprep.subr.mxu1 %v4911_v1 }
 0x138   :  { %673 = vmatmul.mubr.f32.gmra.mxu1 %v454_v51 }
 0x139   :  { %678 = vmatprep.mubr.f32.mxu1 %v4911_v1 }
 0x13c   :  { %679 = vmatmul.mubr.f32.gmra.mxu1 %v455_v59  ;;  %v1588_v59 = vld [vmem:[#allocation2 + $0x168] sm:$0xff] }
 0x13d   :  { %684 = vmatprep.mubr.f32.mxu1 %v4911_v1 }
 0x140   :  { %685 = vmatmul.mubr.f32.gmra.mxu1 %v456_v7  ;;  %v1580_v7 = vld [vmem:[#allocation2 + $0x128] sm:$0xff] }
 0x141   :  { %690 = vmatprep.mubr.f32.mxu1 %v4911_v1 }
 0x144   :  { %691 = vmatmul.mubr.f32.gmra.mxu1 %v457_v12  ;;  %v1579_v12 = vld [vmem:[#allocation2 + $0x120] sm:$0xff] }
 0x145   :  { %696 = vmatprep.mubr.f32.mxu1 %v4911_v1 }
 0x148   :  { %697 = vmatmul.mubr.f32.gmra.mxu1 %v458_v16 }
 0x149   :  { %702 = vmatprep.mubr.f32.mxu1 %v4911_v1 }
 0x14c   :  { %703 = vmatmul.mubr.f32.gmra.mxu1 %v459_v18  ;;  %v1575_v18 = vld [vmem:[#allocation2 + $0x100] sm:$0xff] }
 0x14d   :  { %708 = vmatprep.mubr.f32.mxu1 %v4911_v1 }
 0x150   :  { %709 = vmatmul.mubr.f32.gmra.mxu1 %v460_v23 }
 0x151   :  { %714 = vmatprep.mubr.f32.mxu1 %v4911_v1 }
 0x154   :  { %715 = vmatmul.mubr.f32.gmra.mxu1 %v461_v25  ;;  %v1571_v25 = vld [vmem:[#allocation2 + $0xe0] sm:$0xff] }
 0x155   :  { %720 = vmatprep.mubr.f32.mxu1 %v4911_v1 }
 0x158   :  { %721 = vmatmul.mubr.f32.gmra.mxu1 %v462_v29 }
 0x159   :  { %726 = vmatprep.mubr.f32.mxu1 %v4911_v1 }
 0x15c   :  { %727 = vmatmul.mubr.f32.gmra.mxu1 %v463_v31 }
 0x15d   :  { %732 = vmatprep.mubr.f32.mxu1 %v4911_v1 }
 0x160   :  { %733 = vmatmul.mubr.f32.gmra.mxu1 %v464_v35  ;;  %v1564_v35 = vld [vmem:[#allocation2 + $0xa8] sm:$0xff] }
 0x161   :  { %738 = vmatprep.mubr.f32.mxu1 %v4911_v1 }
 0x164   :  { %739 = vmatmul.mubr.f32.gmra.mxu1 %v465_v37 }
 0x165   :  { %744 = vmatprep.mubr.f32.mxu1 %v4911_v1 }
 0x168   :  { %745 = vmatmul.mubr.f32.gmra.mxu1 %v466_v40 }
 0x169   :  { %750 = vmatprep.mubr.f32.mxu1 %v4911_v1 }
 0x16c   :  { %751 = vmatmul.mubr.f32.gmra.mxu1 %v467_v41  ;;  %v1563_v41 = vld [vmem:[#allocation2 + $0xa0] sm:$0xff] }
 0x1b0   :  { %v566_v42 = vpop.f32.mrf.mxu1 }
 0x1b2   :  { %v3791_v43 = vpop.f32.mrf.mxu1 }
 0x1b3   :  { %1093 = vmatprep.mubr.f32.mxu0 %v3791_v43  ;;  %1350 = vmatprep.mubr.f32.mxu1 %v3791_v43 }
 0x1b4   :  { %v572_v46 = vpop.f32.mrf.mxu1  ;;  %1094 = vmatmul.mubr.f32.vlgmr.msra.gmra.mxu0 %v566_v42  ;;  %1351 = vmatmul.mubr.f32.vlgmr.msra.gmra.mxu1 %v566_v42 }
 0x1b5   :  { %v757_v47 = vmax.f32 %v566_v42, %v572_v46  ;;  %1711 = vmatpush1.msra.mxu0 %v1603_v44  ;;  %v1560_v44 = vld [vmem:[#allocation2 + $0x88] sm:$0xff] }
 0x1b6   :  { %v3795_v3 = vpop.f32.mrf.mxu1  ;;  %1712 = vmatprep.subr.mxu0 %v1600_v45 }
 0x1b7   :  { %1099 = vmatprep.mubr.f32.mxu0 %v3795_v3  ;;  %1356 = vmatprep.mubr.f32.mxu1 %v3795_v3 }
 0x1b8   :  { %v578_v50 = vpop.f32.mrf.mxu1  ;;  %1100 = vmatmul.mubr.f32.gmra.mxu0 %v572_v46  ;;  %1357 = vmatmul.mubr.f32.gmra.mxu1 %v572_v46 }
 0x1b9   :  { %v758_v51 = vmax.f32 %v757_v47, %v578_v50  ;;  %1713 = vmatpush1.msra.mxu0 %v1599_v48  ;;  %v1559_v48 = vld [vmem:[#allocation2 + $0x80] sm:$0xff] }
 0x1ba   :  { %v3799_v52 = vpop.f32.mrf.mxu1  ;;  %1714 = vmatprep.subr.mxu0 %v1596_v49 }
 0x1bb   :  { %1105 = vmatprep.mubr.f32.mxu0 %v3799_v52  ;;  %1362 = vmatprep.mubr.f32.mxu1 %v3799_v52 }
 0x1bc   :  { %v584_v55 = vpop.f32.mrf.mxu1  ;;  %1106 = vmatmul.mubr.f32.gmra.mxu0 %v578_v50  ;;  %1363 = vmatmul.mubr.f32.gmra.mxu1 %v578_v50  ;;  %v1556_v50 = vld [vmem:[#allocation2 + $0x68] sm:$0xff] }
 0x1bd   :  { %v759_v56 = vmax.f32 %v758_v51, %v584_v55  ;;  %1715 = vmatpush1.msra.mxu0 %v1595_v53 }
 0x1be   :  { %v3803_v57 = vpop.f32.mrf.mxu1  ;;  %1716 = vmatprep.subr.mxu0 %v1592_v54 }
 0x1bf   :  { %1111 = vmatprep.mubr.f32.mxu0 %v3803_v57  ;;  %1368 = vmatprep.mubr.f32.mxu1 %v3803_v57  ;;  %v760_v2 = vrot.slane %v759_v56, 4 }
 0x1c0   :  { %v590_v60 = vpop.f32.mrf.mxu1  ;;  %1112 = vmatmul.mubr.f32.gmra.mxu0 %v584_v55  ;;  %1369 = vmatmul.mubr.f32.gmra.mxu1 %v584_v55  ;;  %v1555_v55 = vld [vmem:[#allocation2 + $0x60] sm:$0xff] }
 0x1c1   :  { %1717 = vmatpush1.msra.mxu0 %v1591_v58  ;;  %v761_v9 = vmax.f32 %v759_v56, %v760_v2  ;;  %v1552_v58 = vld [vmem:[#allocation2 + $0x48] sm:$0xff] }
 0x1c2   :  { %v3807_v61 = vpop.f32.mrf.mxu1  ;;  %1718 = vmatprep.subr.mxu0 %v1588_v59 }
 0x1c3   :  { %1117 = vmatprep.mubr.f32.mxu0 %v3807_v61  ;;  %1374 = vmatprep.mubr.f32.mxu1 %v3807_v61  ;;  %v762_v15 = vrot.slane %v761_v9, 2 }
 0x1c4   :  { %v596_v0 = vpop.f32.mrf.mxu1  ;;  %1118 = vmatmul.mubr.f32.gmra.mxu0 %v590_v60  ;;  %1375 = vmatmul.mubr.f32.gmra.mxu1 %v590_v60 }
 0x1c5   :  { %v775_v4 = vmax.f32 %v590_v60, %v596_v0  ;;  %1719 = vmatpush1.msra.mxu0 %v1587_v62  ;;  %v763_v22 = vmax.f32 %v761_v9, %v762_v15 }
 0x1c6   :  { %v3811_v5 = vpop.f32.mrf.mxu1  ;;  %1720 = vmatprep.subr.mxu0 %v1584_v63 }
 0x1c7   :  { %1123 = vmatprep.mubr.f32.mxu0 %v3811_v5  ;;  %1380 = vmatprep.mubr.f32.mxu1 %v3811_v5  ;;  %v764_v29 = vrot.slane %v763_v22, 1 }
 0x1c8   :  { %v602_v8 = vpop.f32.mrf.mxu1  ;;  %1124 = vmatmul.mubr.f32.gmra.mxu0 %v596_v0  ;;  %1381 = vmatmul.mubr.f32.gmra.mxu1 %v596_v0  ;;  %v1551_v0 = vld [vmem:[#allocation2 + $0x40] sm:$0xff] }
 0x1c9   :  { %v776_v10 = vmax.f32 %v775_v4, %v602_v8  ;;  %1721 = vmatpush1.msra.mxu0 %v1583_v6  ;;  %v765_v37 = vmax.f32 %v763_v22, %v764_v29  ;;  %v1548_v4 = vld [vmem:[#allocation2 + $0x28] sm:$0xff] }
 0x1ca   :  { %v3815_v11 = vpop.f32.mrf.mxu1  ;;  %1722 = vmatprep.subr.mxu0 %v1580_v7 }
 0x1cb   :  { %1129 = vmatprep.mubr.f32.mxu0 %v3815_v11  ;;  %1386 = vmatprep.mubr.f32.mxu1 %v3815_v11 }
 0x1cc   :  { %v608_v14 = vpop.f32.mrf.mxu1  ;;  %1130 = vmatmul.mubr.f32.gmra.mxu0 %v602_v8  ;;  %1387 = vmatmul.mubr.f32.gmra.mxu1 %v602_v8 }
 0x1cd   :  { %v777_v16 = vmax.f32 %v776_v10, %v608_v14  ;;  %1723 = vmatpush1.msra.mxu0 %v1579_v12  ;;  %v1547_v10 = vld [vmem:[#allocation2 + $0x20] sm:$0xff] }
 0x1ce   :  { %v3819_v17 = vpop.f32.mrf.mxu1  ;;  %1724 = vmatprep.subr.mxu0 %v1576_v13  ;;  %v1544_v13 = vld [vmem:[#allocation2 + $0x8] sm:$0xff] }
 0x1cf   :  { %v778_v19 = vrot.slane %v777_v16, 4  ;;  %1135 = vmatprep.mubr.f32.mxu0 %v3819_v17  ;;  %1392 = vmatprep.mubr.f32.mxu1 %v3819_v17 }
 0x1d0   :  { %v614_v21 = vpop.f32.mrf.mxu1  ;;  %1136 = vmatmul.mubr.f32.gmra.mxu0 %v608_v14  ;;  %1393 = vmatmul.mubr.f32.gmra.mxu1 %v608_v14 }
 0x1d1   :  { %v779_v23 = vmax.f32 %v777_v16, %v778_v19  ;;  %1725 = vmatpush1.msra.mxu0 %v1575_v18  ;;  %v1543_v18 = vld [vmem:[#allocation2] sm:$0xff] }
 0x1d2   :  { %v3823_v24 = vpop.f32.mrf.mxu1  ;;  %1726 = vmatprep.subr.mxu0 %v1572_v20  ;;  %v1668_v20 = vld [vmem:[#allocation2 + $0x3e8] sm:$0xff] }
 0x1d3   :  { %v780_v26 = vrot.slane %v779_v23, 2  ;;  %1141 = vmatprep.mubr.f32.mxu0 %v3823_v24  ;;  %1398 = vmatprep.mubr.f32.mxu1 %v3823_v24 }
 0x1d4   :  { %v620_v28 = vpop.f32.mrf.mxu1  ;;  %1142 = vmatmul.mubr.f32.gmra.mxu0 %v614_v21  ;;  %1399 = vmatmul.mubr.f32.gmra.mxu1 %v614_v21 }
 0x1d5   :  { %v781_v30 = vmax.f32 %v779_v23, %v780_v26  ;;  %v793_v31 = vmax.f32 %v614_v21, %v620_v28  ;;  %1727 = vmatpush1.msra.mxu0 %v1571_v25  ;;  %v1667_v25 = vld [vmem:[#allocation2 + $0x3e0] sm:$0xff] }
 0x1d6   :  { %v3827_v32 = vpop.f32.mrf.mxu1  ;;  %1728 = vmatprep.subr.mxu0 %v1568_v27  ;;  %v1664_v27 = vld [vmem:[#allocation2 + $0x3c8] sm:$0xff] }
 0x1d7   :  { %v782_v34 = vrot.slane %v781_v30, 1  ;;  %1147 = vmatprep.mubr.f32.mxu0 %v3827_v32  ;;  %1404 = vmatprep.mubr.f32.mxu1 %v3827_v32 }
 0x1d8   :  { %v626_v36 = vpop.f32.mrf.mxu1  ;;  %1148 = vmatmul.mubr.f32.gmra.mxu0 %v620_v28  ;;  %1405 = vmatmul.mubr.f32.gmra.mxu1 %v620_v28 }
 0x1d9   :  { %v783_v38 = vmax.f32 %v781_v30, %v782_v34  ;;  %v794_v39 = vmax.f32 %v793_v31, %v626_v36  ;;  %1729 = vmatpush1.msra.mxu0 %v1567_v33  ;;  %v1663_v31 = vld [vmem:[#allocation2 + $0x3c0] sm:$0xff]  ;;  %v1660_v34 = vld [vmem:[#allocation2 + $0x3a8] sm:$0xff] }
 0x1da   :  { %v3831_v40 = vpop.f32.mrf.mxu1  ;;  %1730 = vmatprep.subr.mxu0 %v1564_v35 }
 0x1db   :  { %v1688_v42 = vsel %vm1687_vm1, %v783_v38, %v765_v37  ;;  %1153 = vmatprep.mubr.f32.mxu0 %v3831_v40  ;;  %1410 = vmatprep.mubr.f32.mxu1 %v3831_v40  ;;  %v1659_v38 = vld [vmem:[#allocation2 + $0x3a0] sm:$0xff] }
 0x1dc   :  { %v632_v45 = vpop.f32.mrf.mxu1  ;;  %1154 = vmatmul.mubr.f32.gmra.mxu0 %v626_v36  ;;  %1411 = vmatmul.mubr.f32.gmra.mxu1 %v626_v36 }
 0x1dd   :  { %v795_v46 = vmax.f32 %v794_v39, %v632_v45  ;;  %1731 = vmatpush1.msra.mxu0 %v1563_v41  ;;  %v1656_v39 = vld [vmem:[#allocation2 + $0x388] sm:$0xff] }
 0x1de   :  { %v3836_v47 = vpop.f32.mrf.mxu1  ;;  %1732 = vmatprep.subr.mxu0 %v1560_v44 }
 0x1df   :  { %v796_v49 = vrot.slane %v795_v46, 4  ;;  %1159 = vmatprep.mubr.f32.mxu0 %v3836_v47  ;;  %1416 = vmatprep.mubr.f32.mxu1 %v3836_v47 }
 0x1e0   :  { %v638_v51 = vpop.f32.mrf.mxu1  ;;  %1160 = vmatmul.mubr.f32.gmra.mxu0 %v632_v45  ;;  %1417 = vmatmul.mubr.f32.gmra.mxu1 %v632_v45  ;;  %v1655_v45 = vld [vmem:[#allocation2 + $0x380] sm:$0xff] }
 0x1e1   :  { %v797_v53 = vmax.f32 %v795_v46, %v796_v49  ;;  %1733 = vmatpush1.msra.mxu0 %v1559_v48  ;;  %v1652_v46 = vld [vmem:[#allocation2 + $0x368] sm:$0xff] }
 0x1e2   :  { %v3840_v54 = vpop.f32.mrf.mxu1  ;;  %1734 = vmatprep.subr.mxu0 %v1556_v50  ;;  %v1651_v50 = vld [vmem:[#allocation2 + $0x360] sm:$0xff] }
 0x1e3   :  { %v798_v56 = vrot.slane %v797_v53, 2  ;;  %1165 = vmatprep.mubr.f32.mxu0 %v3840_v54  ;;  %1422 = vmatprep.mubr.f32.mxu1 %v3840_v54 }
 0x1e4   :  { %v644_v59 = vpop.f32.mrf.mxu1  ;;  %1166 = vmatmul.mubr.f32.gmra.mxu0 %v638_v51  ;;  %1423 = vmatmul.mubr.f32.gmra.mxu1 %v638_v51 }
 0x1e5   :  { %v799_v60 = vmax.f32 %v797_v53, %v798_v56  ;;  %v811_v62 = vmax.f32 %v638_v51, %v644_v59  ;;  %1735 = vmatpush1.msra.mxu0 %v1555_v55  ;;  %v1648_v51 = vld [vmem:[#allocation2 + $0x348] sm:$0xff]  ;;  %v1647_v56 = vld [vmem:[#allocation2 + $0x340] sm:$0xff] }
 0x1e6   :  { %v3844_v63 = vpop.f32.mrf.mxu1  ;;  %1736 = vmatprep.subr.mxu0 %v1552_v58  ;;  %v1644_v58 = vld [vmem:[#allocation2 + $0x328] sm:$0xff] }
 0x1e7   :  { %v800_v2 = vrot.slane %v799_v60, 1  ;;  %1171 = vmatprep.mubr.f32.mxu0 %v3844_v63  ;;  %1428 = vmatprep.mubr.f32.mxu1 %v3844_v63 }
 0x1e8   :  { %v650_v6 = vpop.f32.mrf.mxu1  ;;  %1172 = vmatmul.mubr.f32.gmra.mxu0 %v644_v59  ;;  %1429 = vmatmul.mubr.f32.gmra.mxu1 %v644_v59 }
 0x1e9   :  { %v801_v7 = vmax.f32 %v799_v60, %v800_v2  ;;  %v812_v8 = vmax.f32 %v811_v62, %v650_v6  ;;  %1737 = vmatpush1.msra.mxu0 %v1551_v0  ;;  %v1643_v62 = vld [vmem:[#allocation2 + $0x320] sm:$0xff]  ;;  %v1640_v0 = vld [vmem:[#allocation2 + $0x308] sm:$0xff] }
 0x1ea   :  { %v3848_v9 = vpop.f32.mrf.mxu1  ;;  %1738 = vmatprep.subr.mxu0 %v1548_v4 }
 0x1eb   :  { %v1690_v12 = vsel %vm1689_vm2, %v801_v7, %v1688_v42  ;;  %1177 = vmatprep.mubr.f32.mxu0 %v3848_v9  ;;  %1434 = vmatprep.mubr.f32.mxu1 %v3848_v9  ;;  %v1636_v7 = vld [vmem:[#allocation2 + $0x2e8] sm:$0xff] }
 0x1ec   :  { %v656_v14 = vpop.f32.mrf.mxu1  ;;  %1178 = vmatmul.mubr.f32.gmra.mxu0 %v650_v6  ;;  %1435 = vmatmul.mubr.f32.gmra.mxu1 %v650_v6  ;;  %v1639_v6 = vld [vmem:[#allocation2 + $0x300] sm:$0xff] }
 0x1ed   :  { %v813_v15 = vmax.f32 %v812_v8, %v656_v14  ;;  %1739 = vmatpush1.msra.mxu0 %v1547_v10 }
 0x1ee   :  { %v3853_v16 = vpop.f32.mrf.mxu1  ;;  %1740 = vmatprep.subr.mxu0 %v1544_v13  ;;  %v1632_v13 = vld [vmem:[#allocation2 + $0x2c8] sm:$0xff] }
 0x1ef   :  { %v814_v19 = vrot.slane %v813_v15, 4  ;;  %1183 = vmatprep.mubr.f32.mxu0 %v3853_v16  ;;  %1440 = vmatprep.mubr.f32.mxu1 %v3853_v16 }
 0x1f0   :  { %v3857_v21 = vpop.f32.mrf.mxu1  ;;  %1184 = vmatmul.mubr.f32.gmra.mxu0 %v656_v14  ;;  %1441 = vmatmul.mubr.f32.gmra.mxu1 %v656_v14 }
 0x1f1   :  { %v815_v22 = vmax.f32 %v813_v15, %v814_v19  ;;  %1741 = vmatpush1.msra.mxu0 %v1543_v18  ;;  %v766_v15 = vmax.f32 %v3791_v43, %v3795_v3  ;;  %v784_v18 = vmax.f32 %v3807_v61, %v3811_v5  ;;  %v802_v19 = vmax.f32 %v3823_v24, %v3827_v32 }
 0x1f2   :  { %v3859_v23 = vpop.f32.mrf.mxu1  ;;  %1742 = vmatprep.subr.mxu0 %v1668_v20  ;;  %v820_v43 = vmax.f32 %v3840_v54, %v3844_v63 }
 0x1f3   :  { %v816_v26 = vrot.slane %v815_v22, 2  ;;  %1189 = vmatprep.mubr.f32.mxu0 %v3859_v23  ;;  %1446 = vmatprep.mubr.f32.mxu1 %v3859_v23 }
 0x1f4   :  { %v3863_v28 = vpop.f32.mrf.mxu1  ;;  %1190 = vmatmul.mubr.f32.gmra.mxu0 %v3857_v21  ;;  %1447 = vmatmul.mubr.f32.gmra.mxu1 %v3857_v21  ;;  %v821_v32 = vmax.f32 %v820_v43, %v3848_v9 }
 0x1f5   :  { %v817_v29 = vmax.f32 %v815_v22, %v816_v26  ;;  %1743 = vmatpush2.msra.mxu0 %v1667_v25  ;;  %v1631_v22 = vld [vmem:[#allocation2 + $0x2c0] sm:$0xff]  ;;  %v1628_v25 = vld [vmem:[#allocation2 + $0x2a8] sm:$0xff]  ;;  %v767_v26 = vmax.f32 %v766_v15, %v3799_v52 }
 0x1f6   :  { %v3867_v30 = vpop.f32.mrf.mxu1  ;;  %1744 = vmatprep.subr.mxu0 %v1664_v27  ;;  %v785_v27 = vmax.f32 %v784_v18, %v3815_v11  ;;  %v1627_v11 = vld [vmem:[#allocation2 + $0x2a0] sm:$0xff]  ;;  %v822_v9 = vmax.f32 %v821_v32, %v3853_v16 }
 0x1f7   :  { %v818_v33 = vrot.slane %v817_v29, 1  ;;  %1195 = vmatprep.mubr.f32.mxu0 %v3867_v30  ;;  %1452 = vmatprep.mubr.f32.mxu1 %v3867_v30  ;;  %v768_v3 = vmax.f32 %v767_v26, %v3803_v57  ;;  %v838_v52 = vmax.f32 %v3859_v23, %v3867_v30  ;;  %v1624_v57 = vld [vmem:[#allocation2 + $0x288] sm:$0xff]  ;;  %v1615_v18 = vld [vmem:[#allocation2 + $0x240] sm:$0xff] }
 0x1f8   :  { %v3871_v35 = vpop.f32.mrf.mxu1  ;;  %1196 = vmatmul.mubr.f32.gmra.mxu0 %v3863_v28  ;;  %1453 = vmatmul.mubr.f32.gmra.mxu1 %v3863_v28  ;;  %v786_v61 = vmax.f32 %v785_v27, %v3819_v17 }
 0x1f9   :  { %v819_v36 = vmax.f32 %v817_v29, %v818_v33  ;;  %1745 = vmatpush2.msra.mxu0 %v1663_v31  ;;  %v803_v29 = vmax.f32 %v802_v19, %v3831_v40  ;;  %v829_v40 = vmax.f32 %v3857_v21, %v3863_v28 }
 0x1fa   :  { %v3875_v37 = vpop.f32.mrf.mxu1  ;;  %1746 = vmatprep.subr.mxu0 %v1660_v34  ;;  %v787_v33 = vrot.slane %v786_v61, 4 }
 0x1fb   :  { %1201 = vmatprep.mubr.f32.mxu0 %v3875_v37  ;;  %1458 = vmatprep.mubr.f32.mxu1 %v3875_v37  ;;  %v3880_v41 = vsel %vm1691_vm3, %v819_v36, %v1690_v12  ;;  %v1635_v12 = vld [vmem:[#allocation2 + $0x2e0] sm:$0xff]  ;;  %v804_v5 = vmax.f32 %v803_v29, %v3836_v47  ;;  %v839_v17 = vmax.f32 %v838_v52, %v3875_v37 }
 0x1fc   :  { %v3882_v42 = vpop.f32.mrf.mxu1  ;;  %1202 = vmatmul.mubr.f32.gmra.mxu0 %v3871_v35  ;;  %1459 = vmatmul.mubr.f32.gmra.mxu1 %v3871_v35  ;;  %v830_v30 = vmax.f32 %v829_v40, %v3871_v35  ;;  %v1620_v35 = vld [vmem:[#allocation2 + $0x268] sm:$0xff] }
 0x1fd   :  { %1747 = vmatpush2.msra.mxu0 %v1659_v38 }
 0x1fe   :  { %v3886_v44 = vpop.f32.mrf.mxu1  ;;  %1748 = vmatprep.subr.mxu0 %v1656_v39  ;;  %v1623_v39 = vld [vmem:[#allocation2 + $0x280] sm:$0xff] }
 0x1ff   :  { %1207 = vmatprep.mubr.f32.mxu0 %v3886_v44  ;;  %1464 = vmatprep.mubr.f32.mxu1 %v3886_v44  ;;  %v840_v34 = vmax.f32 %v839_v17, %v3886_v44  ;;  %v1608_v17 = vld [vmem:[#allocation2 + $0x208] sm:$0xff] }
 0x200   :  { %v3890_v48 = vpop.f32.mrf.mxu1  ;;  %1208 = vmatmul.mubr.f32.gmra.mxu0 %v3882_v42  ;;  %1465 = vmatmul.mubr.f32.gmra.mxu1 %v3882_v42 }
 0x201   :  { %1749 = vmatpush2.msra.mxu0 %v1655_v45  ;;  %v831_v45 = vmax.f32 %v830_v30, %v3882_v42 }
 0x202   :  { %v3894_v49 = vpop.f32.mrf.mxu1  ;;  %1750 = vmatprep.subr.mxu0 %v1652_v46 }
 0x203   :  { %1213 = vmatprep.mubr.f32.mxu0 %v3894_v49  ;;  %1470 = vmatprep.mubr.f32.mxu1 %v3894_v49 }
 0x204   :  { %v3898_v53 = vpop.f32.mrf.mxu1  ;;  %1214 = vmatmul.mubr.f32.gmra.mxu0 %v3890_v48  ;;  %1471 = vmatmul.mubr.f32.gmra.mxu1 %v3890_v48 }
 0x205   :  { %1751 = vmatpush2.msra.mxu0 %v1651_v50  ;;  %v847_v47 = vmax.f32 %v3890_v48, %v3898_v53  ;;  %v769_v48 = vrot.slane %v768_v3, 4 }
 0x206   :  { %v3902_v55 = vpop.f32.mrf.mxu1  ;;  %1752 = vmatprep.subr.mxu0 %v1648_v51 }
 0x207   :  { %1219 = vmatprep.mubr.f32.mxu0 %v3902_v55  ;;  %1476 = vmatprep.mubr.f32.mxu1 %v3902_v55  ;;  %v856_v54 = vmax.f32 %v3894_v49, %v3902_v55  ;;  %v805_v49 = vrot.slane %v804_v5, 4 }
 0x208   :  { %v3906_v59 = vpop.f32.mrf.mxu1  ;;  %1220 = vmatmul.mubr.f32.gmra.mxu0 %v3898_v53  ;;  %1477 = vmatmul.mubr.f32.gmra.mxu1 %v3898_v53  ;;  %v823_v53 = vrot.slane %v822_v9, 4 }
 0x209   :  { %1753 = vmatpush2.msra.mxu0 %v1647_v56  ;;  %v848_v36 = vmax.f32 %v847_v47, %v3906_v59  ;;  %v788_v56 = vmax.f32 %v786_v61, %v787_v33 }
 0x20a   :  { %v3910_v60 = vpop.f32.mrf.mxu1  ;;  %1754 = vmatprep.subr.mxu0 %v1644_v58  ;;  %v841_v58 = vrot.slane %v840_v34, 4 }
 0x20b   :  { %1225 = vmatprep.mubr.f32.mxu0 %v3910_v60  ;;  %1482 = vmatprep.mubr.f32.mxu1 %v3910_v60  ;;  %v857_v21 = vmax.f32 %v856_v54, %v3910_v60  ;;  %v832_v60 = vrot.slane %v831_v45, 4 }
 0x20c   :  { %v3914_v2 = vpop.f32.mrf.mxu1  ;;  %1226 = vmatmul.mubr.f32.gmra.mxu0 %v3906_v59  ;;  %1483 = vmatmul.mubr.f32.gmra.mxu1 %v3906_v59  ;;  %v1619_v59 = vld [vmem:[#allocation2 + $0x260] sm:$0xff] }
 0x20d   :  { %1755 = vmatpush2.msra.mxu0 %v1643_v62  ;;  %v849_v50 = vmax.f32 %v848_v36, %v3914_v2  ;;  %v833_v19 = vmax.f32 %v831_v45, %v832_v60 }
 0x20e   :  { %v3918_v4 = vpop.f32.mrf.mxu1  ;;  %1756 = vmatprep.subr.mxu0 %v1640_v0  ;;  %v1616_v0 = vld [vmem:[#allocation2 + $0x248] sm:$0xff] }
 0x20f   :  { %1231 = vmatprep.mubr.f32.mxu0 %v3918_v4  ;;  %1488 = vmatprep.mubr.f32.mxu1 %v3918_v4  ;;  %v858_v16 = vmax.f32 %v857_v21, %v3918_v4  ;;  %v770_v4 = vmax.f32 %v768_v3, %v769_v48  ;;  %v834_v32 = vrot.slane %v833_v19, 2  ;;  %v1606_v48 = vld [vmem:[#allocation2 + $0x1f8] sm:$0xff] }
 0x210   :  { %v3922_v8 = vpop.f32.mrf.mxu1  ;;  %1232 = vmatmul.mubr.f32.gmra.mxu0 %v3914_v2  ;;  %1489 = vmatmul.mubr.f32.gmra.mxu1 %v3914_v2  ;;  %v850_v2 = vrot.slane %v849_v50, 4 }
 0x211   :  { %1757 = vmatpush2.msra.mxu0 %v1639_v6  ;;  %v859_v62 = vrot.slane %v858_v16, 4  ;;  %v806_v6 = vmax.f32 %v804_v5, %v805_v49  ;;  %v835_v45 = vmax.f32 %v833_v19, %v834_v32 }
 0x212   :  { %v712_v10 = vpop.f32.mrf.mxu1  ;;  %1758 = vmatprep.subr.mxu0 %v1636_v7  ;;  %v851_v27 = vmax.f32 %v849_v50, %v850_v2 }
 0x213   :  { %1237 = vmatprep.mubr.f32.mxu0 %v712_v10  ;;  %1494 = vmatprep.mubr.f32.mxu1 %v712_v10  ;;  %v807_v26 = vrot.slane %v806_v6, 2  ;;  %v836_v60 = vrot.slane %v835_v45, 1 }
 0x214   :  { %v716_v14 = vpop.f32.mrf.mxu1  ;;  %1238 = vmatmul.mubr.f32.gmra.mxu0 %v3922_v8  ;;  %1495 = vmatmul.mubr.f32.gmra.mxu1 %v3922_v8 }
 0x215   :  { %1759 = vmatpush2.msra.mxu0 %v1635_v12  ;;  %v865_v28 = vmax.f32 %v3922_v8, %v716_v14  ;;  %v837_v19 = vmax.f32 %v835_v45, %v836_v60  ;;  %v1577_v45 = vld [vmem:[#allocation2 + $0x110] sm:$0xff]  ;;  %v1550_v60 = vld [vmem:[#allocation2 + $0x38] sm:$0xff] }
 0x216   :  { %v718_v20 = vpop.f32.mrf.mxu1  ;;  %1760 = vmatprep.subr.mxu0 %v1632_v13  ;;  %v789_v13 = vrot.slane %v788_v56, 2 }
 0x217   :  { %1243 = vmatprep.mubr.f32.mxu0 %v718_v20  ;;  %1500 = vmatprep.mubr.f32.mxu1 %v718_v20  ;;  %v874_v63 = vmax.f32 %v712_v10, %v718_v20  ;;  %v824_v10 = vmax.f32 %v822_v9, %v823_v53  ;;  %v860_v20 = vmax.f32 %v858_v16, %v859_v62 }
 0x218   :  { %v722_v31 = vpop.f32.mrf.mxu1  ;;  %1244 = vmatmul.mubr.f32.gmra.mxu0 %v716_v14  ;;  %1501 = vmatmul.mubr.f32.gmra.mxu1 %v716_v14  ;;  %v842_v14 = vmax.f32 %v840_v34, %v841_v58  ;;  %v790_v5 = vmax.f32 %v788_v56, %v789_v13 }
 0x219   :  { %1761 = vmatpush2.msra.mxu0 %v1631_v22  ;;  %v866_v46 = vmax.f32 %v865_v28, %v722_v31  ;;  %v1612_v22 = vld [vmem:[#allocation2 + $0x228] sm:$0xff]  ;;  %v825_v43 = vrot.slane %v824_v10, 2  ;;  %v861_v40 = vrot.slane %v860_v20, 2 }
 0x21a   :  { %v724_v24 = vpop.f32.mrf.mxu1  ;;  %1762 = vmatprep.subr.mxu0 %v1628_v25  ;;  %v771_v25 = vrot.slane %v770_v4, 2  ;;  %v843_v52 = vrot.slane %v842_v14, 2  ;;  %v791_v36 = vrot.slane %v790_v5, 1 }
 0x21b   :  { %1249 = vmatprep.mubr.f32.mxu0 %v724_v24  ;;  %1506 = vmatprep.mubr.f32.mxu1 %v724_v24  ;;  %v875_v37 = vmax.f32 %v874_v63, %v724_v24  ;;  %v808_v63 = vmax.f32 %v806_v6, %v807_v26  ;;  %v826_v21 = vmax.f32 %v824_v10, %v825_v43 }
 0x21c   :  { %v728_v23 = vpop.f32.mrf.mxu1  ;;  %1250 = vmatmul.mubr.f32.gmra.mxu0 %v722_v31  ;;  %1507 = vmatmul.mubr.f32.gmra.mxu1 %v722_v31  ;;  %v772_v47 = vmax.f32 %v770_v4, %v771_v25  ;;  %v862_v16 = vmax.f32 %v860_v20, %v861_v40 }
 0x21d   :  { %1763 = vmatpush2.msra.mxu0 %v1627_v11  ;;  %v867_v55 = vmax.f32 %v866_v46, %v728_v23  ;;  %v1611_v11 = vld [vmem:[#allocation2 + $0x220] sm:$0xff]  ;;  %v809_v50 = vrot.slane %v808_v63, 1  ;;  %v827_v53 = vrot.slane %v826_v21, 1 }
 0x21e   :  { %v730_v38 = vpop.f32.mrf.mxu1  ;;  %1764 = vmatprep.subr.mxu0 %v1624_v57  ;;  %v773_v49 = vrot.slane %v772_v47, 1  ;;  %v863_v62 = vrot.slane %v862_v16, 1 }
 0x21f   :  { %1255 = vmatprep.mubr.f32.mxu0 %v730_v38  ;;  %1512 = vmatprep.mubr.f32.mxu1 %v730_v38  ;;  %v876_v51 = vmax.f32 %v875_v37, %v730_v38  ;;  %v868_v12 = vrot.slane %v867_v55, 4  ;;  %v844_v37 = vmax.f32 %v842_v14, %v843_v52  ;;  %v810_v2 = vmax.f32 %v808_v63, %v809_v50  ;;  %v1602_v63 = vld [vmem:[#allocation2 + $0x1d8] sm:$0xff]  ;;  %v1565_v50 = vld [vmem:[#allocation2 + $0xb0] sm:$0xff] }
 0x220   :  { %v734_v44 = vpop.f32.mrf.mxu1  ;;  %1256 = vmatmul.mubr.f32.gmra.mxu0 %v728_v23  ;;  %1513 = vmatmul.mubr.f32.gmra.mxu1 %v728_v23  ;;  %v852_v23 = vrot.slane %v851_v27, 2  ;;  %v774_v6 = vmax.f32 %v772_v47, %v773_v49  ;;  %v828_v10 = vmax.f32 %v826_v21, %v827_v53  ;;  %v1593_v21 = vld [vmem:[#allocation2 + $0x190] sm:$0xff]  ;;  %v1566_v49 = vld [vmem:[#allocation2 + $0xb8] sm:$0xff] }
 0x221   :  { %1765 = vmatpush2.msra.mxu0 %v1623_v39  ;;  %v877_v7 = vrot.slane %v876_v51, 4  ;;  %v869_v3 = vmax.f32 %v867_v55, %v868_v12  ;;  %v1607_v39 = vld [vmem:[#allocation2 + $0x200] sm:$0xff]  ;;  %v1561_v53 = vld [vmem:[#allocation2 + $0x90] sm:$0xff] }
 0x222   :  { %v736_v42 = vpop.f32.mrf.mxu1  ;;  %1766 = vmatprep.subr.mxu0 %v1620_v35 }
 0x223   :  { %1261 = vmatprep.mubr.f32.mxu0 %v736_v42  ;;  %1518 = vmatprep.mubr.f32.mxu1 %v736_v42  ;;  %v878_v29 = vmax.f32 %v876_v51, %v877_v7  ;;  %v870_v28 = vrot.slane %v869_v3, 2  ;;  %v853_v51 = vmax.f32 %v851_v27, %v852_v23  ;;  %v1601_v23 = vld [vmem:[#allocation2 + $0x1d0] sm:$0xff] }
 0x224   :  { %v740_v8 = vpop.f32.mrf.mxu1  ;;  %1262 = vmatmul.mubr.f32.gmra.mxu0 %v734_v44  ;;  %1519 = vmatmul.mubr.f32.gmra.mxu1 %v734_v44 }
 0x225   :  { %1767 = vmatpush2.msra.mxu0 %v1619_v59  ;;  %v883_v61 = vmax.f32 %v734_v44, %v740_v8  ;;  %v879_v9 = vrot.slane %v878_v29, 2  ;;  %v871_v55 = vmax.f32 %v869_v3, %v870_v28  ;;  %v845_v59 = vrot.slane %v844_v37, 1  ;;  %v1590_v28 = vld [vmem:[#allocation2 + $0x178] sm:$0xff] }
 0x226   :  { %v742_v15 = vpop.f32.mrf.mxu1  ;;  %1768 = vmatprep.subr.mxu0 %v1616_v0  ;;  %v854_v7 = vrot.slane %v853_v51, 1 }
 0x227   :  { %1267 = vmatprep.mubr.f32.mxu0 %v742_v15  ;;  %1524 = vmatprep.mubr.f32.mxu1 %v742_v15  ;;  %v892_v54 = vmax.f32 %v736_v42, %v742_v15  ;;  %v880_v44 = vmax.f32 %v878_v29, %v879_v9  ;;  %v792_v42 = vmax.f32 %v790_v5, %v791_v36  ;;  %v872_v12 = vrot.slane %v871_v55, 1  ;;  %v1597_v9 = vld [vmem:[#allocation2 + $0x1b0] sm:$0xff] }
 0x228   :  { %v746_v31 = vpop.f32.mrf.mxu1  ;;  %1268 = vmatmul.mubr.f32.gmra.mxu0 %v740_v8  ;;  %1525 = vmatmul.mubr.f32.gmra.mxu1 %v740_v8  ;;  %v846_v15 = vmax.f32 %v844_v37, %v845_v59  ;;  %v855_v26 = vmax.f32 %v853_v51, %v854_v7  ;;  %v1585_v36 = vld [vmem:[#allocation2 + $0x150] sm:$0xff]  ;;  %v1582_v37 = vld [vmem:[#allocation2 + $0x138] sm:$0xff] }
 0x229   :  { %1769 = vmatpush2.msra.mxu0 %v1615_v18  ;;  %v884_v57 = vmax.f32 %v883_v61, %v746_v31  ;;  %v881_v8 = vrot.slane %v880_v44, 1  ;;  %v1701_v18 = vsel %vm1687_vm1, %v792_v42, %v774_v6  ;;  %v1562_v51 = vld [vmem:[#allocation2 + $0x98] sm:$0xff]  ;;  %v2504_v42 = vld [vmem:[#allocation7 + $0x70] sm:$0xff] }
 0x22a   :  { %v748_v24 = vpop.f32.mrf.mxu1  ;;  %1770 = vmatprep.subr.mxu0 %v1612_v22  ;;  %v864_v22 = vmax.f32 %v862_v16, %v863_v62  ;;  %v1702_v29 = vsel %vm1689_vm2, %v810_v2, %v1701_v18  ;;  %v1574_v16 = vld [vmem:[#allocation2 + $0xf8] sm:$0xff]  ;;  %v1553_v59 = vld [vmem:[#allocation2 + $0x50] sm:$0xff] }
 0x22b   :  { %1273 = vmatprep.mubr.f32.mxu0 %v748_v24  ;;  %1530 = vmatprep.mubr.f32.mxu1 %v748_v24  ;;  %v893_v33 = vmax.f32 %v892_v54, %v748_v24  ;;  %v882_v27 = vmax.f32 %v880_v44, %v881_v8  ;;  %v1703_v3 = vsel %vm1691_vm3, %v828_v10, %v1702_v29  ;;  %v2505_v44 = vld [vmem:[#allocation7 + $0x78] sm:$0xff]  ;;  %v1549_v62 = vld [vmem:[#allocation2 + $0x30] sm:$0xff]  ;;  %v2502_v10 = vld [vmem:[#allocation7 + $0x60] sm:$0xff] }
 0x22c   :  { %v752_v30 = vpop.f32.mrf.mxu1  ;;  %1274 = vmatmul.mubr.f32.gmra.mxu0 %v746_v31  ;;  %1531 = vmatmul.mubr.f32.gmra.mxu1 %v746_v31  ;;  %v873_v31 = vmax.f32 %v871_v55, %v872_v12  ;;  %v1704_v5 = vsel %vm1693_vm4, %v846_v15, %v1703_v3  ;;  %v1558_v55 = vld [vmem:[#allocation2 + $0x78] sm:$0xff]  ;;  %v1545_v6 = vld [vmem:[#allocation2 + $0x10] sm:$0xff]  ;;  %v2499_v3 = vld [vmem:[#allocation7 + $0x48] sm:$0xff] }
 0x22d   :  { %v885_v34 = vmax.f32 %v884_v57, %v752_v30  ;;  %1771 = vmatpush2.msra.mxu0 %v1611_v11  ;;  %v1705_v24 = vsel %vm1695_vm5, %v864_v22, %v1704_v5  ;;  %v1694_v11 = vsel %vm1693_vm4, %v837_v19, %v3880_v41  ;;  %v1598_v41 = vld [vmem:[#allocation2 + $0x1b8] sm:$0xff]  ;;  %2555 = vmatpush1.msra.mxu1 %v2505_v44  ;;  %v1669_v7 = vld [vmem:[#allocation2 + $0x3f0] sm:$0xff] }
 0x22e   :  { %v754_v38 = vpop.f32.mrf.mxu1  ;;  %1772 = vmatprep.subr.mxu0 %v1608_v17  ;;  %v1706_v32 = vsel %vm1697_vm6, %v882_v27, %v1705_v24  ;;  %v1696_v40 = vsel %vm1695_vm5, %v855_v26, %v1694_v11  ;;  %v1605_v17 = vld [vmem:[#allocation2 + $0x1f0] sm:$0xff]  ;;  %2556 = vmatprep.subr.mxu1 %v4911_v1  ;;  %v1670_v2 = vld [vmem:[#allocation2 + $0x3f8] sm:$0xff]  ;;  %v2498_v11 = vld [vmem:[#allocation7 + $0x40] sm:$0xff] }
 0x22f   :  { %v886_v46 = vrot.slane %v885_v34, 4  ;;  %v894_v35 = vmax.f32 %v893_v33, %v754_v38  ;;  %1279 = vmatprep.mubr.f32.mxu0 %v754_v38  ;;  %1536 = vmatprep.mubr.f32.mxu1 %v754_v38  ;;  %v1698_v57 = vsel %vm1697_vm6, %v873_v31, %v1696_v40  ;;  %v1589_v33 = vld [vmem:[#allocation2 + $0x170] sm:$0xff]  ;;  %v1666_v8 = vld [vmem:[#allocation2 + $0x3d8] sm:$0xff] }
 0x230   :  { %1280 = vmatmul.mubr.f32.gmra.mxu0 %v752_v30  ;;  %1537 = vmatmul.mubr.f32.gmra.mxu1 %v752_v30  ;;  %v1594_v30 = vld [vmem:[#allocation2 + $0x198] sm:$0xff]  ;;  %v1581_v38 = vld [vmem:[#allocation2 + $0x130] sm:$0xff] }
 0x231   :  { %v887_v56 = vmax.f32 %v885_v34, %v886_v46  ;;  %v895_v58 = vrot.slane %v894_v35, 4  ;;  %1773 = vmatpush2.msra.mxu0 %v1607_v39  ;;  %v1586_v34 = vld [vmem:[#allocation2 + $0x158] sm:$0xff]  ;;  %v1573_v46 = vld [vmem:[#allocation2 + $0xf0] sm:$0xff]  ;;  %2557 = vmatpush1.msra.mxu1 %v2504_v42  ;;  %v4017_v42 = vld [vmem:[#allocation7 + $0x168] sm:$0xff] }
 0x232   :  { %1781 = vmatprep.subr.mxu0 %v1606_v48  ;;  %v1578_v39 = vld [vmem:[#allocation2 + $0x118] sm:$0xff]  ;;  %v1569_v48 = vld [vmem:[#allocation2 + $0xd0] sm:$0xff]  ;;  %2558 = vmatprep.subr.mxu1 %v4911_v1 }
 0x233   :  { %v888_v0 = vrot.slane %v887_v56, 2  ;;  %v896_v4 = vmax.f32 %v894_v35, %v895_v58  ;;  %v1570_v35 = vld [vmem:[#allocation2 + $0xd8] sm:$0xff]  ;;  %v1665_v12 = vld [vmem:[#allocation2 + $0x3d0] sm:$0xff] }
 0x234   :  { %v1554_v58 = vld [vmem:[#allocation2 + $0x58] sm:$0xff]  ;;  %v1657_v19 = vld [vmem:[#allocation2 + $0x390] sm:$0xff] }
 0x235   :  { %v889_v13 = vmax.f32 %v887_v56, %v888_v0  ;;  %v897_v14 = vrot.slane %v896_v4, 2  ;;  %v1557_v56 = vld [vmem:[#allocation2 + $0x70] sm:$0xff]  ;;  %v1546_v0 = vld [vmem:[#allocation2 + $0x18] sm:$0xff] }
 0x236   :  { %v1658_v15 = vld [vmem:[#allocation2 + $0x398] sm:$0xff]  ;;  %v1653_v22 = vld [vmem:[#allocation2 + $0x370] sm:$0xff] }
 0x237   :  { %v890_v20 = vrot.slane %v889_v13, 1  ;;  %v898_v25 = vmax.f32 %v896_v4, %v897_v14  ;;  %v2503_v4 = vld [vmem:[#allocation7 + $0x68] sm:$0xff]  ;;  %v1661_v14 = vld [vmem:[#allocation2 + $0x3b0] sm:$0xff]  ;;  %v2501_v18 = vld [vmem:[#allocation7 + $0x58] sm:$0xff] }
 0x238   :  { %2559 = vmatpush1.msra.mxu1 %v2503_v4  ;;  %v2500_v26 = vld [vmem:[#allocation7 + $0x50] sm:$0xff]  ;;  %v1646_v29 = vld [vmem:[#allocation2 + $0x338] sm:$0xff] }
 0x239   :  { %v899_v43 = vrot.slane %v898_v25, 1  ;;  %v891_v61 = vmax.f32 %v889_v13, %v890_v20  ;;  %2560 = vmatprep.subr.mxu1 %v4911_v1  ;;  %v1662_v13 = vld [vmem:[#allocation2 + $0x3b8] sm:$0xff]  ;;  %v1649_v27 = vld [vmem:[#allocation2 + $0x350] sm:$0xff] }
 0x23a   :  { %2561 = vmatpush1.msra.mxu1 %v2502_v10  ;;  %v1654_v20 = vld [vmem:[#allocation2 + $0x378] sm:$0xff]  ;;  %v1645_v31 = vld [vmem:[#allocation2 + $0x330] sm:$0xff] }
 0x23b   :  { %v900_v52 = vmax.f32 %v898_v25, %v899_v43  ;;  %v3973_v47 = vsel %vm1699_vm7, %v891_v61, %v1698_v57  ;;  %2562 = vmatprep.subr.mxu1 %v4911_v1  ;;  %v1650_v25 = vld [vmem:[#allocation2 + $0x358] sm:$0xff]  ;;  %v1641_v61 = vld [vmem:[#allocation2 + $0x310] sm:$0xff] }
 0x23c   :  { %2563 = vmatpush1.msra.mxu1 %v2501_v18  ;;  %v1642_v43 = vld [vmem:[#allocation2 + $0x318] sm:$0xff]  ;;  %v4052_v18 = vld [vmem:[#allocation7 + $0x140] sm:$0xff] }
 0x23d   :  { %v1707_v54 = vsel %vm1699_vm7, %v900_v52, %v1706_v32  ;;  %2564 = vmatprep.subr.mxu1 %v4911_v1  ;;  %v1638_v5 = vld [vmem:[#allocation2 + $0x2f8] sm:$0xff]  ;;  %v1637_v52 = vld [vmem:[#allocation2 + $0x2f0] sm:$0xff]  ;;  %4929 = vst [vmem:[#allocation13_spill] sm:$0xff] %v4052_v18 }
 0x23e   :  { %1774 = vmatprep.mubr.f32.mxu0 %v1707_v54  ;;  %2565 = vmatpush1.msra.mxu1 %v2500_v26  ;;  %v1634_v24 = vld [vmem:[#allocation2 + $0x2d8] sm:$0xff]  ;;  %v1633_v32 = vld [vmem:[#allocation2 + $0x2d0] sm:$0xff] }
 0x23f   :  { %1775 = vmatmul.mubr.f32.vlgmr.msra.gmra.mxu0 %v3973_v47  ;;  %2566 = vmatprep.subr.mxu1 %v4911_v1  ;;  %v1630_v40 = vld [vmem:[#allocation2 + $0x2b8] sm:$0xff]  ;;  %v2516_v26 = vld [vmem:[#allocation7 + $0xd0] sm:$0xff] }
 0x240   :  { %1782 = vmatpush1.msra.mxu0 %v1605_v17  ;;  %1845 = vmatprep.mubr.f32.mxu0 %v1707_v54  ;;  %v1629_v54 = vld [vmem:[#allocation2 + $0x2b0] sm:$0xff]  ;;  %v1626_v57 = vld [vmem:[#allocation2 + $0x298] sm:$0xff] }
 0x241   :  { %1783 = vmatprep.subr.mxu0 %v1602_v63  ;;  %2567 = vmatpush1.msra.mxu1 %v2499_v3  ;;  %v2497_v17 = vld [vmem:[#allocation7 + $0x38] sm:$0xff]  ;;  %v2496_v63 = vld [vmem:[#allocation7 + $0x30] sm:$0xff] }
 0x242   :  { %1784 = vmatpush1.msra.mxu0 %v1601_v23  ;;  %2568 = vmatprep.subr.mxu1 %v4911_v1  ;;  %v1625_v23 = vld [vmem:[#allocation2 + $0x290] sm:$0xff]  ;;  %v2493_v44 = vld [vmem:[#allocation7 + $0x18] sm:$0xff] }
 0x243   :  { %1785 = vmatprep.subr.mxu0 %v1598_v41  ;;  %2569 = vmatpush1.msra.mxu1 %v2498_v11  ;;  %v2521_v4 = vld [vmem:[#allocation7 + $0xf8] sm:$0xff] }
 0x244   :  { %1786 = vmatpush1.msra.mxu0 %v1597_v9  ;;  %2570 = vmatprep.subr.mxu1 %v4911_v1  ;;  %v1622_v9 = vld [vmem:[#allocation2 + $0x278] sm:$0xff] }
 0x245   :  { %1787 = vmatprep.subr.mxu0 %v1594_v30  ;;  %2571 = vmatpush1.msra.mxu1 %v2497_v17  ;;  %v2495_v30 = vld [vmem:[#allocation7 + $0x28] sm:$0xff]  ;;  %v4087_v11 = vld [vmem:[#allocation7 + $0x118] sm:$0xff] }
 0x246   :  { %1788 = vmatpush1.msra.mxu0 %v1593_v21  ;;  %2572 = vmatprep.subr.mxu1 %v4911_v1  ;;  %v1621_v21 = vld [vmem:[#allocation2 + $0x270] sm:$0xff]  ;;  %4938 = vst [vmem:[#allocation22_spill] sm:$0xff] %v4087_v11  ;;  %v2511_v17 = vld [vmem:[#allocation7 + $0xa8] sm:$0xff] }
 0x247   :  { %1789 = vmatprep.subr.mxu0 %v1590_v28  ;;  %2573 = vmatpush1.msra.mxu1 %v2496_v63  ;;  %v4101_v63 = vld [vmem:[#allocation7 + $0x108] sm:$0xff] }
 0x248   :  { %1790 = vmatpush1.msra.mxu0 %v1589_v33  ;;  %v1618_v33 = vld [vmem:[#allocation2 + $0x258] sm:$0xff]  ;;  %2574 = vmatprep.subr.mxu1 %v4911_v1  ;;  %4942 = vst [vmem:[#allocation26_spill] sm:$0xff] %v4101_v63 }
 0x249   :  { %1791 = vmatprep.subr.mxu0 %v1586_v34  ;;  %v2494_v34 = vld [vmem:[#allocation7 + $0x20] sm:$0xff]  ;;  %2575 = vmatpush1.msra.mxu1 %v2495_v30 }
 0x24a   :  { %1792 = vmatpush1.msra.mxu0 %v1585_v36  ;;  %v1617_v36 = vld [vmem:[#allocation2 + $0x250] sm:$0xff]  ;;  %2576 = vmatprep.subr.mxu1 %v4911_v1 }
 0x24b   :  { %1793 = vmatprep.subr.mxu0 %v1582_v37  ;;  %2577 = vmatpush1.msra.mxu1 %v2494_v34  ;;  %v2552_v34 = vld [vmem:[#allocation7 + $0x1f0] sm:$0xff] }
 0x24c   :  { %1794 = vmatpush1.msra.mxu0 %v1581_v38  ;;  %v1614_v38 = vld [vmem:[#allocation2 + $0x238] sm:$0xff]  ;;  %2578 = vmatprep.subr.mxu1 %v4911_v1 }
 0x24d   :  { %1795 = vmatprep.subr.mxu0 %v1578_v39  ;;  %v1613_v39 = vld [vmem:[#allocation2 + $0x230] sm:$0xff]  ;;  %2579 = vmatpush1.msra.mxu1 %v2493_v44  ;;  %v2549_v44 = vld [vmem:[#allocation7 + $0x1d8] sm:$0xff] }
 0x24e   :  { %1796 = vmatpush1.msra.mxu0 %v1577_v45  ;;  %2580 = vmatprep.subr.mxu1 %v4911_v1 }
 0x24f   :  { %1797 = vmatprep.subr.mxu0 %v1574_v16  ;;  %v1610_v16 = vld [vmem:[#allocation2 + $0x218] sm:$0xff] }
 0x250   :  { %1798 = vmatpush1.msra.mxu0 %v1573_v46  ;;  %v1609_v46 = vld [vmem:[#allocation2 + $0x210] sm:$0xff] }
 0x251   :  { %1799 = vmatprep.subr.mxu0 %v1570_v35 }
 0x252   :  { %1800 = vmatpush1.msra.mxu0 %v1569_v48 }
 0x253   :  { %1801 = vmatprep.subr.mxu0 %v1566_v49 }
 0x254   :  { %1802 = vmatpush1.msra.mxu0 %v1565_v50 }
 0x255   :  { %1803 = vmatprep.subr.mxu0 %v1562_v51 }
 0x256   :  { %1804 = vmatpush1.msra.mxu0 %v1561_v53  ;;  %v2492_v53 = vld [vmem:[#allocation7 + $0x10] sm:$0xff] }
 0x257   :  { %1805 = vmatprep.subr.mxu0 %v1558_v55  ;;  %v4008_v55 = vld [vmem:[#allocation7 + $0x178] sm:$0xff]  ;;  %2581 = vmatpush1.msra.mxu1 %v2492_v53 }
 0x258   :  { %1806 = vmatpush1.msra.mxu0 %v1557_v56  ;;  %2582 = vmatprep.subr.mxu1 %v4911_v1 }
 0x259   :  { %1807 = vmatprep.subr.mxu0 %v1554_v58  ;;  %v2491_v58 = vld [vmem:[#allocation7 + $0x8] sm:$0xff] }
 0x25a   :  { %1808 = vmatpush1.msra.mxu0 %v1553_v59  ;;  %2583 = vmatpush1.msra.mxu1 %v2491_v58  ;;  %v2548_v58 = vld [vmem:[#allocation7 + $0x1d0] sm:$0xff] }
 0x25b   :  { %1809 = vmatprep.subr.mxu0 %v1550_v60  ;;  %v2490_v60 = vld [vmem:[#allocation7] sm:$0xff]  ;;  %2584 = vmatprep.subr.mxu1 %v4911_v1 }
 0x25c   :  { %1810 = vmatpush1.msra.mxu0 %v1549_v62  ;;  %v4024_v62 = vld [vmem:[#allocation7 + $0x160] sm:$0xff]  ;;  %2585 = vmatpush1.msra.mxu1 %v2490_v60 }
 0x25d   :  { %1811 = vmatprep.subr.mxu0 %v1546_v0  ;;  %2586 = vmatprep.subr.mxu1 %v4911_v1 }
 0x25e   :  { %1812 = vmatpush1.msra.mxu0 %v1545_v6  ;;  %v4031_v6 = vld [vmem:[#allocation7 + $0x158] sm:$0xff]  ;;  %2587 = vmatpush2.msra.mxu1 %v2521_v4 }
 0x25f   :  { %1813 = vmatprep.subr.mxu0 %v1670_v2  ;;  %2588 = vmatprep.subr.mxu1 %v4911_v1 }
 0x260   :  { %1814 = vmatpush2.msra.mxu0 %v1669_v7  ;;  %v2520_v7 = vld [vmem:[#allocation7 + $0xf0] sm:$0xff] }
 0x261   :  { %1815 = vmatprep.subr.mxu0 %v1666_v8  ;;  %v4038_v8 = vld [vmem:[#allocation7 + $0x150] sm:$0xff]  ;;  %2589 = vmatpush2.msra.mxu1 %v2520_v7 }
 0x262   :  { %1816 = vmatpush2.msra.mxu0 %v1665_v12  ;;  %v2519_v12 = vld [vmem:[#allocation7 + $0xe8] sm:$0xff]  ;;  %2590 = vmatprep.subr.mxu1 %v4911_v1 }
 0x263   :  { %1817 = vmatprep.subr.mxu0 %v1662_v13  ;;  %v4045_v13 = vld [vmem:[#allocation7 + $0x148] sm:$0xff]  ;;  %2591 = vmatpush2.msra.mxu1 %v2519_v12 }
 0x264   :  { %1818 = vmatpush2.msra.mxu0 %v1661_v14  ;;  %4928 = vst [vmem:[#allocation12_spill] sm:$0xff] %v4045_v13  ;;  %2592 = vmatprep.subr.mxu1 %v4911_v1 }
 0x265   :  { %1819 = vmatprep.subr.mxu0 %v1658_v15  ;;  %v2518_v15 = vld [vmem:[#allocation7 + $0xe0] sm:$0xff] }
 0x266   :  { %1820 = vmatpush2.msra.mxu0 %v1657_v19  ;;  %2593 = vmatpush2.msra.mxu1 %v2518_v15 }
 0x267   :  { %1821 = vmatprep.subr.mxu0 %v1654_v20  ;;  %v2517_v20 = vld [vmem:[#allocation7 + $0xd8] sm:$0xff]  ;;  %2594 = vmatprep.subr.mxu1 %v4911_v1 }
 0x268   :  { %1822 = vmatpush2.msra.mxu0 %v1653_v22  ;;  %v4059_v22 = vld [vmem:[#allocation7 + $0x138] sm:$0xff]  ;;  %2595 = vmatpush2.msra.mxu1 %v2517_v20 }
 0x269   :  { %1823 = vmatprep.subr.mxu0 %v1650_v25  ;;  %4930 = vst [vmem:[#allocation14_spill] sm:$0xff] %v4059_v22  ;;  %2596 = vmatprep.subr.mxu1 %v4911_v1 }
 0x26a   :  { %1824 = vmatpush2.msra.mxu0 %v1649_v27  ;;  %v4066_v27 = vld [vmem:[#allocation7 + $0x130] sm:$0xff]  ;;  %2597 = vmatpush2.msra.mxu1 %v2516_v26 }
 0x26b   :  { %1825 = vmatprep.subr.mxu0 %v1646_v29  ;;  %4932 = vst [vmem:[#allocation16_spill] sm:$0xff] %v4066_v27  ;;  %2598 = vmatprep.subr.mxu1 %v4911_v1 }
 0x26c   :  { %1826 = vmatpush2.msra.mxu0 %v1645_v31  ;;  %v2515_v31 = vld [vmem:[#allocation7 + $0xc8] sm:$0xff] }
 0x26d   :  { %1827 = vmatprep.subr.mxu0 %v1642_v43  ;;  %v4073_v43 = vld [vmem:[#allocation7 + $0x128] sm:$0xff]  ;;  %2599 = vmatpush2.msra.mxu1 %v2515_v31 }
 0x26e   :  { %1828 = vmatpush2.msra.mxu0 %v1641_v61  ;;  %4934 = vst [vmem:[#allocation18_spill] sm:$0xff] %v4073_v43  ;;  %v2514_v61 = vld [vmem:[#allocation7 + $0xc0] sm:$0xff]  ;;  %2600 = vmatprep.subr.mxu1 %v4911_v1 }
 0x26f   :  { %1829 = vmatprep.subr.mxu0 %v1638_v5  ;;  %v4080_v5 = vld [vmem:[#allocation7 + $0x120] sm:$0xff]  ;;  %2601 = vmatpush2.msra.mxu1 %v2514_v61 }
 0x270   :  { %1830 = vmatpush2.msra.mxu0 %v1637_v52  ;;  %4936 = vst [vmem:[#allocation20_spill] sm:$0xff] %v4080_v5  ;;  %2602 = vmatprep.subr.mxu1 %v4911_v1 }
 0x271   :  { %1831 = vmatprep.subr.mxu0 %v1634_v24  ;;  %v2513_v24 = vld [vmem:[#allocation7 + $0xb8] sm:$0xff] }
 0x272   :  { %1832 = vmatpush2.msra.mxu0 %v1633_v32  ;;  %2603 = vmatpush2.msra.mxu1 %v2513_v24  ;;  %v2510_v24 = vld [vmem:[#allocation7 + $0xa0] sm:$0xff] }
 0x273   :  { %1833 = vmatprep.subr.mxu0 %v1630_v40  ;;  %v2512_v40 = vld [vmem:[#allocation7 + $0xb0] sm:$0xff]  ;;  %2604 = vmatprep.subr.mxu1 %v4911_v1 }
 0x274   :  { %1834 = vmatpush2.msra.mxu0 %v1629_v54  ;;  %v3984_v41 = vpop.f32.mrf.mxu0  ;;  %v4094_v54 = vld [vmem:[#allocation7 + $0x110] sm:$0xff]  ;;  %2605 = vmatpush2.msra.mxu1 %v2512_v40  ;;  %v2547_v40 = vld [vmem:[#allocation7 + $0x1c8] sm:$0xff] }
 0x275   :  { %1835 = vmatprep.subr.mxu0 %v1626_v57  ;;  %4940 = vst [vmem:[#allocation24_spill] sm:$0xff] %v4094_v54  ;;  %2606 = vmatprep.subr.mxu1 %v4911_v1 }
 0x276   :  { %1836 = vmatpush2.msra.mxu0 %v1625_v23  ;;  %v3987_v28 = vpop.f32.mrf.mxu0  ;;  %2607 = vmatpush2.msra.mxu1 %v2511_v17 }
 0x277   :  { %1837 = vmatprep.subr.mxu0 %v1622_v9  ;;  %v2522_v9 = vld [vmem:[#allocation7 + $0x100] sm:$0xff]  ;;  %2608 = vmatprep.subr.mxu1 %v4911_v1 }
 0x278   :  { %1838 = vmatpush2.msra.mxu0 %v1621_v21  ;;  %v3990_v37 = vpop.f32.mrf.mxu0  ;;  %v2553_v21 = vld [vmem:[#allocation7 + $0x1f8] sm:$0xff]  ;;  %2609 = vmatpush2.msra.mxu1 %v2510_v24  ;;  %v2543_v24 = vld [vmem:[#allocation7 + $0x1a8] sm:$0xff] }
 0x279   :  { %1839 = vmatprep.subr.mxu0 %v1618_v33  ;;  %2610 = vmatprep.subr.mxu1 %v4911_v1 }
 0x27a   :  { %1840 = vmatpush2.msra.mxu0 %v1617_v36  ;;  %v3993_v45 = vpop.f32.mrf.mxu0 }
 0x27b   :  { %1841 = vmatprep.subr.mxu0 %v1614_v38  ;;  %v2551_v38 = vld [vmem:[#allocation7 + $0x1e8] sm:$0xff] }
 0x27c   :  { %1842 = vmatpush2.msra.mxu0 %v1613_v39  ;;  %v3996_v35 = vpop.f32.mrf.mxu0 }
 0x27d   :  { %1843 = vmatprep.subr.mxu0 %v1610_v16  ;;  %v2550_v16 = vld [vmem:[#allocation7 + $0x1e0] sm:$0xff] }
 0x27e   :  { %1844 = vmatpush2.msra.mxu0 %v1609_v46  ;;  %v3998_v48 = vpop.f32.mrf.mxu0 }
 0x27f   :  { %1846 = vmatmul.mubr.f32.vlgmr.msra.gmra.mxu0 %v3973_v47  ;;  %2779 = vmatprep.subr.mxu0 %v4911_v1  ;;  %v4014_v47 = vld [vmem:[#allocation7 + $0x170] sm:$0xff] }
 0x280   :  { %v4002_v49 = vpop.f32.mrf.mxu0  ;;  %2780 = vmatpush1.msra.mxu0 %v4008_v55 }
 0x281   :  { %2781 = vmatprep.subr.mxu0 %v4911_v1 }
 0x282   :  { %v4004_v50 = vpop.f32.mrf.mxu0  ;;  %2782 = vmatpush1.msra.mxu0 %v4014_v47 }
 0x283   :  { %2783 = vmatprep.subr.mxu0 %v4911_v1 }
 0x284   :  { %v4006_v51 = vpop.f32.mrf.mxu0  ;;  %2784 = vmatpush1.msra.mxu0 %v4017_v42 }
 0x285   :  { %2785 = vmatprep.subr.mxu0 %v4911_v1 }
 0x286   :  { %v4010_v56 = vpop.f32.mrf.mxu0  ;;  %2786 = vmatpush1.msra.mxu0 %v4024_v62 }
 0x287   :  { %2787 = vmatprep.subr.mxu0 %v4911_v1 }
 0x288   :  { %v4019_v59 = vpop.f32.mrf.mxu0  ;;  %2788 = vmatpush1.msra.mxu0 %v4031_v6 }
 0x289   :  { %2789 = vmatprep.subr.mxu0 %v4911_v1 }
 0x28a   :  { %v4026_v0 = vpop.f32.mrf.mxu0  ;;  %2790 = vmatpush1.msra.mxu0 %v4038_v8 }
 0x28b   :  { %2791 = vmatprep.subr.mxu0 %v4911_v1 }
 0x28c   :  { %v4033_v2 = vpop.f32.mrf.mxu0  ;;  %2792 = vmatpush1.msra.mxu0 %v4045_v13 }
 0x28d   :  { %2793 = vmatprep.subr.mxu0 %v4911_v1 }
 0x28e   :  { %v4040_v10 = vpop.f32.mrf.mxu0  ;;  %2794 = vmatpush1.msra.mxu0 %v4052_v18 }
 0x28f   :  { %2795 = vmatprep.subr.mxu0 %v4911_v1 }
 0x290   :  { %v4047_v14 = vpop.f32.mrf.mxu0  ;;  %2796 = vmatpush1.msra.mxu0 %v4059_v22 }
 0x291   :  { %2797 = vmatprep.subr.mxu0 %v4911_v1 }
 0x292   :  { %v4054_v19 = vpop.f32.mrf.mxu0  ;;  %2798 = vmatpush1.msra.mxu0 %v4066_v27  ;;  %v1863_v27 = vlaneseq }
 0x293   :  { %2799 = vmatprep.subr.mxu0 %v4911_v1 }
 0x294   :  { %v4061_v25 = vpop.f32.mrf.mxu0  ;;  %2800 = vmatpush1.msra.mxu0 %v4073_v43 }
 0x295   :  { %4931 = vst [vmem:[#allocation15_spill] sm:$0xff] %v4061_v25  ;;  %2801 = vmatprep.subr.mxu0 %v4911_v1 }
 0x296   :  { %v4068_v29 = vpop.f32.mrf.mxu0  ;;  %2802 = vmatpush1.msra.mxu0 %v4080_v5 }
 0x297   :  { %4933 = vst [vmem:[#allocation17_spill] sm:$0xff] %v4068_v29  ;;  %2803 = vmatprep.subr.mxu0 %v4911_v1 }
 0x298   :  { %v4075_v3 = vpop.f32.mrf.mxu0  ;;  %2804 = vmatpush1.msra.mxu0 %v4087_v11 }
 0x299   :  { %4935 = vst [vmem:[#allocation19_spill] sm:$0xff] %v4075_v3  ;;  %2805 = vmatprep.subr.mxu0 %v4911_v1 }
 0x29a   :  { %v4082_v52 = vpop.f32.mrf.mxu0  ;;  %2806 = vmatpush1.msra.mxu0 %v4094_v54 }
 0x29b   :  { %4937 = vst [vmem:[#allocation21_spill] sm:$0xff] %v4082_v52  ;;  %2807 = vmatprep.subr.mxu0 %v4911_v1 }
 0x29c   :  { %v4089_v32 = vpop.f32.mrf.mxu0  ;;  %2808 = vmatpush1.msra.mxu0 %v4101_v63 }
 0x29d   :  { %4939 = vst [vmem:[#allocation23_spill] sm:$0xff] %v4089_v32  ;;  %2809 = vmatprep.subr.mxu0 %v4911_v1 }
 0x29e   :  { %v4096_v57 = vpop.f32.mrf.mxu0  ;;  %2810 = vmatpush1.msra.mxu0 %v2522_v9 }
 0x29f   :  { %4941 = vst [vmem:[#allocation25_spill] sm:$0xff] %v4096_v57  ;;  %2811 = vmatprep.subr.mxu0 %v4911_v1 }
 0x2a0   :  { %v4103_v23 = vpop.f32.mrf.mxu0  ;;  %2812 = vmatpush2.msra.mxu0 %v2553_v21  ;;  %v2546_v21 = vld [vmem:[#allocation7 + $0x1c0] sm:$0xff] }
 0x2a1   :  { %4943 = vst [vmem:[#allocation27_spill] sm:$0xff] %v4103_v23  ;;  %2813 = vmatprep.subr.mxu0 %v4911_v1 }
 0x2a2   :  { %v4108_v30 = vpop.f32.mrf.mxu0  ;;  %2814 = vmatpush2.msra.mxu0 %v2552_v34 }
 0x2a3   :  { %4944 = vst [vmem:[#allocation28_spill] sm:$0xff] %v4108_v30  ;;  %2815 = vmatprep.subr.mxu0 %v4911_v1  ;;  %v1864_v30 = vshrl.u32 %v1863_v27, 7 }
 0x2a4   :  { %v4113_v33 = vpop.f32.mrf.mxu0  ;;  %2816 = vmatpush2.msra.mxu0 %v2551_v38  ;;  %v2545_v38 = vld [vmem:[#allocation7 + $0x1b8] sm:$0xff] }
 0x2a5   :  { %4945 = vst [vmem:[#allocation29_spill] sm:$0xff] %v4113_v33  ;;  %2817 = vmatprep.subr.mxu0 %v4911_v1  ;;  %v3433_v33 = vmov 1966171168  }
 0x2a6   :  { %v4116_v36 = vpop.f32.mrf.mxu0  ;;  %2818 = vmatpush2.msra.mxu0 %v2550_v16 }
 0x2a7   :  { %4946 = vst [vmem:[#allocation30_spill] sm:$0xff] %v4116_v36  ;;  %2819 = vmatprep.subr.mxu0 %v4911_v1  ;;  %v1861_v36 = vunpack.c.l.s4 %v3433_v33 }
 0x2a8   :  { %v4119_v39 = vpop.f32.mrf.mxu0  ;;  %2820 = vmatpush2.msra.mxu0 %v2549_v44  ;;  %v2544_v44 = vld [vmem:[#allocation7 + $0x1b0] sm:$0xff] }
 0x2a9   :  { %4947 = vst [vmem:[#allocation31_spill] sm:$0xff] %v4119_v39  ;;  %2821 = vmatprep.subr.mxu0 %v4911_v1  ;;  %v1862_v22 = vunpack.c.0.s8 %v1861_v36 }
 0x2aa   :  { %v4122_v46 = vpop.f32.mrf.mxu0  ;;  %2822 = vmatpush2.msra.mxu0 %v2548_v58 }
 0x2ab   :  { %4948 = vst [vmem:[#allocation32_spill] sm:$0xff] %v4122_v46  ;;  %2823 = vmatprep.subr.mxu0 %v4911_v1 }
 0x2ac   :  { %v4125_v53 = vpop.f32.mrf.mxu0  ;;  %2824 = vmatpush2.msra.mxu0 %v2547_v40 }
 0x2ad   :  { %4949 = vst [vmem:[#allocation33_spill] sm:$0xff] %v4125_v53  ;;  %2825 = vmatprep.subr.mxu0 %v4911_v1 }
 0x2ae   :  { %v4128_v60 = vpop.f32.mrf.mxu0  ;;  %2826 = vmatpush2.msra.mxu0 %v2546_v21  ;;  %v2542_v21 = vld [vmem:[#allocation7 + $0x1a0] sm:$0xff] }
 0x2af   :  { %4950 = vst [vmem:[#allocation34_spill] sm:$0xff] %v4128_v60  ;;  %2827 = vmatprep.subr.mxu0 %v4911_v1 }
 0x2b0   :  { %v4131_v4 = vpop.f32.mrf.mxu0  ;;  %2828 = vmatpush2.msra.mxu0 %v2545_v38 }
 0x2b1   :  { %4951 = vst [vmem:[#allocation35_spill] sm:$0xff] %v4131_v4  ;;  %2829 = vmatprep.subr.mxu0 %v4911_v1 }
 0x2b2   :  { %v4134_v7 = vpop.f32.mrf.mxu0  ;;  %2830 = vmatpush2.msra.mxu0 %v2544_v44  ;;  %v2541_v44 = vld [vmem:[#allocation7 + $0x198] sm:$0xff] }
 0x2b3   :  { %4952 = vst [vmem:[#allocation36_spill] sm:$0xff] %v4134_v7  ;;  %2831 = vmatprep.subr.mxu0 %v4911_v1 }
 0x2b4   :  { %v4136_v12 = vpop.f32.mrf.mxu0  ;;  %2832 = vmatpush2.msra.mxu0 %v2543_v24 }
 0x2b5   :  { %4953 = vst [vmem:[#allocation37_spill] sm:$0xff] %v4136_v12  ;;  %2833 = vmatprep.subr.mxu0 %v4911_v1 }
 0x2b6   :  { %v4138_v15 = vpop.f32.mrf.mxu0  ;;  %2834 = vmatpush2.msra.mxu0 %v2542_v21  ;;  %v2506_v21 = vld [vmem:[#allocation7 + $0x80] sm:$0xff] }
 0x2b7   :  { %4954 = vst [vmem:[#allocation38_spill] sm:$0xff] %v4138_v15  ;;  %2835 = vmatprep.subr.mxu0 %v4911_v1 }
 0x2b8   :  { %v4140_v20 = vpop.f32.mrf.mxu0  ;;  %2836 = vmatpush2.msra.mxu0 %v2541_v44 }
 0x2b9   :  { %4955 = vst [vmem:[#allocation39_spill] sm:$0xff] %v4140_v20  ;;  %2837 = vmatprep.subr.mxu0 %v4911_v1 }
 0x2ba   :  { %v4142_v26 = vpop.f32.mrf.mxu0 }
 0x2bb   :  { %4956 = vst [vmem:[#allocation40_spill] sm:$0xff] %v4142_v26 }
 0x2bc   :  { %v4144_v31 = vpop.f32.mrf.mxu0 }
 0x2bd   :  { %4957 = vst [vmem:[#allocation41_spill] sm:$0xff] %v4144_v31 }
 0x2be   :  { %v4146_v61 = vpop.f32.mrf.mxu0 }
 0x2bf   :  { %4958 = vst [vmem:[#allocation42_spill] sm:$0xff] %v4146_v61 }
 0x2c0   :  { %v4148_v17 = vpop.f32.mrf.mxu0 }
 0x2c1   :  { %4959 = vst [vmem:[#allocation43_spill] sm:$0xff] %v4148_v17  ;;  %v2508_v17 = vld [vmem:[#allocation7 + $0x90] sm:$0xff] }
 0x2c2   :  { %v4152_v9 = vpop.f32.mrf.mxu0 }
 0x2c3   :  { %4960 = vst [vmem:[#allocation44_spill] sm:$0xff] %v4152_v9 }
 0x2c4   :  { %v4154_v34 = vpop.f32.mrf.mxu0 }
 0x2c5   :  { %4961 = vst [vmem:[#allocation45_spill] sm:$0xff] %v4154_v34  ;;  %v2509_v34 = vld [vmem:[#allocation7 + $0x98] sm:$0xff] }
 0x2c6   :  { %v4157_v16 = vpop.f32.mrf.mxu0  ;;  %2611 = vmatpush2.msra.mxu1 %v2509_v34 }
 0x2c7   :  { %4962 = vst [vmem:[#allocation46_spill] sm:$0xff] %v4157_v16  ;;  %v2540_v16 = vld [vmem:[#allocation7 + $0x190] sm:$0xff]  ;;  %2612 = vmatprep.subr.mxu1 %v4911_v1 }
 0x2c8   :  { %v4160_v58 = vpop.f32.mrf.mxu0  ;;  %2613 = vmatpush2.msra.mxu1 %v2508_v17  ;;  %2838 = vmatpush2.msra.mxu0 %v2540_v16  ;;  %v2538_v17 = vld [vmem:[#allocation7 + $0x180] sm:$0xff]  ;;  %v4184_v16 = vpop.f32.mrf.mxu1 }
 0x2c9   :  { %4963 = vst [vmem:[#allocation47_spill] sm:$0xff] %v4160_v58  ;;  %v2507_v58 = vld [vmem:[#allocation7 + $0x88] sm:$0xff]  ;;  %2614 = vmatprep.subr.mxu1 %v4911_v1  ;;  %2839 = vmatprep.subr.mxu0 %v4911_v1 }
 0x2ca   :  { %v4163_v40 = vpop.f32.mrf.mxu0  ;;  %2615 = vmatpush2.msra.mxu1 %v2507_v58 }
 0x2cb   :  { %4964 = vst [vmem:[#allocation48_spill] sm:$0xff] %v4163_v40  ;;  %v2539_v40 = vld [vmem:[#allocation7 + $0x188] sm:$0xff]  ;;  %2616 = vmatprep.subr.mxu1 %v4911_v1 }
 0x2cc   :  { %v4166_v38 = vpop.f32.mrf.mxu0  ;;  %2840 = vmatpush2.msra.mxu0 %v2539_v40  ;;  %2617 = vmatpush2.msra.mxu1 %v2506_v21 }
 0x2cd   :  { %4965 = vst [vmem:[#allocation49_spill] sm:$0xff] %v4166_v38  ;;  %2841 = vmatprep.subr.mxu0 %v4911_v1  ;;  %3248 = vmatprep.subr.mxu1 %v4911_v1 }
 0x2ce   :  { %v4170_v24 = vpop.f32.mrf.mxu0  ;;  %2842 = vmatpush2.msra.mxu0 %v2538_v17 }
 0x2cf   :  { %4966 = vst [vmem:[#allocation50_spill] sm:$0xff] %v4170_v24  ;;  %v4190_v24 = vpop.f32.mrf.mxu1 }
 0x2d0   :  { %v4174_v38 = vpop.f32.mrf.mxu0 }
 0x2d1   :  { %4967 = vst [vmem:[#allocation51_spill] sm:$0xff] %v4174_v38  ;;  %v4196_v21 = vpop.f32.mrf.mxu1 }
 0x2d2   :  { %v4178_v34 = vpop.f32.mrf.mxu0 }
 0x2d3   :  { %4968 = vst [vmem:[#allocation52_spill] sm:$0xff] %v4178_v34  ;;  %v4202_v17 = vpop.f32.mrf.mxu1 }
 0x2d4   :  { %v4182_v44 = vpop.f32.mrf.mxu0 }
 0x2d5   :  { %4969 = vst [vmem:[#allocation53_spill] sm:$0xff] %v4182_v44 }
 0x2d6   :  { %v4186_v38 = vpop.f32.mrf.mxu0 }
 0x2d7   :  { %4970 = vst [vmem:[#allocation54_spill] sm:$0xff] %v4186_v38  ;;  %v4208_v38 = vpop.f32.mrf.mxu1 }
 0x2d8   :  { %v4188_v58 = vpop.f32.mrf.mxu0 }
 0x2d9   :  { %4971 = vst [vmem:[#allocation55_spill] sm:$0xff] %v4188_v58 }
 0x2da   :  { %v4192_v40 = vpop.f32.mrf.mxu0 }
 0x2db   :  { %4972 = vst [vmem:[#allocation56_spill] sm:$0xff] %v4192_v40  ;;  %v4214_v40 = vpop.f32.mrf.mxu1 }
 0x2dc   :  { %v4194_v34 = vpop.f32.mrf.mxu0 }
 0x2dd   :  { %4973 = vst [vmem:[#allocation57_spill] sm:$0xff] %v4194_v34  ;;  %v4218_v20 = vpop.f32.mrf.mxu1 }
 0x2de   :  { %v4198_v9 = vpop.f32.mrf.mxu0 }
 0x2df   :  { %4974 = vst [vmem:[#allocation58_spill] sm:$0xff] %v4198_v9 }
 0x2e0   :  { %v4200_v1 = vpop.f32.mrf.mxu0 }
 0x2e1   :  { %4975 = vst [vmem:[#allocation59_spill] sm:$0xff] %v4200_v1  ;;  %v4222_v1 = vpop.f32.mrf.mxu1 }
 0x2e2   :  { %v4204_v44 = vpop.f32.mrf.mxu0 }
 0x2e3   :  { %4976 = vst [vmem:[#allocation60_spill] sm:$0xff] %v4204_v44  ;;  %v4226_v44 = vpop.f32.mrf.mxu1 }
 0x2e4   :  { %v4206_v31 = vpop.f32.mrf.mxu0 }
 0x2e5   :  { %4977 = vst [vmem:[#allocation61_spill] sm:$0xff] %v4206_v31  ;;  %v4230_v26 = vpop.f32.mrf.mxu1 }
 0x2e6   :  { %v4210_v58 = vpop.f32.mrf.mxu0 }
 0x2e7   :  { %4978 = vst [vmem:[#allocation62_spill] sm:$0xff] %v4210_v58 }
 0x2e8   :  { %v4212_v61 = vpop.f32.mrf.mxu0 }
 0x2e9   :  { %4979 = vst [vmem:[#allocation63_spill] sm:$0xff] %v4212_v61  ;;  %v4234_v61 = vpop.f32.mrf.mxu1 }
 0x2ea   :  { %v4216_v34 = vpop.f32.mrf.mxu0 }
 0x2eb   :  { %4980 = vst [vmem:[#allocation64_spill] sm:$0xff] %v4216_v34  ;;  %v4236_v15 = vpop.f32.mrf.mxu1 }
 0x2ec   :  { %v4220_v9 = vpop.f32.mrf.mxu0 }
 0x2ed   :  { %4981 = vst [vmem:[#allocation65_spill] sm:$0xff] %v4220_v9  ;;  %v4238_v9 = vpop.f32.mrf.mxu1 }
 0x2ee   :  { %v4224_v63 = vpop.f32.mrf.mxu0 }
 0x2ef   :  { %4982 = vst [vmem:[#allocation66_spill] sm:$0xff] %v4224_v63  ;;  %v4240_v4 = vpop.f32.mrf.mxu1 }
 0x2f0   :  { %v4228_v31 = vpop.f32.mrf.mxu0 }
 0x2f1   :  { %4983 = vst [vmem:[#allocation67_spill] sm:$0xff] %v4228_v31  ;;  %v4242_v63 = vpop.f32.mrf.mxu1 }
 0x2f2   :  { %v4232_v58 = vpop.f32.mrf.mxu0 }
 0x2f3   :  { %4984 = vst [vmem:[#allocation68_spill] sm:$0xff] %v4232_v58  ;;  %v4244_v11 = vpop.f32.mrf.mxu1 }
 0x2f5   :  { %v4246_v31 = vpop.f32.mrf.mxu1 }
 0x2f6   :  { %4985 = vst [vmem:[#allocation69_spill] sm:$0xff] %v4246_v31 }
 0x2f7   :  { %v4248_v7 = vpop.f32.mrf.mxu1 }
 0x2f8   :  { %4986 = vst [vmem:[#allocation70_spill] sm:$0xff] %v4248_v7 }
 0x2f9   :  { %v4250_v58 = vpop.f32.mrf.mxu1 }
 0x2fa   :  { %4987 = vst [vmem:[#allocation71_spill] sm:$0xff] %v4250_v58 }
 0x2fb   :  { %v4252_v53 = vpop.f32.mrf.mxu1 }
 0x2fc   :  { %4988 = vst [vmem:[#allocation72_spill] sm:$0xff] %v4252_v53 }
 0x2fd   :  { %v4254_v5 = vpop.f32.mrf.mxu1 }
 0x2fe   :  { %4989 = vst [vmem:[#allocation73_spill] sm:$0xff] %v4254_v5  ;;  %v4268_v5 = vsub.s32 %v1862_v22, %v1864_v30 }
 0x2ff   :  { %v1776_v12 = vpop.f32.mrf.mxu0  ;;  %v4256_v60 = vpop.f32.mrf.mxu1 }
 0x300   :  { %4990 = vst [vmem:[#allocation74_spill] sm:$0xff] %v4256_v60  ;;  %4996 = vst [vmem:[#allocation80_spill] sm:$0xff] %v4268_v5 }
 0x301   :  { %v1778_v34 = vpop.f32.mrf.mxu0  ;;  %v4258_v39 = vpop.f32.mrf.mxu1 }
 0x302   :  { %v1857_v54 = vcombine.high %v1776_v12, %v1778_v34  ;;  %4991 = vst [vmem:[#allocation75_spill] sm:$0xff] %v4258_v39  ;;  %v1856_v57 = vcombine.low %v1776_v12, %v1778_v34 }
 0x303   :  { %v4260_v43 = vpop.f32.mrf.mxu1 }
 0x304   :  { %4992 = vst [vmem:[#allocation76_spill] sm:$0xff] %v4260_v43  ;;  %v4274_v33 = vrot.slane %v1857_v54, %v4268_v5  ;;  %v2212_v54 = vld [vmem:[%s4907_s6] sm:$0xf] }
 0x305   :  { %v4262_v46 = vpop.f32.mrf.mxu1 }
 0x306   :  { %4993 = vst [vmem:[#allocation77_spill] sm:$0xff] %v4262_v46  ;;  %v1866_v46 = vrot.slane %v1856_v57, %v4268_v5  ;;  %4998 = vst [vmem:[#allocation82_spill] sm:$0xff] %v4274_v33  ;;  %v4291_v57 = vsub.s32 1, %v1864_v30 }
 0x307   :  { %v4264_v23 = vpop.f32.mrf.mxu1 }
 0x308   :  { %4994 = vst [vmem:[#allocation78_spill] sm:$0xff] %v4264_v23 }
 0x309   :  { %v4266_v32 = vpop.f32.mrf.mxu1 }
 0x30a   :  { %4995 = vst [vmem:[#allocation79_spill] sm:$0xff] %v4266_v32 }
 0x30b   :  { %v4270_v58 = vpop.f32.mrf.mxu1 }
 0x30c   :  { %4997 = vst [vmem:[#allocation81_spill] sm:$0xff] %v4270_v58 }
 0x30d   :  { %v4280_v36 = vpop.f32.mrf.mxu1 }
 0x30e   :  { %5000 = vst [vmem:[#allocation84_spill] sm:$0xff] %v4280_v36 }
 0x30f   :  { %v4300_v22 = vpop.f32.mrf.mxu1 }
 0x310   :  { %5001 = vst [vmem:[#allocation85_spill] sm:$0xff] %v4300_v22 }
 0x311   :  { %v4329_v53 = vpop.f32.mrf.mxu1 }
 0x312   :  { %5002 = vst [vmem:[#allocation86_spill] sm:$0xff] %v4329_v53 }
 0x33f   :  { %v1847_v18 = vpop.f32.mrf.mxu0 }
 0x341   :  { %v1849_v60 = vpop.f32.mrf.mxu0 }
 0x342   :  { %v1858_v39 = vcombine.low %v1847_v18, %v1849_v60  ;;  %v1859_v43 = vcombine.high %v1847_v18, %v1849_v60  ;;  %v4286_v18 = vsub.s32 0, %v1864_v30 }
 0x344   :  { %v1880_v23 = vrot.slane %v1858_v39, %v4268_v5  ;;  %v4278_v27 = vrot.slane %v1859_v43, %v4268_v5  ;;  %v4293_v39 = vsub.s32 3, %v1864_v30  ;;  %v4295_v43 = vsub.s32 2, %v1864_v30 }
 0x345   :  { %v4303_v34 = vrot.slane %v2212_v54, %v4286_v18 }
 0x346   :  { %4999 = vst [vmem:[#allocation83_spill] sm:$0xff] %v4278_v27  ;;  %v1888_v12 = vcombine.low %v1866_v46, %v1880_v23  ;;  %v1889_v60 = vcombine.high %v1866_v46, %v1880_v23  ;;  %v4306_v27 = vrot.slane %v2212_v54, %v4291_v57  ;;  %v4309_v33 = vrot.slane %v2212_v54, %v4293_v39 }
 0x347   :  { %v4312_v32 = vrot.slane %v2212_v54, %v4295_v43 }
 0x348   :  { %v4298_v36 = vrot.slane %v1888_v12, %v4268_v5  ;;  %v4323_v22 = vrot.slane %v1889_v60, %v4268_v5  ;;  %v4349_v5 = vpop.f32.mrf.mxu1 }
 0x349   :  { %5003 = vst [vmem:[#allocation87_spill] sm:$0xff] %v4349_v5 }
 0x34a   :  { %v1927_v23 = vrot.slane %v4298_v36, %v4286_v18  ;;  %v1931_v30 = vrot.slane %v4298_v36, %v4291_v57  ;;  %v1939_v46 = vrot.slane %v4298_v36, %v4293_v39  ;;  %v1935_v12 = vrot.slane %v4298_v36, %v4295_v43 }
 0x34c   :  { %v2085_v58 = vadd.f32 %v1931_v30, %v3987_v28  ;;  %v2087_v54 = vadd.f32 %v1939_v46, %v4190_v24  ;;  %v2084_v3 = vadd.f32 %v1927_v23, %v3984_v41  ;;  %v2086_v13 = vadd.f32 %v1935_v12, %v4184_v16 }
 0x34d   :  { %v2089_v31 = vadd.f32 %v1931_v30, %v3993_v45  ;;  %v2091_v52 = vadd.f32 %v1939_v46, %v4202_v17  ;;  %v2088_v25 = vadd.f32 %v1927_v23, %v3990_v37  ;;  %v2090_v7 = vadd.f32 %v1935_v12, %v4196_v21 }
 0x34e   :  { %v2235_v60 = vadd.f32 %v4306_v27, %v2085_v58  ;;  %v2237_v28 = vadd.f32 %v4309_v33, %v2087_v54  ;;  %v2234_v24 = vadd.f32 %v4303_v34, %v2084_v3  ;;  %v2236_v41 = vadd.f32 %v4312_v32, %v2086_v13 }
 0x34f   :  { %v2239_v16 = vadd.f32 %v4306_v27, %v2089_v31  ;;  %v2241_v53 = vadd.f32 %v4309_v33, %v2091_v52  ;;  %v4343_v45 = vrot.slane %v4323_v22, %v4291_v57  ;;  %v4347_v37 = vrot.slane %v4323_v22, %v4293_v39 }
 0x350   :  { %v2363_v21 = vmax.f32 %v2235_v60, 0.0  ;;  %v2365_v58 = vmax.f32 %v2237_v28, 0.0  ;;  %v2362_v17 = vmax.f32 %v2234_v24, 0.0  ;;  %v2364_v54 = vmax.f32 %v2236_v41, 0.0 }
 0x351   :  { %v2238_v13 = vadd.f32 %v4303_v34, %v2088_v25  ;;  %v2240_v3 = vadd.f32 %v4312_v32, %v2090_v7  ;;  %v4355_v52 = vrot.slane %v4323_v22, %v4286_v18  ;;  %v4359_v31 = vrot.slane %v4323_v22, %v4295_v43 }
 0x352   :  { %2618 = vmatprep.mubr.f32.mxu1 %v2363_v21  ;;  %2843 = vmatprep.mubr.f32.mxu0 %v2365_v58  ;;  %v2367_v60 = vmax.f32 %v2239_v16, 0.0  ;;  %v2093_v28 = vadd.f32 %v1931_v30, %v3998_v48  ;;  %v2095_v24 = vadd.f32 %v1939_v46, %v4214_v40  ;;  %v2092_v41 = vadd.f32 %v1927_v23, %v3996_v35  ;;  %v4371_v21 = vpop.f32.mrf.mxu1 }
 0x353   :  { %2619 = vmatmul.mubr.f32.vlgmr.msra.gmra.mxu1 %v2362_v17  ;;  %2844 = vmatmul.mubr.f32.vlgmr.msra.gmra.mxu0 %v2364_v54  ;;  %v2369_v25 = vmax.f32 %v2241_v53, 0.0  ;;  %v2094_v7 = vadd.f32 %v1935_v12, %v4208_v38  ;;  %v2097_v5 = vadd.f32 %v1931_v30, %v4004_v50  ;;  %v2099_v29 = vadd.f32 %v1939_v46, %v4222_v1 }
 0x354   :  { %3280 = vmatpush1.msra.mxu1 %v4008_v55  ;;  %2623 = vmatprep.mubr.f32.mxu1 %v2367_v60  ;;  %v2243_v16 = vadd.f32 %v4306_v27, %v2093_v28  ;;  %v2245_v48 = vadd.f32 %v4309_v33, %v2095_v24  ;;  %v2242_v40 = vadd.f32 %v4303_v34, %v2092_v41  ;;  %v5004_v35 = vmov 0.0  }
 0x355   :  { %2848 = vmatprep.mubr.f32.mxu0 %v2369_v25  ;;  %3249 = vmatprep.subr.mxu1 %v5004_v35  ;;  %v2366_v53 = vmax.f32 %v2238_v13, 0.0  ;;  %v2368_v38 = vmax.f32 %v2240_v3, 0.0  ;;  %v2244_v50 = vadd.f32 %v4312_v32, %v2094_v7  ;;  %v2247_v1 = vadd.f32 %v4306_v27, %v2097_v5 }
 0x356   :  { %3281 = vmatpush1.msra.mxu1 %v4014_v47  ;;  %v2371_v55 = vmax.f32 %v2243_v16, 0.0  ;;  %v2373_v30 = vmax.f32 %v2245_v48, 0.0  ;;  %v2249_v46 = vadd.f32 %v4309_v33, %v2099_v29  ;;  %v2096_v58 = vadd.f32 %v1927_v23, %v4002_v49  ;;  %v4385_v29 = vpop.f32.mrf.mxu1 }
 0x357   :  { %2624 = vmatmul.mubr.f32.gmra.mxu1 %v2366_v53  ;;  %2849 = vmatmul.mubr.f32.gmra.mxu0 %v2368_v38  ;;  %v2370_v17 = vmax.f32 %v2242_v40, 0.0  ;;  %v2372_v54 = vmax.f32 %v2244_v50, 0.0  ;;  %v2098_v60 = vadd.f32 %v1935_v12, %v4218_v20  ;;  %v2375_v13 = vmax.f32 %v2247_v1, 0.0 }
 0x358   :  { %2628 = vmatprep.mubr.f32.mxu1 %v2371_v55  ;;  %2853 = vmatprep.mubr.f32.mxu0 %v2373_v30  ;;  %v2246_v3 = vadd.f32 %v4303_v34, %v2096_v58  ;;  %v2101_v47 = vadd.f32 %v4343_v45, %v4010_v56  ;;  %v2103_v5 = vadd.f32 %v4347_v37, %v4230_v26  ;;  %v2377_v56 = vmax.f32 %v2249_v46, 0.0  ;;  %v4404_v25 = vpop.f32.mrf.mxu1 }
 0x359   :  { %3250 = vmatprep.subr.mxu1 %v5004_v35  ;;  %v2248_v49 = vadd.f32 %v4312_v32, %v2098_v60  ;;  %v2100_v20 = vadd.f32 %v4355_v52, %v4006_v51  ;;  %v2102_v23 = vadd.f32 %v4359_v31, %v4226_v44  ;;  %v2105_v12 = vadd.f32 %v4343_v45, %v4026_v0 }
 0x35a   :  { %3282 = vmatpush1.msra.mxu1 %v4017_v42  ;;  %v2251_v26 = vadd.f32 %v4306_v27, %v2101_v47  ;;  %v2253_v28 = vadd.f32 %v4309_v33, %v2103_v5  ;;  %v2107_v24 = vadd.f32 %v4347_v37, %v4236_v15  ;;  %v2374_v41 = vmax.f32 %v2246_v3, 0.0  ;;  %v4425_v55 = vpop.f32.mrf.mxu1 }
 0x35b   :  { %2629 = vmatmul.mubr.f32.gmra.mxu1 %v2370_v17  ;;  %2854 = vmatmul.mubr.f32.gmra.mxu0 %v2372_v54  ;;  %v2376_v51 = vmax.f32 %v2248_v49, 0.0  ;;  %v2250_v44 = vadd.f32 %v4303_v34, %v2100_v20  ;;  %v2252_v0 = vadd.f32 %v4312_v32, %v2102_v23  ;;  %v2104_v42 = vadd.f32 %v4355_v52, %v4019_v59  ;;  %v5005_v20 = vld [vmem:[#allocation17_spill] sm:$0xff] }
 0x35c   :  { %2633 = vmatprep.mubr.f32.mxu1 %v2375_v13  ;;  %2858 = vmatprep.mubr.f32.mxu0 %v2377_v56  ;;  %v2379_v7 = vmax.f32 %v2251_v26, 0.0  ;;  %v2381_v16 = vmax.f32 %v2253_v28, 0.0  ;;  %v2255_v15 = vadd.f32 %v4306_v27, %v2105_v12  ;;  %v2106_v48 = vadd.f32 %v4359_v31, %v4234_v61  ;;  %v5006_v12 = vld [vmem:[#allocation70_spill] sm:$0xff]  ;;  %v5007_v26 = vld [vmem:[#allocation15_spill] sm:$0xff]  ;;  %v5008_v28 = vld [vmem:[#allocation21_spill] sm:$0xff] }
 0x35d   :  { %3251 = vmatprep.subr.mxu1 %v5004_v35  ;;  %v2257_v40 = vadd.f32 %v4309_v33, %v2107_v24  ;;  %v2254_v53 = vadd.f32 %v4303_v34, %v2104_v42  ;;  %v2109_v59 = vadd.f32 %v4343_v45, %v4040_v10  ;;  %v2111_v38 = vadd.f32 %v4347_v37, %v4240_v4 }
 0x35e   :  { %3283 = vmatpush1.msra.mxu1 %v4024_v62  ;;  %v2256_v50 = vadd.f32 %v4312_v32, %v2106_v48  ;;  %v2108_v1 = vadd.f32 %v4355_v52, %v4033_v2  ;;  %v2110_v62 = vadd.f32 %v4359_v31, %v4238_v9  ;;  %v1920_v61 = vcombine.high %v4298_v36, %v4298_v36 }
 0x35f   :  { %2634 = vmatmul.mubr.f32.gmra.mxu1 %v2374_v41  ;;  %2859 = vmatmul.mubr.f32.gmra.mxu0 %v2376_v51  ;;  %v2259_v10 = vadd.f32 %v4306_v27, %v2109_v59  ;;  %v2378_v4 = vmax.f32 %v2250_v44, 0.0  ;;  %v2380_v30 = vmax.f32 %v2252_v0, 0.0  ;;  %v2261_v46 = vadd.f32 %v4309_v33, %v2111_v38  ;;  %v5009_v0 = vld [vmem:[#allocation69_spill] sm:$0xff]  ;;  %v5012_v38 = vld [vmem:[#allocation19_spill] sm:$0xff] }
 0x360   :  { %2638 = vmatprep.mubr.f32.mxu1 %v2379_v7  ;;  %2863 = vmatprep.mubr.f32.mxu0 %v2381_v16  ;;  %v2383_v2 = vmax.f32 %v2255_v15, 0.0  ;;  %v2385_v58 = vmax.f32 %v2257_v40, 0.0  ;;  %v2113_v9 = vadd.f32 %v4343_v45, %v4054_v19  ;;  %v2115_v36 = vadd.f32 %v4347_v37, %v4244_v11  ;;  %v4444_v11 = vpop.f32.mrf.mxu1  ;;  %v5010_v7 = vld [vmem:[#allocation72_spill] sm:$0xff] }
 0x361   :  { %3252 = vmatprep.subr.mxu1 %v5004_v35  ;;  %v2382_v17 = vmax.f32 %v2254_v53, 0.0  ;;  %v2384_v54 = vmax.f32 %v2256_v50, 0.0  ;;  %v2258_v60 = vadd.f32 %v4303_v34, %v2108_v1  ;;  %v2260_v13 = vadd.f32 %v4312_v32, %v2110_v62  ;;  %v5011_v15 = vld [vmem:[#allocation12_spill] sm:$0xff] }
 0x362   :  { %3284 = vmatpush1.msra.mxu1 %v4031_v6  ;;  %v2387_v3 = vmax.f32 %v2259_v10, 0.0  ;;  %v2112_v6 = vadd.f32 %v4355_v52, %v4047_v14  ;;  %v4439_v47 = vrot.slane %v1920_v61, %v4291_v57  ;;  %v4442_v19 = vrot.slane %v1920_v61, %v4293_v39  ;;  %v4467_v41 = vpop.f32.mrf.mxu1  ;;  %v5013_v10 = vld [vmem:[#allocation71_spill] sm:$0xff] }
 0x363   :  { %2639 = vmatmul.mubr.f32.gmra.mxu1 %v2378_v4  ;;  %2864 = vmatmul.mubr.f32.gmra.mxu0 %v2380_v30  ;;  %v2389_v45 = vmax.f32 %v2261_v46, 0.0  ;;  %v2114_v37 = vadd.f32 %v4359_v31, %v4242_v63  ;;  %v4450_v5 = vrot.slane %v1920_v61, %v4286_v18  ;;  %v4453_v49 = vrot.slane %v1920_v61, %v4295_v43 }
 0x364   :  { %2643 = vmatprep.mubr.f32.mxu1 %v2383_v2  ;;  %2868 = vmatprep.mubr.f32.mxu0 %v2385_v58  ;;  %v2263_v14 = vadd.f32 %v4306_v27, %v2113_v9  ;;  %v2265_v52 = vadd.f32 %v4309_v33, %v2115_v36  ;;  %v2117_v23 = vadd.f32 %v4439_v47, %v5005_v20  ;;  %v2386_v63 = vmax.f32 %v2258_v60, 0.0  ;;  %v4484_v30 = vpop.f32.mrf.mxu1  ;;  %v5014_v9 = vld [vmem:[#allocation25_spill] sm:$0xff] }
 0x365   :  { %3253 = vmatprep.subr.mxu1 %v5004_v35  ;;  %v2119_v56 = vadd.f32 %v4442_v19, %v5006_v12  ;;  %v2262_v31 = vadd.f32 %v4303_v34, %v2112_v6  ;;  %v2121_v24 = vadd.f32 %v4439_v47, %v5008_v28  ;;  %v2388_v51 = vmax.f32 %v2260_v13, 0.0 }
 0x366   :  { %3285 = vmatpush1.msra.mxu1 %v4038_v8  ;;  %v2116_v8 = vadd.f32 %v4450_v5, %v5007_v26  ;;  %v2264_v44 = vadd.f32 %v4312_v32, %v2114_v37  ;;  %v2118_v42 = vadd.f32 %v4453_v49, %v5009_v0  ;;  %v2123_v16 = vadd.f32 %v4442_v19, %v5010_v7  ;;  %v5017_v37 = vld [vmem:[#allocation23_spill] sm:$0xff] }
 0x367   :  { %2644 = vmatmul.mubr.f32.gmra.mxu1 %v2382_v17  ;;  %2869 = vmatmul.mubr.f32.gmra.mxu0 %v2384_v54  ;;  %v2391_v48 = vmax.f32 %v2263_v14, 0.0  ;;  %v2393_v40 = vmax.f32 %v2265_v52, 0.0  ;;  %v2267_v53 = vadd.f32 %v4306_v27, %v2117_v23  ;;  %v2269_v59 = vadd.f32 %v4309_v33, %v2119_v56  ;;  %v5015_v54 = vld [vmem:[#allocation13_spill] sm:$0xff]  ;;  %v4502_v56 = vpop.f32.mrf.mxu1 }
 0x368   :  { %2648 = vmatprep.mubr.f32.mxu1 %v2387_v3  ;;  %2873 = vmatprep.mubr.f32.mxu0 %v2389_v45  ;;  %v2120_v50 = vadd.f32 %v4450_v5, %v5012_v38  ;;  %v2390_v1 = vmax.f32 %v2262_v31, 0.0  ;;  %v2266_v62 = vadd.f32 %v4303_v34, %v2116_v8  ;;  %v2271_v61 = vadd.f32 %v4306_v27, %v2121_v24  ;;  %v5016_v3 = vld [vmem:[#allocation74_spill] sm:$0xff]  ;;  %v5018_v23 = vld [vmem:[#allocation73_spill] sm:$0xff]  ;;  %v5019_v8 = vld [vmem:[#allocation28_spill] sm:$0xff] }
 0x369   :  { %3254 = vmatprep.subr.mxu1 %v5004_v35  ;;  %v2122_v4 = vadd.f32 %v4453_v49, %v5013_v10  ;;  %v2392_v46 = vmax.f32 %v2264_v44, 0.0  ;;  %v2268_v2 = vadd.f32 %v4312_v32, %v2118_v42  ;;  %v2273_v58 = vadd.f32 %v4309_v33, %v2123_v16  ;;  %v5020_v24 = vld [vmem:[#allocation14_spill] sm:$0xff]  ;;  %v5021_v44 = vld [vmem:[#allocation76_spill] sm:$0xff] }
 0x36a   :  { %3286 = vmatpush1.msra.mxu1 %v5011_v15  ;;  %v2125_v36 = vadd.f32 %v4439_v47, %v5014_v9  ;;  %v1922_v17 = vcombine.high %v4323_v22, %v4323_v22  ;;  %v2395_v60 = vmax.f32 %v2267_v53, 0.0  ;;  %v2397_v13 = vmax.f32 %v2269_v59, 0.0  ;;  %v4525_v59 = vpop.f32.mrf.mxu1  ;;  %v5024_v10 = vld [vmem:[#allocation16_spill] sm:$0xff] }
 0x36b   :  { %2649 = vmatmul.mubr.f32.gmra.mxu1 %v2386_v63  ;;  %2874 = vmatmul.mubr.f32.gmra.mxu0 %v2388_v51  ;;  %v2127_v6 = vadd.f32 %v4442_v19, %v5016_v3  ;;  %v2270_v45 = vadd.f32 %v4303_v34, %v2120_v50  ;;  %v2124_v14 = vadd.f32 %v4450_v5, %v5017_v37  ;;  %v2394_v52 = vmax.f32 %v2266_v62, 0.0  ;;  %v5029_v37 = vld [vmem:[#allocation77_spill] sm:$0xff] }
 0x36c   :  { %2653 = vmatprep.mubr.f32.mxu1 %v2391_v48  ;;  %2878 = vmatprep.mubr.f32.mxu0 %v2393_v40  ;;  %v2399_v20 = vmax.f32 %v2271_v61, 0.0  ;;  %v2272_v22 = vadd.f32 %v4312_v32, %v2122_v4  ;;  %v2126_v12 = vadd.f32 %v4453_v49, %v5018_v23  ;;  %v2396_v63 = vmax.f32 %v2268_v2, 0.0  ;;  %v5022_v40 = vld [vmem:[#allocation27_spill] sm:$0xff]  ;;  %v4545_v3 = vpop.f32.mrf.mxu1 }
 0x36d   :  { %3255 = vmatprep.subr.mxu1 %v5004_v35  ;;  %v2401_v31 = vmax.f32 %v2273_v58, 0.0  ;;  %v2275_v26 = vadd.f32 %v4306_v27, %v2125_v36  ;;  %v2129_v28 = vadd.f32 %v4439_v47, %v5019_v8  ;;  %v2277_v51 = vadd.f32 %v4309_v33, %v2127_v6  ;;  %v5026_v58 = vld [vmem:[#allocation78_spill] sm:$0xff] }
 0x36e   :  { %3287 = vmatpush1.msra.mxu1 %v5015_v54  ;;  %v2131_v0 = vadd.f32 %v4442_v19, %v5021_v44  ;;  %v4513_v42 = vrot.slane %v1922_v17, %v4291_v57  ;;  %v4516_v7 = vrot.slane %v1922_v17, %v4293_v39  ;;  %v2398_v16 = vmax.f32 %v2270_v45, 0.0  ;;  %v5033_v44 = vld [vmem:[#allocation79_spill] sm:$0xff] }
 0x36f   :  { %2654 = vmatmul.mubr.f32.gmra.mxu1 %v2390_v1  ;;  %2879 = vmatmul.mubr.f32.gmra.mxu0 %v2392_v46  ;;  %v2274_v15 = vadd.f32 %v4303_v34, %v2124_v14  ;;  %v2400_v47 = vmax.f32 %v2272_v22, 0.0  ;;  %v2276_v48 = vadd.f32 %v4312_v32, %v2126_v12  ;;  %v2128_v53 = vadd.f32 %v4450_v5, %v5022_v40  ;;  %v5023_v1 = vld [vmem:[#allocation75_spill] sm:$0xff]  ;;  %v5025_v46 = vld [vmem:[#allocation30_spill] sm:$0xff] }
 0x370   :  { %2658 = vmatprep.mubr.f32.mxu1 %v2395_v60  ;;  %2883 = vmatprep.mubr.f32.mxu0 %v2397_v13  ;;  %v4523_v19 = vrot.slane %v1922_v17, %v4286_v18  ;;  %v2403_v38 = vmax.f32 %v2275_v26, 0.0  ;;  %v2279_v50 = vadd.f32 %v4306_v27, %v2129_v28  ;;  %v2130_v62 = vadd.f32 %v4453_v49, %v5023_v1  ;;  %v5028_v60 = vld [vmem:[#allocation32_spill] sm:$0xff]  ;;  %v5031_v22 = vld [vmem:[#allocation18_spill] sm:$0xff]  ;;  %v5032_v26 = vld [vmem:[#allocation31_spill] sm:$0xff] }
 0x371   :  { %3256 = vmatprep.subr.mxu1 %v5004_v35  ;;  %v4532_v61 = vrot.slane %v1922_v17, %v4295_v43  ;;  %v2405_v4 = vmax.f32 %v2277_v51, 0.0  ;;  %v2281_v5 = vadd.f32 %v4309_v33, %v2131_v0  ;;  %v2133_v2 = vadd.f32 %v4513_v42, %v5025_v46  ;;  %v5027_v17 = vld [vmem:[#allocation29_spill] sm:$0xff]  ;;  %v5034_v40 = vld [vmem:[#allocation34_spill] sm:$0xff]  ;;  %v5037_v1 = vld [vmem:[#allocation83_spill] sm:$0xff] }
 0x372   :  { %3288 = vmatpush1.msra.mxu1 %v5020_v24  ;;  %v2135_v9 = vadd.f32 %v4516_v7, %v5026_v58  ;;  %v2402_v36 = vmax.f32 %v2274_v15, 0.0  ;;  %v2278_v49 = vadd.f32 %v4303_v34, %v2128_v53  ;;  %v2132_v54 = vadd.f32 %v4523_v19, %v5027_v17 }
 0x373   :  { %2659 = vmatmul.mubr.f32.gmra.mxu1 %v2394_v52  ;;  %2884 = vmatmul.mubr.f32.gmra.mxu0 %v2396_v63  ;;  %v2137_v13 = vadd.f32 %v4513_v42, %v5028_v60  ;;  %v2404_v6 = vmax.f32 %v2276_v48, 0.0  ;;  %v2280_v45 = vadd.f32 %v4312_v32, %v2130_v62  ;;  %v2134_v14 = vadd.f32 %v4532_v61, %v5029_v37  ;;  %v5030_v52 = vld [vmem:[#allocation81_spill] sm:$0xff] }
 0x374   :  { %2663 = vmatprep.mubr.f32.mxu1 %v2399_v20  ;;  %2888 = vmatprep.mubr.f32.mxu0 %v2401_v31  ;;  %v2139_v20 = vadd.f32 %v4516_v7, %v5030_v52  ;;  %v2407_v23 = vmax.f32 %v2279_v50, 0.0  ;;  %v2409_v12 = vmax.f32 %v2281_v5, 0.0  ;;  %v2283_v63 = vadd.f32 %v4306_v27, %v2133_v2  ;;  %v5036_v50 = vld [vmem:[#allocation82_spill] sm:$0xff]  ;;  %v5040_v2 = vld [vmem:[#allocation85_spill] sm:$0xff] }
 0x375   :  { %3257 = vmatprep.subr.mxu1 %v5004_v35  ;;  %v2285_v31 = vadd.f32 %v4309_v33, %v2135_v9  ;;  %v2136_v8 = vadd.f32 %v4523_v19, %v5032_v26  ;;  %v2406_v28 = vmax.f32 %v2278_v49, 0.0  ;;  %v2282_v24 = vadd.f32 %v4303_v34, %v2132_v54 }
 0x376   :  { %3289 = vmatpush1.msra.mxu1 %v5024_v10  ;;  %v2287_v51 = vadd.f32 %v4306_v27, %v2137_v13  ;;  %v2138_v0 = vadd.f32 %v4532_v61, %v5033_v44  ;;  %v2408_v15 = vmax.f32 %v2280_v45, 0.0  ;;  %v2289_v48 = vadd.f32 %v4309_v33, %v2139_v20  ;;  %v5042_v13 = vld [vmem:[#allocation84_spill] sm:$0xff]  ;;  %v5046_v44 = vld [vmem:[#allocation35_spill] sm:$0xff] }
 0x377   :  { %2664 = vmatmul.mubr.f32.gmra.mxu1 %v2398_v16  ;;  %2889 = vmatmul.mubr.f32.gmra.mxu0 %v2400_v47  ;;  %v4562_v16 = vpop.f32.mrf.mxu1  ;;  %v2284_v47 = vadd.f32 %v4312_v32, %v2134_v14  ;;  %v2141_v53 = vadd.f32 %v4513_v42, %v5034_v40  ;;  %v5038_v62 = vcombine.low %v5036_v50, %v5037_v1  ;;  %v2411_v5 = vmax.f32 %v2283_v63, 0.0  ;;  %v5043_v20 = vld [vmem:[#allocation36_spill] sm:$0xff]  ;;  %v5045_v63 = vld [vmem:[#allocation87_spill] sm:$0xff]  ;;  %v5047_v40 = vld [vmem:[#allocation86_spill] sm:$0xff] }
 0x378   :  { %2668 = vmatprep.mubr.f32.mxu1 %v2403_v38  ;;  %2893 = vmatprep.mubr.f32.mxu0 %v2405_v4  ;;  %v5035_v38 = vld [vmem:[#allocation80_spill] sm:$0xff]  ;;  %v2413_v46 = vmax.f32 %v2285_v31, 0.0  ;;  %v2143_v58 = vadd.f32 %v4516_v7, %v5040_v2  ;;  %v2286_v9 = vadd.f32 %v4303_v34, %v2136_v8  ;;  %v2410_v17 = vmax.f32 %v2282_v24, 0.0 }
 0x379   :  { %3258 = vmatprep.subr.mxu1 %v5004_v35  ;;  %v4573_v10 = vrot.slane %v5038_v62, %v5035_v38  ;;  %v5039_v4 = vld [vmem:[#allocation20_spill] sm:$0xff]  ;;  %v2415_v54 = vmax.f32 %v2287_v51, 0.0  ;;  %v2288_v60 = vadd.f32 %v4312_v32, %v2138_v0  ;;  %v4584_v45 = vpop.f32.mrf.mxu1  ;;  %v2412_v37 = vmax.f32 %v2284_v47, 0.0 }
 0x37a   :  { %3290 = vmatpush1.msra.mxu1 %v5031_v22  ;;  %v2417_v14 = vmax.f32 %v2289_v48, 0.0  ;;  %v2291_v52 = vadd.f32 %v4306_v27, %v2141_v53  ;;  %v2145_v22 = vadd.f32 %v4513_v42, %v5043_v20  ;;  %v2147_v31 = vadd.f32 %v4516_v7, %v5045_v63 }
 0x37b   :  { %2669 = vmatmul.mubr.f32.gmra.mxu1 %v2402_v36  ;;  %2894 = vmatmul.mubr.f32.gmra.mxu0 %v2404_v6  ;;  %v5041_v36 = vld [vmem:[#allocation33_spill] sm:$0xff]  ;;  %v2142_v6 = vadd.f32 %v4532_v61, %v5042_v13  ;;  %v4596_v26 = vrot.slane %v4573_v10, %v4291_v57  ;;  %v4600_v8 = vrot.slane %v4573_v10, %v4293_v39  ;;  %v2416_v24 = vmax.f32 %v2288_v60, 0.0 }
 0x37c   :  { %2673 = vmatprep.mubr.f32.mxu1 %v2407_v23  ;;  %2898 = vmatprep.mubr.f32.mxu0 %v2409_v12  ;;  %v2140_v49 = vadd.f32 %v4523_v19, %v5041_v36  ;;  %v5044_v23 = vld [vmem:[#allocation22_spill] sm:$0xff]  ;;  %v2293_v12 = vadd.f32 %v4309_v33, %v2143_v58  ;;  %v2144_v7 = vadd.f32 %v4523_v19, %v5046_v44  ;;  %v2419_v47 = vmax.f32 %v2291_v52, 0.0  ;;  %v5050_v36 = vld [vmem:[#allocation37_spill] sm:$0xff] }
 0x37d   :  { %3259 = vmatprep.subr.mxu1 %v5004_v35  ;;  %v2292_v51 = vadd.f32 %v4312_v32, %v2142_v6  ;;  %v4608_v0 = vrot.slane %v4573_v10, %v4286_v18  ;;  %v2295_v48 = vadd.f32 %v4306_v27, %v2145_v22  ;;  %v2146_v53 = vadd.f32 %v4532_v61, %v5047_v40 }
 0x37e   :  { %3291 = vmatpush1.msra.mxu1 %v5039_v4  ;;  %v2290_v42 = vadd.f32 %v4303_v34, %v2140_v49  ;;  %v4618_v62 = vrot.slane %v4573_v10, %v4295_v43  ;;  %v5048_v4 = vld [vmem:[#allocation24_spill] sm:$0xff]  ;;  %v2421_v19 = vmax.f32 %v2293_v12, 0.0  ;;  %v2151_v58 = vadd.f32 %v4600_v8, %v4385_v29  ;;  %v5053_v12 = vld [vmem:[#allocation39_spill] sm:$0xff] }
 0x37f   :  { %2674 = vmatmul.mubr.f32.gmra.mxu1 %v2406_v28  ;;  %2899 = vmatmul.mubr.f32.gmra.mxu0 %v2408_v15  ;;  %v2414_v28 = vmax.f32 %v2286_v9, 0.0  ;;  %v4610_v15 = vpop.f32.mrf.mxu1  ;;  %v2294_v9 = vadd.f32 %v4303_v34, %v2144_v7  ;;  %v2148_v49 = vadd.f32 %v4608_v0, %v5050_v36  ;;  %v2420_v13 = vmax.f32 %v2292_v51, 0.0  ;;  %v5054_v7 = vld [vmem:[#allocation42_spill] sm:$0xff] }
 0x380   :  { %2678 = vmatprep.mubr.f32.mxu1 %v2411_v5  ;;  %2903 = vmatprep.mubr.f32.mxu0 %v2413_v46  ;;  %v2297_v5 = vadd.f32 %v4309_v33, %v2147_v31  ;;  %v5049_v46 = vld [vmem:[#allocation38_spill] sm:$0xff]  ;;  %v2418_v61 = vmax.f32 %v2290_v42, 0.0  ;;  %v2296_v29 = vadd.f32 %v4312_v32, %v2146_v53  ;;  %v2150_v6 = vadd.f32 %v4618_v62, %v4371_v21  ;;  %v3322_v53 = vld [vmem:[#allocation7 + $0x100] sm:$0xff] }
 0x381   :  { %3260 = vmatprep.subr.mxu1 %v5004_v35  ;;  %v2149_v2 = vadd.f32 %v4596_v26, %v5049_v46  ;;  %v4631_v60 = vpop.f32.mrf.mxu1  ;;  %v2423_v52 = vmax.f32 %v2295_v48, 0.0  ;;  %v2152_v63 = vadd.f32 %v4608_v0, %v5053_v12  ;;  %v2422_v31 = vmax.f32 %v2294_v9, 0.0  ;;  %v5056_v46 = vld [vmem:[#allocation41_spill] sm:$0xff] }
 0x382   :  { %3292 = vmatpush1.msra.mxu1 %v5044_v23  ;;  %v2425_v20 = vmax.f32 %v2297_v5, 0.0  ;;  %v2301_v23 = vadd.f32 %v4309_v33, %v2151_v58  ;;  %v2298_v21 = vadd.f32 %v4303_v34, %v2148_v49  ;;  %v2300_v51 = vadd.f32 %v4312_v32, %v2150_v6  ;;  %v5057_v49 = vld [vmem:[#allocation44_spill] sm:$0xff] }
 0x383   :  { %2679 = vmatmul.mubr.f32.gmra.mxu1 %v2410_v17  ;;  %2904 = vmatmul.mubr.f32.gmra.mxu0 %v2412_v37  ;;  %v5051_v17 = vld [vmem:[#allocation40_spill] sm:$0xff]  ;;  %v2155_v37 = vadd.f32 %v4600_v8, %v4425_v55  ;;  %v2299_v22 = vadd.f32 %v4306_v27, %v2149_v2  ;;  %v4648_v42 = vpop.f32.mrf.mxu1  ;;  %v5055_v48 = vcombine.high %v5036_v50, %v5037_v1 }
 0x384   :  { %2683 = vmatprep.mubr.f32.mxu1 %v2415_v54  ;;  %2908 = vmatprep.mubr.f32.mxu0 %v2417_v14  ;;  %v2153_v54 = vadd.f32 %v4596_v26, %v5051_v17  ;;  %v5052_v14 = vld [vmem:[#allocation26_spill] sm:$0xff]  ;;  %v2302_v5 = vadd.f32 %v4303_v34, %v2152_v63  ;;  %v2156_v2 = vadd.f32 %v4608_v0, %v5056_v46  ;;  %v2426_v58 = vmax.f32 %v2298_v21, 0.0  ;;  %v3324_v21 = vld [vmem:[#allocation7 + $0x1f0] sm:$0xff] }
 0x385   :  { %3261 = vmatprep.subr.mxu1 %v5004_v35  ;;  %v2305_v44 = vadd.f32 %v4309_v33, %v2155_v37  ;;  %v4659_v40 = vrot.slane %v5055_v48, %v5035_v38  ;;  %v2158_v1 = vadd.f32 %v4618_v62, %v4444_v11  ;;  %v2161_v17 = vadd.f32 %v4596_v26, %v5057_v49 }
 0x386   :  { %3293 = vmatpush1.msra.mxu1 %v5048_v4  ;;  %v2303_v55 = vadd.f32 %v4306_v27, %v2153_v54  ;;  %v2429_v4 = vmax.f32 %v2301_v23, 0.0  ;;  %v3323_v54 = vld [vmem:[#allocation7 + $0x1f8] sm:$0xff]  ;;  %v2430_v37 = vmax.f32 %v2302_v5, 0.0  ;;  %v3325_v5 = vld [vmem:[#allocation7 + $0x1e8] sm:$0xff] }
 0x387   :  { %2684 = vmatmul.mubr.f32.gmra.mxu1 %v2414_v28  ;;  %2909 = vmatmul.mubr.f32.gmra.mxu0 %v2416_v24  ;;  %v2154_v28 = vadd.f32 %v4618_v62, %v4404_v25  ;;  %v2424_v24 = vmax.f32 %v2296_v29, 0.0  ;;  %v2427_v25 = vmax.f32 %v2299_v22, 0.0  ;;  %v2433_v9 = vmax.f32 %v2305_v44, 0.0 }
 0x388   :  { %2688 = vmatprep.mubr.f32.mxu1 %v2419_v47  ;;  %2913 = vmatprep.mubr.f32.mxu0 %v2421_v19  ;;  %v2157_v47 = vadd.f32 %v4596_v26, %v5054_v7  ;;  %v2159_v19 = vadd.f32 %v4600_v8, %v4467_v41  ;;  %v2431_v50 = vmax.f32 %v2303_v55, 0.0  ;;  %v2428_v41 = vmax.f32 %v2300_v51, 0.0  ;;  %v5060_v7 = vld [vmem:[#allocation48_spill] sm:$0xff] }
 0x389   :  { %3262 = vmatprep.subr.mxu1 %v5004_v35  ;;  %v2304_v38 = vadd.f32 %v4312_v32, %v2154_v28  ;;  %v2163_v29 = vadd.f32 %v4600_v8, %v4502_v56  ;;  %v4680_v11 = vrot.slane %v4659_v40, %v4291_v57  ;;  %v4684_v6 = vrot.slane %v4659_v40, %v4293_v39 }
 0x38a   :  { %3294 = vmatpush1.msra.mxu1 %v5052_v14  ;;  %v2307_v36 = vadd.f32 %v4306_v27, %v2157_v47  ;;  %v2306_v26 = vadd.f32 %v4303_v34, %v2156_v2  ;;  %v2162_v8 = vadd.f32 %v4618_v62, %v4484_v30  ;;  %v2311_v12 = vadd.f32 %v4306_v27, %v2161_v17  ;;  %v5059_v62 = vld [vmem:[#allocation46_spill] sm:$0xff] }
 0x38b   :  { %2689 = vmatmul.mubr.f32.gmra.mxu1 %v2418_v61  ;;  %2914 = vmatmul.mubr.f32.gmra.mxu0 %v2420_v13  ;;  %v4669_v61 = vpop.f32.mrf.mxu1  ;;  %v2309_v13 = vadd.f32 %v4309_v33, %v2159_v19  ;;  %v2432_v14 = vmax.f32 %v2304_v38, 0.0  ;;  %v4698_v63 = vrot.slane %v4659_v40, %v4286_v18  ;;  %v2313_v30 = vadd.f32 %v4309_v33, %v2163_v29  ;;  %v5062_v38 = vld [vmem:[#allocation47_spill] sm:$0xff] }
 0x38c   :  { %2693 = vmatprep.mubr.f32.mxu1 %v2423_v52  ;;  %2918 = vmatprep.mubr.f32.mxu0 %v2425_v20  ;;  %v2308_v52 = vadd.f32 %v4312_v32, %v2158_v1  ;;  %v5058_v20 = vld [vmem:[#allocation43_spill] sm:$0xff]  ;;  %v2435_v23 = vmax.f32 %v2307_v36, 0.0  ;;  %v2165_v55 = vadd.f32 %v4680_v11, %v5059_v62  ;;  %v2167_v28 = vadd.f32 %v4684_v6, %v4545_v3 }
 0x38d   :  { %3263 = vmatprep.subr.mxu1 %v5004_v35  ;;  %v2160_v56 = vadd.f32 %v4608_v0, %v5058_v20  ;;  %v4692_v22 = vpop.f32.mrf.mxu1  ;;  %v2437_v0 = vmax.f32 %v2309_v13, 0.0  ;;  %v2312_v44 = vadd.f32 %v4312_v32, %v2162_v8  ;;  %v2169_v47 = vadd.f32 %v4680_v11, %v5060_v7  ;;  %v5063_v13 = vld [vmem:[#allocation50_spill] sm:$0xff] }
 0x38e   :  { %3295 = vmatpush1.msra.mxu1 %v3322_v53  ;;  %v2436_v53 = vmax.f32 %v2308_v52, 0.0  ;;  %v2171_v19 = vadd.f32 %v4684_v6, %v4584_v45  ;;  %v2439_v46 = vmax.f32 %v2311_v12, 0.0  ;;  %v2441_v2 = vmax.f32 %v2313_v30, 0.0 }
 0x38f   :  { %2694 = vmatmul.mubr.f32.gmra.mxu1 %v2422_v31  ;;  %2919 = vmatmul.mubr.f32.gmra.mxu0 %v2424_v24  ;;  %v4702_v31 = vrot.slane %v4659_v40, %v4295_v43  ;;  %v2434_v24 = vmax.f32 %v2306_v26, 0.0  ;;  %v2310_v51 = vadd.f32 %v4303_v34, %v2160_v56  ;;  %v4713_v48 = vpop.f32.mrf.mxu1  ;;  %v2168_v1 = vadd.f32 %v4698_v63, %v5062_v38  ;;  %v3326_v26 = vld [vmem:[#allocation7 + $0x1e0] sm:$0xff]  ;;  %v5064_v56 = vld [vmem:[#allocation49_spill] sm:$0xff] }
 0x390   :  { %2698 = vmatprep.mubr.f32.mxu1 %v2427_v25  ;;  %2923 = vmatprep.mubr.f32.mxu0 %v2429_v4  ;;  %v5061_v25 = vld [vmem:[#allocation45_spill] sm:$0xff]  ;;  %v2173_v29 = vadd.f32 %v4680_v11, %v5063_v13  ;;  %v2175_v52 = vadd.f32 %v4684_v6, %v4631_v60  ;;  %v2172_v8 = vadd.f32 %v4698_v63, %v5064_v56 }
 0x391   :  { %3264 = vmatprep.subr.mxu1 %v5004_v35  ;;  %v2164_v3 = vadd.f32 %v4698_v63, %v5061_v25  ;;  %v2166_v4 = vadd.f32 %v4702_v31, %v4525_v59  ;;  %v2440_v59 = vmax.f32 %v2312_v44, 0.0  ;;  %v2170_v45 = vadd.f32 %v4702_v31, %v4562_v16  ;;  %v4729_v36 = vpop.f32.mrf.mxu1 }
 0x392   :  { %3296 = vmatpush2.msra.mxu1 %v3323_v54  ;;  %v2321_v54 = vadd.f32 %v4309_v33, %v2171_v19  ;;  %v2318_v20 = vadd.f32 %v4303_v34, %v2168_v1  ;;  %v2179_v44 = vadd.f32 %v4684_v6, %v4669_v61  ;;  %v5067_v1 = vld [vmem:[#allocation54_spill] sm:$0xff] }
 0x393   :  { %2699 = vmatmul.mubr.f32.gmra.mxu1 %v2426_v58  ;;  %2924 = vmatmul.mubr.f32.gmra.mxu0 %v2428_v41  ;;  %v2315_v58 = vadd.f32 %v4306_v27, %v2165_v55  ;;  %v2438_v41 = vmax.f32 %v2310_v51, 0.0  ;;  %v2314_v49 = vadd.f32 %v4303_v34, %v2164_v3  ;;  %v2316_v17 = vadd.f32 %v4312_v32, %v2166_v4  ;;  %v1504_v30 = vpop.f32.mrf.mxu1  ;;  %v5066_v4 = vld [vmem:[#allocation51_spill] sm:$0xff] }
 0x394   :  { %2703 = vmatprep.mubr.f32.mxu1 %v2431_v50  ;;  %2928 = vmatprep.mubr.f32.mxu0 %v2433_v9  ;;  %v2317_v50 = vadd.f32 %v4309_v33, %v2167_v28  ;;  %v2319_v9 = vadd.f32 %v4306_v27, %v2169_v47  ;;  %v2320_v12 = vadd.f32 %v4312_v32, %v2170_v45  ;;  %v2449_v55 = vmax.f32 %v2321_v54, 0.0  ;;  %v5069_v54 = vld [vmem:[#allocation53_spill] sm:$0xff] }
 0x395   :  { %3265 = vmatprep.subr.mxu1 %v5004_v35  ;;  %v2442_v60 = vmax.f32 %v2314_v49, 0.0  ;;  %v2444_v62 = vmax.f32 %v2316_v17, 0.0  ;;  %v2323_v28 = vadd.f32 %v4306_v27, %v2173_v29  ;;  %v2325_v51 = vadd.f32 %v4309_v33, %v2175_v52  ;;  %v1508_v6 = vpop.f32.mrf.mxu1 }
 0x396   :  { %3297 = vmatpush2.msra.mxu1 %v3324_v21  ;;  %v2445_v16 = vmax.f32 %v2317_v50, 0.0  ;;  %v5065_v21 = vld [vmem:[#allocation52_spill] sm:$0xff]  ;;  %v2446_v7 = vmax.f32 %v2318_v20, 0.0  ;;  %v2322_v47 = vadd.f32 %v4303_v34, %v2172_v8  ;;  %v2176_v61 = vadd.f32 %v4698_v63, %v5066_v4  ;;  %v5070_v20 = vld [vmem:[#allocation55_spill] sm:$0xff] }
 0x397   :  { %2704 = vmatmul.mubr.f32.gmra.mxu1 %v2430_v37  ;;  %2929 = vmatmul.mubr.f32.gmra.mxu0 %v2432_v14  ;;  %v1921_v37 = vcombine.high %v4573_v10, %v4573_v10  ;;  %v2443_v14 = vmax.f32 %v2315_v58, 0.0  ;;  %v2174_v10 = vadd.f32 %v4702_v31, %v4610_v15  ;;  %v2451_v19 = vmax.f32 %v2323_v28, 0.0  ;;  %v3328_v58 = vld [vmem:[#allocation7 + $0x1d0] sm:$0xff]  ;;  %v1510_v49 = vpop.f32.mrf.mxu1  ;;  %v5071_v28 = vld [vmem:[#allocation58_spill] sm:$0xff] }
 0x398   :  { %2708 = vmatprep.mubr.f32.mxu1 %v2435_v23  ;;  %2933 = vmatprep.mubr.f32.mxu0 %v2437_v0  ;;  %v2447_v23 = vmax.f32 %v2319_v9, 0.0  ;;  %v2177_v0 = vadd.f32 %v4680_v11, %v5065_v21  ;;  %v2453_v50 = vmax.f32 %v2325_v51, 0.0  ;;  %v2329_v38 = vadd.f32 %v4309_v33, %v2179_v44  ;;  %v5068_v9 = vld [vmem:[#allocation56_spill] sm:$0xff] }
 0x399   :  { %3266 = vmatprep.subr.mxu1 %v5004_v35  ;;  %v4755_v15 = vrot.slane %v1921_v37, %v4291_v57  ;;  %v4758_v11 = vrot.slane %v1921_v37, %v4293_v39  ;;  %v2324_v25 = vadd.f32 %v4312_v32, %v2174_v10  ;;  %v4795_v8 = vcombine.high %v4659_v40, %v4659_v40  ;;  %v1514_v10 = vpop.f32.mrf.mxu1  ;;  %v3330_v40 = vld [vmem:[#allocation7 + $0x1c0] sm:$0xff] }
 0x39a   :  { %3298 = vmatpush2.msra.mxu1 %v3325_v5  ;;  %v2327_v3 = vadd.f32 %v4306_v27, %v2177_v0  ;;  %v2178_v5 = vadd.f32 %v4702_v31, %v4648_v42  ;;  %v2450_v42 = vmax.f32 %v2322_v47, 0.0  ;;  %v5072_v47 = vld [vmem:[#allocation57_spill] sm:$0xff] }
 0x39b   :  { %2709 = vmatmul.mubr.f32.gmra.mxu1 %v2434_v24  ;;  %2934 = vmatmul.mubr.f32.gmra.mxu0 %v2436_v53  ;;  %v3327_v24 = vld [vmem:[#allocation7 + $0x1d8] sm:$0xff]  ;;  %v2448_v53 = vmax.f32 %v2320_v12, 0.0  ;;  %v2181_v63 = vadd.f32 %v4755_v15, %v5067_v1  ;;  %v2452_v31 = vmax.f32 %v2324_v25, 0.0  ;;  %v2185_v45 = vadd.f32 %v4755_v15, %v5068_v9  ;;  %v5074_v9 = vld [vmem:[#allocation59_spill] sm:$0xff] }
 0x39c   :  { %2713 = vmatprep.mubr.f32.mxu1 %v2439_v46  ;;  %2938 = vmatprep.mubr.f32.mxu0 %v2441_v2  ;;  %v4769_v46 = vrot.slane %v1921_v37, %v4286_v18  ;;  %v4772_v2 = vrot.slane %v1921_v37, %v4295_v43  ;;  %v2328_v17 = vadd.f32 %v4312_v32, %v2178_v5  ;;  %v3329_v37 = vld [vmem:[#allocation7 + $0x1c8] sm:$0xff] }
 0x39d   :  { %3267 = vmatprep.subr.mxu1 %v5004_v35  ;;  %v2187_v29 = vadd.f32 %v4758_v11, %v1504_v30  ;;  %v2191_v51 = vadd.f32 %v4758_v11, %v1510_v49  ;;  %v5073_v5 = vld [vmem:[#allocation60_spill] sm:$0xff]  ;;  %v2039_v49 = vrot.slane %v4795_v8, %v4286_v18 }
 0x39e   :  { %3299 = vmatpush2.msra.mxu1 %v3326_v26  ;;  %v2180_v13 = vadd.f32 %v4769_v46, %v5069_v54  ;;  %v2455_v26 = vmax.f32 %v2327_v3, 0.0  ;;  %v2184_v56 = vadd.f32 %v4769_v46, %v5070_v20  ;;  %v2186_v12 = vadd.f32 %v4772_v2, %v4729_v36  ;;  %v1516_v3 = vpop.f32.mrf.mxu1  ;;  %v3333_v20 = vld [vmem:[#allocation7 + $0x1a8] sm:$0xff] }
 0x39f   :  { %2714 = vmatmul.mubr.f32.gmra.mxu1 %v2438_v41  ;;  %2939 = vmatmul.mubr.f32.gmra.mxu0 %v2440_v59  ;;  %v2183_v41 = vadd.f32 %v4758_v11, %v4713_v48  ;;  %v2326_v59 = vadd.f32 %v4303_v34, %v2176_v61  ;;  %v2182_v48 = vadd.f32 %v4772_v2, %v4692_v22  ;;  %v2456_v21 = vmax.f32 %v2328_v17, 0.0  ;;  %v3332_v17 = vld [vmem:[#allocation7 + $0x1b0] sm:$0xff] }
 0x3a0   :  { %2718 = vmatprep.mubr.f32.mxu1 %v2443_v14  ;;  %2943 = vmatprep.mubr.f32.mxu0 %v2445_v16  ;;  %v2457_v14 = vmax.f32 %v2329_v38, 0.0  ;;  %v2331_v16 = vadd.f32 %v4306_v27, %v2181_v63  ;;  %v2330_v0 = vadd.f32 %v4303_v34, %v2180_v13  ;;  %v2334_v36 = vadd.f32 %v4303_v34, %v2184_v56 }
 0x3a1   :  { %3268 = vmatprep.subr.mxu1 %v5004_v35  ;;  %v2333_v52 = vadd.f32 %v4309_v33, %v2183_v41  ;;  %v2454_v22 = vmax.f32 %v2326_v59, 0.0  ;;  %v2332_v30 = vadd.f32 %v4312_v32, %v2182_v48  ;;  %v2190_v25 = vadd.f32 %v4772_v2, %v1508_v6  ;;  %v4824_v59 = vpop.f32.mrf.mxu1 }
 0x3a2   :  { %3300 = vmatpush2.msra.mxu1 %v3327_v24  ;;  %v2189_v24 = vadd.f32 %v4755_v15, %v5071_v28  ;;  %v2458_v4 = vmax.f32 %v2330_v0, 0.0  ;;  %v2341_v1 = vadd.f32 %v4309_v33, %v2191_v51  ;;  %v2195_v63 = vadd.f32 %v4758_v11, %v1516_v3  ;;  %v5079_v51 = vld [vmem:[#allocation66_spill] sm:$0xff] }
 0x3a3   :  { %2719 = vmatmul.mubr.f32.gmra.mxu1 %v2442_v60  ;;  %2944 = vmatmul.mubr.f32.gmra.mxu0 %v2444_v62  ;;  %v2337_v60 = vadd.f32 %v4309_v33, %v2187_v29  ;;  %v2459_v62 = vmax.f32 %v2331_v16, 0.0  ;;  %v2460_v61 = vmax.f32 %v2332_v30, 0.0  ;;  %v4820_v6 = vrot.slane %v4795_v8, %v4291_v57  ;;  %v5075_v29 = vld [vmem:[#allocation62_spill] sm:$0xff]  ;;  %v5076_v16 = vld [vmem:[#allocation61_spill] sm:$0xff] }
 0x3a4   :  { %2723 = vmatprep.mubr.f32.mxu1 %v2447_v23  ;;  %2948 = vmatprep.mubr.f32.mxu0 %v2449_v55  ;;  %v2335_v23 = vadd.f32 %v4306_v27, %v2185_v45  ;;  %v2461_v55 = vmax.f32 %v2333_v52, 0.0  ;;  %v2339_v38 = vadd.f32 %v4306_v27, %v2189_v24  ;;  %v2462_v41 = vmax.f32 %v2334_v36, 0.0 }
 0x3a5   :  { %3269 = vmatprep.subr.mxu1 %v5004_v35  ;;  %v2192_v57 = vadd.f32 %v4769_v46, %v5074_v9  ;;  %v2194_v45 = vadd.f32 %v4772_v2, %v1514_v10  ;;  %v2469_v13 = vmax.f32 %v2341_v1, 0.0  ;;  %v2345_v48 = vadd.f32 %v4309_v33, %v2195_v63  ;;  %v3338_v9 = vld [vmem:[#allocation7 + $0x180] sm:$0xff] }
 0x3a6   :  { %3301 = vmatpush2.msra.mxu1 %v3328_v58  ;;  %v2463_v44 = vmax.f32 %v2335_v23, 0.0  ;;  %v2193_v58 = vadd.f32 %v4755_v15, %v5073_v5  ;;  %v2467_v54 = vmax.f32 %v2339_v38, 0.0  ;;  %v2196_v52 = vadd.f32 %v2039_v49, %v5076_v16 }
 0x3a7   :  { %2724 = vmatmul.mubr.f32.gmra.mxu1 %v2446_v7  ;;  %2949 = vmatmul.mubr.f32.gmra.mxu0 %v2448_v53  ;;  %v2336_v7 = vadd.f32 %v4312_v32, %v2186_v12  ;;  %v2188_v53 = vadd.f32 %v4769_v46, %v5072_v47  ;;  %v1522_v46 = vpop.f32.mrf.mxu1  ;;  %v2342_v18 = vadd.f32 %v4303_v34, %v2192_v57  ;;  %v5077_v12 = vld [vmem:[#allocation64_spill] sm:$0xff]  ;;  %v3335_v47 = vld [vmem:[#allocation7 + $0x198] sm:$0xff] }
 0x3a8   :  { %2728 = vmatprep.mubr.f32.mxu1 %v2451_v19  ;;  %2953 = vmatprep.mubr.f32.mxu0 %v2453_v50  ;;  %v2465_v19 = vmax.f32 %v2337_v60, 0.0  ;;  %v3331_v50 = vld [vmem:[#allocation7 + $0x1b8] sm:$0xff]  ;;  %v2343_v11 = vadd.f32 %v4306_v27, %v2193_v58  ;;  %v2201_v10 = vadd.f32 %v4820_v6, %v5077_v12  ;;  %v2346_v60 = vadd.f32 %v4303_v34, %v2196_v52 }
 0x3a9   :  { %3270 = vmatprep.subr.mxu1 %v5004_v35  ;;  %v2338_v15 = vadd.f32 %v4303_v34, %v2188_v53  ;;  %v2470_v0 = vmax.f32 %v2342_v18, 0.0  ;;  %v2205_v36 = vadd.f32 %v4820_v6, %v5079_v51  ;;  %v2051_v58 = vrot.slane %v4795_v8, %v4293_v39 }
 0x3aa   :  { %3302 = vmatpush2.msra.mxu1 %v3329_v37  ;;  %v2197_v37 = vadd.f32 %v4820_v6, %v5075_v29  ;;  %v2471_v56 = vmax.f32 %v2343_v11, 0.0  ;;  %v2351_v24 = vadd.f32 %v4306_v27, %v2201_v10 }
 0x3ab   :  { %2729 = vmatmul.mubr.f32.gmra.mxu1 %v2450_v42  ;;  %2954 = vmatmul.mubr.f32.gmra.mxu0 %v2452_v31  ;;  %v2464_v42 = vmax.f32 %v2336_v7, 0.0  ;;  %v2340_v31 = vadd.f32 %v4312_v32, %v2190_v25  ;;  %v2474_v7 = vmax.f32 %v2346_v60, 0.0  ;;  %v5080_v25 = vld [vmem:[#allocation65_spill] sm:$0xff]  ;;  %v2199_v11 = vadd.f32 %v2051_v58, %v1522_v46 }
 0x3ac   :  { %2733 = vmatprep.mubr.f32.mxu1 %v2455_v26  ;;  %2958 = vmatprep.mubr.f32.mxu0 %v2457_v14  ;;  %v2466_v26 = vmax.f32 %v2338_v15, 0.0  ;;  %v2344_v14 = vadd.f32 %v4312_v32, %v2194_v45  ;;  %v2347_v23 = vadd.f32 %v4306_v27, %v2197_v37  ;;  %v2204_v3 = vadd.f32 %v2039_v49, %v5080_v25 }
 0x3ad   :  { %3271 = vmatprep.subr.mxu1 %v5004_v35  ;;  %v2468_v2 = vmax.f32 %v2340_v31, 0.0  ;;  %v2047_v15 = vrot.slane %v4795_v8, %v4295_v43  ;;  %v2349_v43 = vadd.f32 %v4309_v33, %v2199_v11 }
 0x3ae   :  { %3303 = vmatpush2.msra.mxu1 %v3330_v40  ;;  %v2472_v30 = vmax.f32 %v2344_v14, 0.0  ;;  %v5078_v40 = vld [vmem:[#allocation63_spill] sm:$0xff]  ;;  %v2475_v28 = vmax.f32 %v2347_v23, 0.0  ;;  %v2354_v63 = vadd.f32 %v4303_v34, %v2204_v3 }
 0x3af   :  { %2734 = vmatmul.mubr.f32.gmra.mxu1 %v2454_v22  ;;  %2959 = vmatmul.mubr.f32.gmra.mxu0 %v2456_v21  ;;  %v2473_v22 = vmax.f32 %v2345_v48, 0.0  ;;  %v1526_v21 = vpop.f32.mrf.mxu1  ;;  %v2477_v29 = vmax.f32 %v2349_v43, 0.0 }
 0x3b0   :  { %2738 = vmatprep.mubr.f32.mxu1 %v2459_v62  ;;  %2963 = vmatprep.mubr.f32.mxu0 %v2461_v55  ;;  %v2200_v62 = vadd.f32 %v2039_v49, %v5078_v40  ;;  %v3334_v55 = vld [vmem:[#allocation7 + $0x1a0] sm:$0xff]  ;;  %v2482_v45 = vmax.f32 %v2354_v63, 0.0 }
 0x3b1   :  { %3272 = vmatprep.subr.mxu1 %v5004_v35 }
 0x3b2   :  { %3304 = vmatpush2.msra.mxu1 %v3331_v50  ;;  %v2350_v53 = vadd.f32 %v4303_v34, %v2200_v62  ;;  %v3336_v50 = vld [vmem:[#allocation7 + $0x190] sm:$0xff] }
 0x3b3   :  { %2739 = vmatmul.mubr.f32.gmra.mxu1 %v2458_v4  ;;  %2964 = vmatmul.mubr.f32.gmra.mxu0 %v2460_v61  ;;  %v2479_v4 = vmax.f32 %v2351_v24, 0.0  ;;  %v2355_v61 = vadd.f32 %v4306_v27, %v2205_v36 }
 0x3b4   :  { %2743 = vmatprep.mubr.f32.mxu1 %v2463_v44  ;;  %2968 = vmatprep.mubr.f32.mxu0 %v2465_v19  ;;  %v1528_v44 = vpop.f32.mrf.mxu1  ;;  %v5081_v19 = vld [vmem:[#allocation68_spill] sm:$0xff]  ;;  %v2478_v1 = vmax.f32 %v2350_v53, 0.0 }
 0x3b5   :  { %3273 = vmatprep.subr.mxu1 %v5004_v35  ;;  %v2209_v5 = vadd.f32 %v4820_v6, %v5081_v19  ;;  %v2483_v31 = vmax.f32 %v2355_v61, 0.0  ;;  %v3337_v6 = vld [vmem:[#allocation7 + $0x188] sm:$0xff]  ;;  %v2203_v8 = vadd.f32 %v2051_v58, %v1528_v44 }
 0x3b6   :  { %3305 = vmatpush2.msra.mxu1 %v3332_v17  ;;  %v1532_v38 = vpop.f32.mrf.mxu1 }
 0x3b7   :  { %2744 = vmatmul.mubr.f32.gmra.mxu1 %v2462_v41  ;;  %2969 = vmatmul.mubr.f32.gmra.mxu0 %v2464_v42  ;;  %v5082_v41 = vld [vmem:[#allocation67_spill] sm:$0xff]  ;;  %v2359_v39 = vadd.f32 %v4306_v27, %v2209_v5  ;;  %v2353_v37 = vadd.f32 %v4309_v33, %v2203_v8 }
 0x3b8   :  { %2748 = vmatprep.mubr.f32.mxu1 %v2467_v54  ;;  %2973 = vmatprep.mubr.f32.mxu0 %v2469_v13  ;;  %v2208_v42 = vadd.f32 %v2039_v49, %v5082_v41  ;;  %v1534_v57 = vpop.f32.mrf.mxu1  ;;  %v2198_v49 = vadd.f32 %v2047_v15, %v4824_v59 }
 0x3b9   :  { %3274 = vmatprep.subr.mxu1 %v5004_v35  ;;  %v2487_v54 = vmax.f32 %v2359_v39, 0.0  ;;  %v2481_v18 = vmax.f32 %v2353_v37, 0.0 }
 0x3ba   :  { %3306 = vmatpush2.msra.mxu1 %v3333_v20  ;;  %v2358_v17 = vadd.f32 %v4303_v34, %v2208_v42  ;;  %v1538_v27 = vpop.f32.mrf.mxu1  ;;  %v2348_v48 = vadd.f32 %v4312_v32, %v2198_v49 }
 0x3bb   :  { %2749 = vmatmul.mubr.f32.gmra.mxu1 %v2466_v26  ;;  %2974 = vmatmul.mubr.f32.gmra.mxu0 %v2468_v2  ;;  %v2207_v26 = vadd.f32 %v2051_v58, %v1534_v57  ;;  %v2206_v2 = vadd.f32 %v2047_v15, %v1532_v38 }
 0x3bc   :  { %2753 = vmatprep.mubr.f32.mxu1 %v2471_v56  ;;  %2978 = vmatprep.mubr.f32.mxu0 %v2473_v22  ;;  %v2486_v13 = vmax.f32 %v2358_v17, 0.0  ;;  %v1540_v34 = vpop.f32.mrf.mxu1  ;;  %v2476_v46 = vmax.f32 %v2348_v48, 0.0  ;;  %v2210_v56 = vadd.f32 %v2047_v15, %v1538_v27 }
 0x3bd   :  { %3275 = vmatprep.subr.mxu1 %v5004_v35  ;;  %v2357_v14 = vadd.f32 %v4309_v33, %v2207_v26  ;;  %v2211_v16 = vadd.f32 %v2051_v58, %v1540_v34  ;;  %v2356_v20 = vadd.f32 %v4312_v32, %v2206_v2 }
 0x3be   :  { %3307 = vmatpush2.msra.mxu1 %v3334_v55  ;;  %v2360_v10 = vadd.f32 %v4312_v32, %v2210_v56 }
 0x3bf   :  { %2754 = vmatmul.mubr.f32.gmra.mxu1 %v2470_v0  ;;  %2979 = vmatmul.mubr.f32.gmra.mxu0 %v2472_v30  ;;  %v2485_v22 = vmax.f32 %v2357_v14, 0.0  ;;  %v2361_v23 = vadd.f32 %v4309_v33, %v2211_v16  ;;  %v2484_v12 = vmax.f32 %v2356_v20, 0.0 }
 0x3c0   :  { %2758 = vmatprep.mubr.f32.mxu1 %v2475_v28  ;;  %3276 = vmatprep.subr.mxu1 %v5004_v35  ;;  %v2488_v0 = vmax.f32 %v2360_v10, 0.0 }
 0x3c1   :  { %3308 = vmatpush2.msra.mxu1 %v3335_v47 }
 0x3c2   :  { %3277 = vmatprep.subr.mxu1 %v5004_v35 }
 0x3c3   :  { %2759 = vmatmul.mubr.f32.gmra.mxu1 %v2474_v7 }
 0x3c4   :  { %2763 = vmatprep.mubr.f32.mxu1 %v2479_v4  ;;  %3309 = vmatpush2.msra.mxu1 %v3336_v50 }
 0x3c5   :  { %3278 = vmatprep.subr.mxu1 %v5004_v35 }
 0x3c6   :  { %3310 = vmatpush2.msra.mxu1 %v3337_v6 }
 0x3c7   :  { %2764 = vmatmul.mubr.f32.gmra.mxu1 %v2478_v1  ;;  %3279 = vmatprep.subr.mxu1 %v5004_v35  ;;  %v2202_v35 = vadd.f32 %v2047_v15, %v1526_v21  ;;  %v2489_v21 = vmax.f32 %v2361_v23, 0.0 }
 0x3c8   :  { %2768 = vmatprep.mubr.f32.mxu1 %v2483_v31  ;;  %3311 = vmatpush2.msra.mxu1 %v3338_v9 }
 0x3c9   :  { %v2352_v59 = vadd.f32 %v4312_v32, %v2202_v35 }
 0x3cb   :  { %2769 = vmatmul.mubr.f32.gmra.mxu1 %v2482_v45  ;;  %v2480_v52 = vmax.f32 %v2352_v59, 0.0 }
 0x3cc   :  { %2773 = vmatprep.mubr.f32.mxu1 %v2487_v54 }
 0x3cf   :  { %2774 = vmatmul.mubr.f32.gmra.mxu1 %v2486_v13 }
 0x3d0   :  { %2983 = vmatprep.mubr.f32.mxu1 %v2477_v29 }
 0x3d3   :  { %2984 = vmatmul.mubr.f32.vlgmr.msra.gmra.mxu1 %v2476_v46 }
 0x3d4   :  { %2988 = vmatprep.mubr.f32.mxu1 %v2481_v18 }
 0x3d7   :  { %2989 = vmatmul.mubr.f32.gmra.mxu1 %v2480_v52 }
 0x3d8   :  { %2993 = vmatprep.mubr.f32.mxu1 %v2485_v22 }
 0x3db   :  { %2994 = vmatmul.mubr.f32.gmra.mxu1 %v2484_v12 }
 0x3dc   :  { %2998 = vmatprep.mubr.f32.mxu1 %v2489_v21 }
 0x3df   :  { %2999 = vmatmul.mubr.f32.gmra.mxu1 %v2488_v0 }
 0x413   :  { %v2620_v30 = vpop.f32.mrf.mxu1  ;;  %v2845_v60 = vpop.f32.mrf.mxu0 }
 0x414   :  { %v2846_v40 = vadd.f32 %v2845_v60, %v2620_v30 }
 0x415   :  { %v2622_v62 = vpop.f32.mrf.mxu1  ;;  %v2847_v55 = vpop.f32.mrf.mxu0 }
 0x417   :  { %v2625_v28 = vpop.f32.mrf.mxu1  ;;  %v2850_v24 = vpop.f32.mrf.mxu0 }
 0x418   :  { %v2851_v51 = vadd.f32 %v2850_v24, %v2625_v28 }
 0x419   :  { %v2627_v36 = vpop.f32.mrf.mxu1  ;;  %v2852_v33 = vpop.f32.mrf.mxu0 }
 0x41a   :  { %v3004_v44 = vmax.f32 %v2846_v40, %v2851_v51 }
 0x41b   :  { %v2630_v7 = vpop.f32.mrf.mxu1  ;;  %v2855_v47 = vpop.f32.mrf.mxu0 }
 0x41c   :  { %v2856_v53 = vadd.f32 %v2855_v47, %v2630_v7  ;;  %v4878_v7 = vld [vmem:[%s4909_s8] ss:$0 sm:$0xff]  ;;  %s3434_s8 = smov [#allocation8]  }
 0x41d   :  { %v2632_v32 = vpop.f32.mrf.mxu1  ;;  %v2857_v25 = vpop.f32.mrf.mxu0  ;;  %s3121_s11 = sshll.u32 %s3434_s8, 4  ;;  %s3122_s11 = int_to_ptr.vmem [resolvable:$true] %s3121_s11 }
 0x41e   :  { %v3005_v3 = vmax.f32 %v3004_v44, %v2856_v53  ;;  %s3399_s1 = scalar_lea.vmem %s3122_s11, 128  ;;  %p3404_p2 = scmp.lt.s32.totalorder %s3122_s11, %s3122_s11 }
 0x41f   :  { %v2635_v4 = vpop.f32.mrf.mxu1  ;;  %v2860_v61 = vpop.f32.mrf.mxu0  ;;  %p3400_p1 = scmp.ne.s32.totalorder %s3122_s11, %s3399_s1  ;;  %p3405_p3 = scmp.lt.s32.totalorder %s3399_s1, %s3399_s1 }
 0x420   :  { %v2861_v19 = vadd.f32 %v2860_v61, %v2635_v4 }
 0x421   :  { %v2637_v5 = vpop.f32.mrf.mxu1  ;;  %v2862_v58 = vpop.f32.mrf.mxu0  ;;  %p3406_p4 = por %p3405_p3, %p3404_p2 }
 0x422   :  { %v3006_v50 = vmax.f32 %v3005_v3, %v2861_v19 }
 0x423   :  { %v2640_v38 = vpop.f32.mrf.mxu1  ;;  %v2865_v1 = vpop.f32.mrf.mxu0  ;;  %p3407_p5 = pnand %p3406_p4, %p3400_p1 }
 0x424   :  { %v2866_v63 = vadd.f32 %v2865_v1, %v2640_v38  ;;  %v3007_v9 = vrot.slane %v3006_v50, 4 }
 0x425   :  { %v2642_v41 = vpop.f32.mrf.mxu1  ;;  %v2867_v42 = vpop.f32.mrf.mxu0 }
 0x426   :  { %v3008_v8 = vmax.f32 %v3006_v50, %v3007_v9 }
 0x427   :  { %v2645_v15 = vpop.f32.mrf.mxu1  ;;  %v2870_v31 = vpop.f32.mrf.mxu0 }
 0x428   :  { %v2871_v6 = vadd.f32 %v2870_v31, %v2645_v15  ;;  %v3009_v26 = vrot.slane %v3008_v8, 2 }
 0x429   :  { %v2647_v39 = vpop.f32.mrf.mxu1  ;;  %v2872_v11 = vpop.f32.mrf.mxu0 }
 0x42a   :  { %v3013_v57 = vmax.f32 %v2866_v63, %v2871_v6  ;;  %v3010_v52 = vmax.f32 %v3008_v8, %v3009_v26 }
 0x42b   :  { %v2650_v45 = vpop.f32.mrf.mxu1  ;;  %v2875_v17 = vpop.f32.mrf.mxu0 }
 0x42c   :  { %v2876_v49 = vadd.f32 %v2875_v17, %v2650_v45  ;;  %v3011_v0 = vrot.slane %v3010_v52, 1 }
 0x42d   :  { %v2652_v54 = vpop.f32.mrf.mxu1  ;;  %v2877_v43 = vpop.f32.mrf.mxu0 }
 0x42e   :  { %v3014_v27 = vmax.f32 %v3013_v57, %v2876_v49  ;;  %v3012_v36 = vmax.f32 %v3010_v52, %v3011_v0 }
 0x42f   :  { %v2655_v13 = vpop.f32.mrf.mxu1  ;;  %v2880_v48 = vpop.f32.mrf.mxu0 }
 0x430   :  { %v2881_v35 = vadd.f32 %v2880_v48, %v2655_v13  ;;  %v3083_v61 = vadd.f32 %v4878_v7, %v3012_v36 }
 0x431   :  { %v2657_v29 = vpop.f32.mrf.mxu1  ;;  %v2882_v37 = vpop.f32.mrf.mxu0 }
 0x432   :  { %v3015_v34 = vmax.f32 %v3014_v27, %v2881_v35 }
 0x433   :  { %v2660_v46 = vpop.f32.mrf.mxu1  ;;  %v2885_v59 = vpop.f32.mrf.mxu0 }
 0x434   :  { %v3016_v2 = vrot.slane %v3015_v34, 4  ;;  %v2886_v18 = vadd.f32 %v2885_v59, %v2660_v46 }
 0x435   :  { %v2662_v14 = vpop.f32.mrf.mxu1  ;;  %v2887_v16 = vpop.f32.mrf.mxu0 }
 0x436   :  { %v3017_v20 = vmax.f32 %v3015_v34, %v3016_v2 }
 0x437   :  { %v2665_v56 = vpop.f32.mrf.mxu1  ;;  %v2890_v22 = vpop.f32.mrf.mxu0 }
 0x438   :  { %v3018_v23 = vrot.slane %v3017_v20, 2  ;;  %v2891_v12 = vadd.f32 %v2890_v22, %v2665_v56 }
 0x439   :  { %v2667_v10 = vpop.f32.mrf.mxu1  ;;  %v2892_v21 = vpop.f32.mrf.mxu0 }
 0x43a   :  { %v3019_v30 = vmax.f32 %v3017_v20, %v3018_v23  ;;  %v3022_v60 = vmax.f32 %v2886_v18, %v2891_v12 }
 0x43b   :  { %v2670_v40 = vpop.f32.mrf.mxu1  ;;  %v2895_v62 = vpop.f32.mrf.mxu0 }
 0x43c   :  { %v3020_v55 = vrot.slane %v3019_v30, 1  ;;  %v2896_v28 = vadd.f32 %v2895_v62, %v2670_v40 }
 0x43d   :  { %v2672_v24 = vpop.f32.mrf.mxu1  ;;  %v2897_v51 = vpop.f32.mrf.mxu0 }
 0x43e   :  { %v3021_v33 = vmax.f32 %v3019_v30, %v3020_v55  ;;  %v3023_v44 = vmax.f32 %v3022_v60, %v2896_v28 }
 0x43f   :  { %v2675_v47 = vpop.f32.mrf.mxu1  ;;  %v2900_v53 = vpop.f32.mrf.mxu0 }
 0x440   :  { %v3084_v32 = vadd.f32 %v4878_v7, %v3021_v33  ;;  %v2901_v25 = vadd.f32 %v2900_v53, %v2675_v47 }
 0x441   :  { %v2677_v3 = vpop.f32.mrf.mxu1  ;;  %v2902_v4 = vpop.f32.mrf.mxu0 }
 0x442   :  { %v3099_v19 = vrot.slane %v3084_v32, 7  ;;  %v3024_v5 = vmax.f32 %v3023_v44, %v2901_v25 }
 0x443   :  { %v2680_v58 = vpop.f32.mrf.mxu1  ;;  %v2905_v50 = vpop.f32.mrf.mxu0 }
 0x444   :  { %v3100_v38 = vsel %vm1687_vm1, %v3099_v19, %v3083_v61  ;;  %v3025_v1 = vrot.slane %v3024_v5, 4  ;;  %v2906_v63 = vadd.f32 %v2905_v50, %v2680_v58 }
 0x445   :  { %v2682_v41 = vpop.f32.mrf.mxu1  ;;  %v2907_v42 = vpop.f32.mrf.mxu0 }
 0x446   :  { %v3026_v15 = vmax.f32 %v3024_v5, %v3025_v1 }
 0x447   :  { %v2685_v31 = vpop.f32.mrf.mxu1  ;;  %v2910_v6 = vpop.f32.mrf.mxu0 }
 0x448   :  { %v3027_v39 = vrot.slane %v3026_v15, 2  ;;  %v2911_v11 = vadd.f32 %v2910_v6, %v2685_v31 }
 0x449   :  { %v2687_v9 = vpop.f32.mrf.mxu1  ;;  %v2912_v57 = vpop.f32.mrf.mxu0 }
 0x44a   :  { %v3028_v45 = vmax.f32 %v3026_v15, %v3027_v39  ;;  %v3031_v17 = vmax.f32 %v2906_v63, %v2911_v11 }
 0x44b   :  { %v2690_v49 = vpop.f32.mrf.mxu1  ;;  %v2915_v54 = vpop.f32.mrf.mxu0 }
 0x44c   :  { %v3029_v43 = vrot.slane %v3028_v45, 1  ;;  %v2916_v8 = vadd.f32 %v2915_v54, %v2690_v49 }
 0x44d   :  { %v2692_v27 = vpop.f32.mrf.mxu1  ;;  %v2917_v13 = vpop.f32.mrf.mxu0 }
 0x44e   :  { %v3030_v48 = vmax.f32 %v3028_v45, %v3029_v43  ;;  %v3032_v35 = vmax.f32 %v3031_v17, %v2916_v8 }
 0x44f   :  { %v2695_v29 = vpop.f32.mrf.mxu1  ;;  %v2920_v37 = vpop.f32.mrf.mxu0 }
 0x450   :  { %v3085_v26 = vadd.f32 %v4878_v7, %v3030_v48  ;;  %v2921_v34 = vadd.f32 %v2920_v37, %v2695_v29 }
 0x451   :  { %v2697_v46 = vpop.f32.mrf.mxu1  ;;  %v2922_v59 = vpop.f32.mrf.mxu0 }
 0x452   :  { %v3101_v2 = vrot.slane %v3085_v26, 6  ;;  %v3033_v18 = vmax.f32 %v3032_v35, %v2921_v34 }
 0x453   :  { %v2700_v14 = vpop.f32.mrf.mxu1  ;;  %v2925_v16 = vpop.f32.mrf.mxu0 }
 0x454   :  { %v3034_v52 = vrot.slane %v3033_v18, 4  ;;  %v2926_v20 = vadd.f32 %v2925_v16, %v2700_v14  ;;  %v3102_v56 = vsel %vm1689_vm2, %v3101_v2, %v3100_v38 }
 0x455   :  { %v2702_v22 = vpop.f32.mrf.mxu1  ;;  %v2927_v23 = vpop.f32.mrf.mxu0 }
 0x456   :  { %v3035_v12 = vmax.f32 %v3033_v18, %v3034_v52 }
 0x457   :  { %v2705_v10 = vpop.f32.mrf.mxu1  ;;  %v2930_v21 = vpop.f32.mrf.mxu0 }
 0x458   :  { %v3036_v0 = vrot.slane %v3035_v12, 2  ;;  %v2931_v30 = vadd.f32 %v2930_v21, %v2705_v10 }
 0x459   :  { %v2707_v60 = vpop.f32.mrf.mxu1  ;;  %v2932_v40 = vpop.f32.mrf.mxu0 }
 0x45a   :  { %v3037_v62 = vmax.f32 %v3035_v12, %v3036_v0  ;;  %v3040_v55 = vmax.f32 %v2926_v20, %v2931_v30 }
 0x45b   :  { %v2710_v28 = vpop.f32.mrf.mxu1  ;;  %v2935_v24 = vpop.f32.mrf.mxu0 }
 0x45c   :  { %v3038_v51 = vrot.slane %v3037_v62, 1  ;;  %v2936_v36 = vadd.f32 %v2935_v24, %v2710_v28 }
 0x45d   :  { %v2712_v33 = vpop.f32.mrf.mxu1  ;;  %v2937_v44 = vpop.f32.mrf.mxu0 }
 0x45e   :  { %v3039_v47 = vmax.f32 %v3037_v62, %v3038_v51  ;;  %v3041_v3 = vmax.f32 %v3040_v55, %v2936_v36 }
 0x45f   :  { %v2715_v53 = vpop.f32.mrf.mxu1  ;;  %v2940_v32 = vpop.f32.mrf.mxu0 }
 0x460   :  { %v3086_v25 = vadd.f32 %v4878_v7, %v3039_v47  ;;  %v2941_v4 = vadd.f32 %v2940_v32, %v2715_v53 }
 0x461   :  { %v2717_v61 = vpop.f32.mrf.mxu1  ;;  %v2942_v19 = vpop.f32.mrf.mxu0 }
 0x462   :  { %v3103_v5 = vrot.slane %v3086_v25, 5  ;;  %v3042_v58 = vmax.f32 %v3041_v3, %v2941_v4 }
 0x463   :  { %v2720_v50 = vpop.f32.mrf.mxu1  ;;  %v2945_v38 = vpop.f32.mrf.mxu0 }
 0x464   :  { %v3043_v1 = vrot.slane %v3042_v58, 4  ;;  %v3104_v63 = vsel %vm1691_vm3, %v3103_v5, %v3102_v56  ;;  %v2946_v28 = vadd.f32 %v2945_v38, %v2720_v50 }
 0x465   :  { %v2722_v41 = vpop.f32.mrf.mxu1  ;;  %v2947_v42 = vpop.f32.mrf.mxu0 }
 0x466   :  { %v3044_v15 = vmax.f32 %v3042_v58, %v3043_v1 }
 0x467   :  { %v2725_v31 = vpop.f32.mrf.mxu1  ;;  %v2950_v6 = vpop.f32.mrf.mxu0 }
 0x468   :  { %v3045_v39 = vrot.slane %v3044_v15, 2  ;;  %v2951_v40 = vadd.f32 %v2950_v6, %v2725_v31 }
 0x469   :  { %v2727_v11 = vpop.f32.mrf.mxu1  ;;  %v2952_v9 = vpop.f32.mrf.mxu0 }
 0x46a   :  { %v3046_v57 = vmax.f32 %v3044_v15, %v3045_v39  ;;  %v3049_v44 = vmax.f32 %v2946_v28, %v2951_v40 }
 0x46b   :  { %v2730_v45 = vpop.f32.mrf.mxu1  ;;  %v2955_v17 = vpop.f32.mrf.mxu0 }
 0x46c   :  { %v3047_v49 = vrot.slane %v3046_v57, 1  ;;  %v2956_v24 = vadd.f32 %v2955_v17, %v2730_v45 }
 0x46d   :  { %v2732_v54 = vpop.f32.mrf.mxu1  ;;  %v2957_v43 = vpop.f32.mrf.mxu0 }
 0x46e   :  { %v3048_v8 = vmax.f32 %v3046_v57, %v3047_v49  ;;  %v3050_v3 = vmax.f32 %v3049_v44, %v2956_v24 }
 0x46f   :  { %v2735_v27 = vpop.f32.mrf.mxu1  ;;  %v2960_v13 = vpop.f32.mrf.mxu0 }
 0x470   :  { %v3087_v48 = vadd.f32 %v4878_v7, %v3048_v8  ;;  %v2961_v47 = vadd.f32 %v2960_v13, %v2735_v27 }
 0x471   :  { %v2737_v35 = vpop.f32.mrf.mxu1  ;;  %v2962_v29 = vpop.f32.mrf.mxu0 }
 0x472   :  { %v3105_v37 = vrot.slane %v3087_v48, 4  ;;  %v3051_v19 = vmax.f32 %v3050_v3, %v2961_v47 }
 0x473   :  { %v2740_v26 = vpop.f32.mrf.mxu1  ;;  %v2965_v34 = vpop.f32.mrf.mxu0 }
 0x474   :  { %v4889_v46 = vsel %vm1693_vm4, %v3105_v37, %v3104_v63  ;;  %v2966_v51 = vadd.f32 %v2965_v34, %v2740_v26  ;;  %v3052_v63 = vrot.slane %v3051_v19, 4 }
 0x475   :  { %v2742_v59 = vpop.f32.mrf.mxu1  ;;  %v2967_v2 = vpop.f32.mrf.mxu0 }
 0x476   :  { %v3053_v38 = vmax.f32 %v3051_v19, %v3052_v63 }
 0x477   :  { %v2745_v18 = vpop.f32.mrf.mxu1  ;;  %v2970_v14 = vpop.f32.mrf.mxu0 }
 0x478   :  { %v2971_v62 = vadd.f32 %v2970_v14, %v2745_v18  ;;  %v3054_v39 = vrot.slane %v3053_v38, 2 }
 0x479   :  { %v2747_v16 = vpop.f32.mrf.mxu1  ;;  %v2972_v52 = vpop.f32.mrf.mxu0 }
 0x47a   :  { %v3058_v53 = vmax.f32 %v2966_v51, %v2971_v62  ;;  %v3055_v54 = vmax.f32 %v3053_v38, %v3054_v39 }
 0x47b   :  { %v2750_v20 = vpop.f32.mrf.mxu1  ;;  %v2975_v56 = vpop.f32.mrf.mxu0 }
 0x47c   :  { %v2976_v36 = vadd.f32 %v2975_v56, %v2750_v20  ;;  %v3056_v29 = vrot.slane %v3055_v54, 1 }
 0x47d   :  { %v2752_v22 = vpop.f32.mrf.mxu1  ;;  %v2977_v23 = vpop.f32.mrf.mxu0 }
 0x47e   :  { %v3059_v4 = vmax.f32 %v3058_v53, %v2976_v36  ;;  %v3057_v59 = vmax.f32 %v3055_v54, %v3056_v29 }
 0x47f   :  { %v2755_v12 = vpop.f32.mrf.mxu1  ;;  %v2980_v10 = vpop.f32.mrf.mxu0 }
 0x480   :  { %v2981_v32 = vadd.f32 %v2980_v10, %v2755_v12  ;;  %v3088_v16 = vadd.f32 %v4878_v7, %v3057_v59 }
 0x481   :  { %v2757_v21 = vpop.f32.mrf.mxu1  ;;  %v2982_v0 = vpop.f32.mrf.mxu0 }
 0x482   :  { %v3060_v5 = vmax.f32 %v3059_v4, %v2981_v32  ;;  %v3107_v22 = vrot.slane %v3088_v16, 3 }
 0x483   :  { %v2760_v30 = vpop.f32.mrf.mxu1 }
 0x484   :  { %v3061_v41 = vrot.slane %v3060_v5, 4  ;;  %v3108_v21 = vsel %vm1695_vm5, %v3107_v22, %v4889_v46 }
 0x485   :  { %v2762_v60 = vpop.f32.mrf.mxu1 }
 0x486   :  { %v3062_v15 = vmax.f32 %v3060_v5, %v3061_v41 }
 0x487   :  { %v2765_v55 = vpop.f32.mrf.mxu1 }
 0x488   :  { %v3063_v9 = vrot.slane %v3062_v15, 2 }
 0x489   :  { %v2767_v33 = vpop.f32.mrf.mxu1 }
 0x48a   :  { %v3064_v8 = vmax.f32 %v3062_v15, %v3063_v9 }
 0x48b   :  { %v2770_v25 = vpop.f32.mrf.mxu1 }
 0x48c   :  { %v3065_v26 = vrot.slane %v3064_v8, 1 }
 0x48d   :  { %v2772_v61 = vpop.f32.mrf.mxu1 }
 0x48e   :  { %v3066_v18 = vmax.f32 %v3064_v8, %v3065_v26 }
 0x48f   :  { %v2775_v58 = vpop.f32.mrf.mxu1 }
 0x490   :  { %v3089_v20 = vadd.f32 %v4878_v7, %v3066_v18 }
 0x491   :  { %v2777_v1 = vpop.f32.mrf.mxu1 }
 0x492   :  { %v3109_v12 = vrot.slane %v3089_v20, 2 }
 0x493   :  { %v2985_v42 = vpop.f32.mrf.mxu1 }
 0x494   :  { %v2986_v45 = vadd.f32 %v2985_v42, %v2760_v30  ;;  %v3110_v30 = vsel %vm1697_vm6, %v3109_v12, %v3108_v21 }
 0x495   :  { %v2987_v50 = vpop.f32.mrf.mxu1 }
 0x497   :  { %v2990_v31 = vpop.f32.mrf.mxu1 }
 0x498   :  { %v2991_v11 = vadd.f32 %v2990_v31, %v2765_v55 }
 0x499   :  { %v2992_v6 = vpop.f32.mrf.mxu1 }
 0x49a   :  { %v3067_v43 = vmax.f32 %v2986_v45, %v2991_v11 }
 0x49b   :  { %v2995_v57 = vpop.f32.mrf.mxu1 }
 0x49c   :  { %v2996_v17 = vadd.f32 %v2995_v57, %v2770_v25 }
 0x49d   :  { %v2997_v49 = vpop.f32.mrf.mxu1 }
 0x49e   :  { %v3068_v13 = vmax.f32 %v3067_v43, %v2996_v17 }
 0x49f   :  { %v3000_v27 = vpop.f32.mrf.mxu1 }
 0x4a0   :  { %v3001_v48 = vadd.f32 %v3000_v27, %v2775_v58 }
 0x4a1   :  { %v3002_v35 = vpop.f32.mrf.mxu1 }
 0x4a2   :  { %v3069_v37 = vmax.f32 %v3068_v13, %v3001_v48 }
 0x4a4   :  { %v3070_v34 = vrot.slane %v3069_v37, 4 }
 0x4a6   :  { %v3071_v2 = vmax.f32 %v3069_v37, %v3070_v34 }
 0x4a8   :  { %v3072_v14 = vrot.slane %v3071_v2, 2 }
 0x4aa   :  { %v3073_v52 = vmax.f32 %v3071_v2, %v3072_v14 }
 0x4ac   :  { %v3074_v56 = vrot.slane %v3073_v52, 1 }
 0x4ae   :  { %v3075_v23 = vmax.f32 %v3073_v52, %v3074_v56 }
 0x4b0   :  { %v3090_v10 = vadd.f32 %v4878_v7, %v3075_v23 }
 0x4b2   :  { %v3111_v0 = vrot.slane %v3090_v10, 1 }
 0x4b4   :  { %v3112_v60 = vsel %vm1699_vm7, %v3111_v0, %v3110_v30 }
 0x4b5   :  { %3114 = vst [vmem:[#allocation8] sm:$0xff] %v3112_v60 }
 0x4b6   :  { %3410 = shalt.err (!%p3407_p5)
}
 0x4b7   :  { %3124 = dma.vmem_to_hbm [thread:$0]  %s3122_s11, 128, %s4910_s9, [#allocation4]  }
 0x4b8   :  { %3423 = dma.done.wait [#allocation4], 128  }
 0x4b9   :  { %3424 = vsyncadd [#allocation4], 4294967168 }
 0x4ba   :  { %3128 = vsyncpa [#allocation3], 1 }
 0x4bb   :  { %3129 = vsyncpa [#allocation6], 1 }
 0x4bc   :  { %3130 = vsyncpa [#allocation4], 1 }

</bundles_post_ra>
